<compile_context>
chip_gen: v7x
topology: tpu7x:2x2x1
jax: 0.10.0
libtpu: 0.0.40
codegen_flags: <defaults>
</compile_context>

<pallas_src>
import functools

import jax
import jax.numpy as jnp
from jax.experimental import pallas as pl


def _fuser_kernel(anchor_ref, test_ref, wq_ref, bq_ref, wkv_ref, bkv_ref,
                  wf_ref, bf_ref, out_ref, prob_ref, *, num_heads, qk_c):
    H, Qc = num_heads, qk_c
    E, A = anchor_ref.shape                       # anchor on lanes (A = lane axis)
    T = test_ref.shape[1] // A
    HQ = H * Qc

    # --- q projection for all heads: one (HQ, E) @ (E, A) MXU dot.
    #     (1/sqrt(Qc) is pre-folded into wq/bq in the wrapper.)
    q_all = jnp.dot(wq_ref[...], anchor_ref[...],
                    preferred_element_type=jnp.float32) + bq_ref[...]        # (HQ, A)

    # --- k|v projection for all heads & test images: one (HQ+HE, E) @ (E, T*A) dot.
    kv = jnp.dot(wkv_ref[...], test_ref[...],
                 preferred_element_type=jnp.float32) + bkv_ref[...]          # (HQ+HE, T*A)

    ctxs = []
    for h in range(H):                            # small static loop; 128-lane dense ops
        q_h = q_all[h * Qc:(h + 1) * Qc, :]                                  # (Qc, A)

        # scores[t, a] = <q[:, a], k_t[:, a]>  (per-t sublane reduce; lane-dense)
        scores = jnp.concatenate(
            [jnp.sum(q_h * kv[h * Qc:(h + 1) * Qc, t * A:(t + 1) * A],
                     axis=0, keepdims=True) for t in range(T)], axis=0)      # (T, A)

        # softmax over the T test images; divide on the EUP slot.
        m = jnp.max(scores, axis=0, keepdims=True)
        e = jnp.exp(scores - m)
        p = e * pl.reciprocal(jnp.sum(e, axis=0, keepdims=True), approx=True)  # (T, A)

        prob_ref[h] = p.astype(prob_ref.dtype)                               # lane-dense store

        # context: ctx[c, a] = sum_t p[t, a] * v_t[c, a]   (VPU, anchor on lanes)
        ctx_h = p[0:1, :] * kv[HQ + h * E:HQ + (h + 1) * E, 0:A]
        for t in range(1, T):
            ctx_h = ctx_h + p[t:t + 1, :] * kv[HQ + h * E:HQ + (h + 1) * E,
                                               t * A:(t + 1) * A]
        ctxs.append(ctx_h)                                                   # (E, A)

    # --- final_fc: one (E, HE) @ (HE, A) MXU dot (K = H*E), lane-dense output.
    ctx_all = jnp.concatenate(ctxs, axis=0).astype(wf_ref.dtype)             # (HE, A)
    out = jnp.dot(wf_ref[...], ctx_all,
                  preferred_element_type=jnp.float32) + bf_ref[...]          # (E, A)
    out_ref[...] = out.astype(out_ref.dtype)


def anchor2tests_fuser(anchor_feats, test_feats, params, num_heads=4,
                       compute_dtype=jnp.float32):
    """anchor_feats: (1, E, A), test_feats: (1, T, E, A) -> dict like the torch module.

    compute_dtype=jnp.bfloat16 is recommended on v6e/v7x (f32 accumulation is
    kept; biases stay f32); keep float32 on v5e.
    """
    Wq, bq, Wk, bk, Wv, bv, Wf, bf = params
    _, E, A = anchor_feats.shape
    _, T, _, _ = test_feats.shape
    H = num_heads
    Qc = Wq.shape[0] // H
    HQ = H * Qc
    HE = H * E
    scale = 1.0 / (Qc ** 0.5)

    # ---- layout glue (plain JAX, tiny tensors): anchor on lanes everywhere ----
    anchor_t = anchor_feats[0].astype(compute_dtype)                               # (E, A)
    test_t = jnp.transpose(test_feats[0], (1, 0, 2)).reshape(E, T * A).astype(compute_dtype)

    # Head-major packed weights.  torch channel conventions: q/k output channels
    # are '(Qc H)' (c = qc*H + h); v output / final_fc input channels are '(C H)'
    # (c = c*H + h).  Packed rows are head-major: q/k row = h*Qc + qc, v row = h*E + c.
    wq_p = jnp.transpose(Wq.reshape(Qc, H, E), (1, 0, 2)).reshape(HQ, E) * scale   # scale folded
    bq_p = jnp.transpose(bq.reshape(Qc, H), (1, 0)).reshape(HQ, 1) * scale
    wk_p = jnp.transpose(Wk.reshape(Qc, H, E), (1, 0, 2)).reshape(HQ, E)
    bk_p = jnp.transpose(bk.reshape(Qc, H), (1, 0)).reshape(HQ, 1)
    wv_p = jnp.transpose(Wv.reshape(E, H, E), (1, 0, 2)).reshape(HE, E)
    bv_p = jnp.transpose(bv.reshape(E, H), (1, 0)).reshape(HE, 1)

    w_q = wq_p.astype(compute_dtype)                                               # (HQ, E)
    b_q = bq_p.astype(jnp.float32)                                                 # (HQ, 1)
    w_kv = jnp.concatenate([wk_p, wv_p], axis=0).astype(compute_dtype)             # (HQ+HE, E)
    b_kv = jnp.concatenate([bk_p, bv_p], axis=0).astype(jnp.float32)               # (HQ+HE, 1)

    # final_fc: context rows are head-major (h*E + c); torch input channels are (c*H + h).
    w_f = jnp.transpose(Wf.reshape(E, E, H), (0, 2, 1)).reshape(E, HE).astype(compute_dtype)
    b_f = bf.reshape(E, 1).astype(jnp.float32)

    kernel = functools.partial(_fuser_kernel, num_heads=H, qk_c=Qc)

    def full(shape):
        return pl.BlockSpec(shape, lambda i, _n=len(shape): (0,) * _n)

    # TODO(synk): if this op is invoked repeatedly (per image / per layer), batch the
    # invocations into one pallas_call with a leading 'parallel' grid axis — this is
    # launch/overhead bound and that is also the only sensible way to feed v7x's 2 TCs.
    out, prob = pl.pallas_call(
        kernel,
        grid=(1,),
        in_specs=[
            full((E, A)),            # anchor (E on sublanes, A on lanes)
            full((E, T * A)),        # test, pre-flattened in the wrapper
            full((HQ, E)),           # packed W_q (scale folded)
            full((HQ, 1)),           # packed b_q (scale folded)
            full((HQ + HE, E)),      # packed W_k|W_v
            full((HQ + HE, 1)),      # packed b_k|b_v
            full((E, HE)),           # W_final (head-major input channels)
            full((E, 1)),            # b_final
        ],
        out_specs=[
            full((E, A)),            # attn_output (transposed to (A, E) in wrapper)
            full((H, T, A)),         # prob (lane-dense)
        ],
        out_shape=[
            jax.ShapeDtypeStruct((E, A), jnp.float32),
            jax.ShapeDtypeStruct((H, T, A), jnp.float32),
        ],
    )(anchor_t, test_t, w_q, b_q, w_kv, b_kv, w_f, b_f)

    attn_output = jnp.transpose(out, (1, 0))                      # (A, E)
    attn_weight = jnp.transpose(prob, (2, 0, 1))[:, :, None, :]   # (A, H, 1, T)
    return {"attn_output": attn_output, "attn_weight": attn_weight}


def reference(anchor_feats, test_feats, params, H):
    """Pure-JAX transliteration of the torch forward (for checking)."""
    Wq, bq, Wk, bk, Wv, bv, Wf, bf = params
    _, E, A = anchor_feats.shape
    _, T, _, _ = test_feats.shape
    Qc = Wq.shape[0] // H

    q = jnp.einsum('oe,ea->oa', Wq, anchor_feats[0]) + bq[:, None]        # (HQc, A)
    tf = test_feats[0]                                                    # (T, E, A)
    k = jnp.einsum('oe,tea->toa', Wk, tf) + bk[None, :, None]             # (T, HQc, A)
    v = jnp.einsum('oe,tea->toa', Wv, tf) + bv[None, :, None]             # (T, HE, A)

    query = jnp.transpose(q.reshape(Qc, H, A), (2, 0, 1))[..., None]      # (A, Qc, H, 1)
    key = jnp.transpose(k.reshape(T, Qc, H, A), (3, 1, 2, 0))             # (A, Qc, H, T)
    value = jnp.transpose(v.reshape(T, E, H, A), (3, 1, 2, 0))            # (A, E, H, T)

    scores = jnp.einsum('adhn,adhm->ahnm', query, key) / (Qc ** 0.5)      # (A, H, 1, T)
    prob = jax.nn.softmax(scores, axis=-1)
    x = jnp.einsum('ahnm,adhm->adhn', prob, value)[..., 0]                # (A, E, H)
    x = x.reshape(A, E * H)                                               # '(C H)'
    out = x @ Wf.T + bf                                                   # (A, E)
    return out, prob


def init_params(key, in_c, qk_c, num_heads):
    H = num_heads

    def conv1d_init(k, out_c, in_c_):
        bound = 1.0 / (in_c_ ** 0.5)
        kw, kb = jax.random.split(k)
        w = jax.random.uniform(kw, (out_c, in_c_), jnp.float32, -bound, bound)
        b = jax.random.uniform(kb, (out_c,), jnp.float32, -bound, bound)
        return w, b

    keys = jax.random.split(key, 4)
    Wq, bq = conv1d_init(keys[0], H * qk_c, in_c)
    Wk, bk = conv1d_init(keys[1], H * qk_c, in_c)
    Wv, bv = conv1d_init(keys[2], H * in_c, in_c)
    Wf, bf = conv1d_init(keys[3], in_c, H * in_c)
    return (Wq, bq, Wk, bk, Wv, bv, Wf, bf)


if __name__ == "__main__":
    key = jax.random.PRNGKey(0)
    in_c, qk_c, H = 32, 16, 4      # E = 32, Qc = 16, 4 heads
    A, T = 128, 8                  # anchors, test images

    kp, ka, kt = jax.random.split(key, 3)
    params = init_params(kp, in_c, qk_c, H)
    anchor_feats = jax.random.normal(ka, (1, in_c, A), jnp.float32)
    test_feats = jax.random.normal(kt, (1, T, in_c, A), jnp.float32)

    result = anchor2tests_fuser(anchor_feats, test_feats, params, num_heads=H)
    jax.block_until_ready(result)

    assert result["attn_output"].shape == (A, in_c)
    assert result["attn_weight"].shape == (A, H, 1, T)

    ref_out, ref_prob = reference(anchor_feats, test_feats, params, H)
    err_o = float(jnp.max(jnp.abs(result["attn_output"] - ref_out)))
    err_p = float(jnp.max(jnp.abs(result["attn_weight"] - ref_prob)))
    assert err_o < 5e-3 and err_p < 5e-3, (err_o, err_p)

    print("KERNEL_OK")
</pallas_src>

<mosaic_0001>
module attributes {stable_mosaic.version = 11 : i64} {
  func.func @_fuser_kernel(%arg0: i32, %arg1: memref<32x128xf32, #tpu.memory_space<vmem>>, %arg2: memref<32x1024xf32, #tpu.memory_space<vmem>>, %arg3: memref<64x32xf32, #tpu.memory_space<vmem>>, %arg4: memref<64x1xf32, #tpu.memory_space<vmem>>, %arg5: memref<192x32xf32, #tpu.memory_space<vmem>>, %arg6: memref<192x1xf32, #tpu.memory_space<vmem>>, %arg7: memref<32x128xf32, #tpu.memory_space<vmem>>, %arg8: memref<32x1xf32, #tpu.memory_space<vmem>>, %arg9: memref<32x128xf32, #tpu.memory_space<vmem>>, %arg10: memref<4x8x128xf32, #tpu.memory_space<vmem>>) attributes {dimension_semantics = [#tpu.dimension_semantics<arbitrary>], iteration_bounds = array<i64: 1>, scalar_prefetch = 0 : i64, scratch_operands = 0 : i64, tpu.core_type = #tpu.core_type<tc>, window_params = [{pipeline_mode = #tpu.pipeline_mode<synchronous>, transform_indices = @transform_0, window_bounds = array<i64: 32, 128>}, {pipeline_mode = #tpu.pipeline_mode<synchronous>, transform_indices = @transform_1, window_bounds = array<i64: 32, 1024>}, {pipeline_mode = #tpu.pipeline_mode<synchronous>, transform_indices = @transform_2, window_bounds = array<i64: 64, 32>}, {pipeline_mode = #tpu.pipeline_mode<synchronous>, transform_indices = @transform_3, window_bounds = array<i64: 64, 1>}, {pipeline_mode = #tpu.pipeline_mode<synchronous>, transform_indices = @transform_4, window_bounds = array<i64: 192, 32>}, {pipeline_mode = #tpu.pipeline_mode<synchronous>, transform_indices = @transform_5, window_bounds = array<i64: 192, 1>}, {pipeline_mode = #tpu.pipeline_mode<synchronous>, transform_indices = @transform_6, window_bounds = array<i64: 32, 128>}, {pipeline_mode = #tpu.pipeline_mode<synchronous>, transform_indices = @transform_7, window_bounds = array<i64: 32, 1>}, {pipeline_mode = #tpu.pipeline_mode<synchronous>, transform_indices = @transform_8, window_bounds = array<i64: 32, 128>}, {pipeline_mode = #tpu.pipeline_mode<synchronous>, transform_indices = @transform_9, window_bounds = array<i64: 4, 8, 128>}]} {
    %c0 = arith.constant 0 : index
    %c0_0 = arith.constant 0 : index
    %0 = vector.load %arg3[%c0, %c0_0] : memref<64x32xf32, #tpu.memory_space<vmem>>, vector<64x32xf32>
    %c0_1 = arith.constant 0 : index
    %c0_2 = arith.constant 0 : index
    %1 = vector.load %arg1[%c0_1, %c0_2] : memref<32x128xf32, #tpu.memory_space<vmem>>, vector<32x128xf32>
    %cst = arith.constant dense<0.000000e+00> : vector<64x128xf32>
    %2 = tpu.matmul %0, %1, %cst {dimension_numbers = #tpu.dot_dimension_numbers<[1], [0], [0], [1], [0, 0, 1, 1], [], []>} : vector<64x32xf32>, vector<32x128xf32>, vector<64x128xf32> -> vector<64x128xf32>
    %c0_3 = arith.constant 0 : index
    %c0_4 = arith.constant 0 : index
    %3 = vector.load %arg4[%c0_3, %c0_4] : memref<64x1xf32, #tpu.memory_space<vmem>>, vector<64x1xf32>
    %4 = vector.broadcast %3 : vector<64x1xf32> to vector<64x128xf32>
    %5 = arith.addf %2, %4 : vector<64x128xf32>
    %c0_5 = arith.constant 0 : index
    %c0_6 = arith.constant 0 : index
    %6 = vector.load %arg5[%c0_5, %c0_6] : memref<192x32xf32, #tpu.memory_space<vmem>>, vector<192x32xf32>
    %c0_7 = arith.constant 0 : index
    %c0_8 = arith.constant 0 : index
    %7 = vector.load %arg2[%c0_7, %c0_8] : memref<32x1024xf32, #tpu.memory_space<vmem>>, vector<32x1024xf32>
    %cst_9 = arith.constant dense<0.000000e+00> : vector<192x1024xf32>
    %8 = tpu.matmul %6, %7, %cst_9 {dimension_numbers = #tpu.dot_dimension_numbers<[1], [0], [0], [1], [0, 0, 1, 1], [], []>} : vector<192x32xf32>, vector<32x1024xf32>, vector<192x1024xf32> -> vector<192x1024xf32>
    %c0_10 = arith.constant 0 : index
    %c0_11 = arith.constant 0 : index
    %9 = vector.load %arg6[%c0_10, %c0_11] : memref<192x1xf32, #tpu.memory_space<vmem>>, vector<192x1xf32>
    %10 = vector.broadcast %9 : vector<192x1xf32> to vector<192x1024xf32>
    %11 = arith.addf %8, %10 : vector<192x1024xf32>
    %12 = vector.extract_strided_slice %5 {offsets = [0, 0], sizes = [16, 128], strides = [1, 1]} : vector<64x128xf32> to vector<16x128xf32>
    %13 = vector.extract_strided_slice %11 {offsets = [0, 0], sizes = [16, 128], strides = [1, 1]} : vector<192x1024xf32> to vector<16x128xf32>
    %14 = arith.mulf %12, %13 : vector<16x128xf32>
    %cst_12 = arith.constant dense<0.000000e+00> : vector<128xf32>
    %15 = vector.multi_reduction <add>, %14, %cst_12 [0] : vector<16x128xf32> to vector<128xf32>
    %16 = vector.shape_cast %15 : vector<128xf32> to vector<1x128xf32>
    %17 = vector.extract_strided_slice %11 {offsets = [0, 128], sizes = [16, 128], strides = [1, 1]} : vector<192x1024xf32> to vector<16x128xf32>
    %18 = arith.mulf %12, %17 : vector<16x128xf32>
    %cst_13 = arith.constant dense<0.000000e+00> : vector<128xf32>
    %19 = vector.multi_reduction <add>, %18, %cst_13 [0] : vector<16x128xf32> to vector<128xf32>
    %20 = vector.shape_cast %19 : vector<128xf32> to vector<1x128xf32>
    %21 = vector.extract_strided_slice %11 {offsets = [0, 256], sizes = [16, 128], strides = [1, 1]} : vector<192x1024xf32> to vector<16x128xf32>
    %22 = arith.mulf %12, %21 : vector<16x128xf32>
    %cst_14 = arith.constant dense<0.000000e+00> : vector<128xf32>
    %23 = vector.multi_reduction <add>, %22, %cst_14 [0] : vector<16x128xf32> to vector<128xf32>
    %24 = vector.shape_cast %23 : vector<128xf32> to vector<1x128xf32>
    %25 = vector.extract_strided_slice %11 {offsets = [0, 384], sizes = [16, 128], strides = [1, 1]} : vector<192x1024xf32> to vector<16x128xf32>
    %26 = arith.mulf %12, %25 : vector<16x128xf32>
    %cst_15 = arith.constant dense<0.000000e+00> : vector<128xf32>
    %27 = vector.multi_reduction <add>, %26, %cst_15 [0] : vector<16x128xf32> to vector<128xf32>
    %28 = vector.shape_cast %27 : vector<128xf32> to vector<1x128xf32>
    %29 = vector.extract_strided_slice %11 {offsets = [0, 512], sizes = [16, 128], strides = [1, 1]} : vector<192x1024xf32> to vector<16x128xf32>
    %30 = arith.mulf %12, %29 : vector<16x128xf32>
    %cst_16 = arith.constant dense<0.000000e+00> : vector<128xf32>
    %31 = vector.multi_reduction <add>, %30, %cst_16 [0] : vector<16x128xf32> to vector<128xf32>
    %32 = vector.shape_cast %31 : vector<128xf32> to vector<1x128xf32>
    %33 = vector.extract_strided_slice %11 {offsets = [0, 640], sizes = [16, 128], strides = [1, 1]} : vector<192x1024xf32> to vector<16x128xf32>
    %34 = arith.mulf %12, %33 : vector<16x128xf32>
    %cst_17 = arith.constant dense<0.000000e+00> : vector<128xf32>
    %35 = vector.multi_reduction <add>, %34, %cst_17 [0] : vector<16x128xf32> to vector<128xf32>
    %36 = vector.shape_cast %35 : vector<128xf32> to vector<1x128xf32>
    %37 = vector.extract_strided_slice %11 {offsets = [0, 768], sizes = [16, 128], strides = [1, 1]} : vector<192x1024xf32> to vector<16x128xf32>
    %38 = arith.mulf %12, %37 : vector<16x128xf32>
    %cst_18 = arith.constant dense<0.000000e+00> : vector<128xf32>
    %39 = vector.multi_reduction <add>, %38, %cst_18 [0] : vector<16x128xf32> to vector<128xf32>
    %40 = vector.shape_cast %39 : vector<128xf32> to vector<1x128xf32>
    %41 = vector.extract_strided_slice %11 {offsets = [0, 896], sizes = [16, 128], strides = [1, 1]} : vector<192x1024xf32> to vector<16x128xf32>
    %42 = arith.mulf %12, %41 : vector<16x128xf32>
    %cst_19 = arith.constant dense<0.000000e+00> : vector<128xf32>
    %43 = vector.multi_reduction <add>, %42, %cst_19 [0] : vector<16x128xf32> to vector<128xf32>
    %44 = vector.shape_cast %43 : vector<128xf32> to vector<1x128xf32>
    %45 = tpu.concatenate %16, %20, %24, %28, %32, %36, %40, %44 in 0 : vector<1x128xf32>, vector<1x128xf32>, vector<1x128xf32>, vector<1x128xf32>, vector<1x128xf32>, vector<1x128xf32>, vector<1x128xf32>, vector<1x128xf32> -> vector<8x128xf32>
    %cst_20 = arith.constant dense<0xFF800000> : vector<128xf32>
    %46 = vector.multi_reduction <maximumf>, %45, %cst_20 [0] : vector<8x128xf32> to vector<128xf32>
    %47 = vector.shape_cast %46 : vector<128xf32> to vector<1x128xf32>
    %48 = vector.broadcast %47 : vector<1x128xf32> to vector<8x128xf32>
    %49 = arith.subf %45, %48 : vector<8x128xf32>
    %50 = math.exp %49 : vector<8x128xf32>
    %cst_21 = arith.constant dense<0.000000e+00> : vector<128xf32>
    %51 = vector.multi_reduction <add>, %50, %cst_21 [0] : vector<8x128xf32> to vector<128xf32>
    %52 = vector.shape_cast %51 : vector<128xf32> to vector<1x128xf32>
    %53 = tpu.reciprocal %52 {approx = true} : vector<1x128xf32> -> vector<1x128xf32>
    %54 = vector.broadcast %53 : vector<1x128xf32> to vector<8x128xf32>
    %55 = arith.mulf %50, %54 : vector<8x128xf32>
    %c0_22 = arith.constant 0 : index
    %c0_23 = arith.constant 0 : index
    %c0_24 = arith.constant 0 : index
    %56 = vector.load %arg10[%c0_22, %c0_23, %c0_24] : memref<4x8x128xf32, #tpu.memory_space<vmem>>, vector<1x8x128xf32>
    %57 = vector.shape_cast %56 : vector<1x8x128xf32> to vector<8x128xf32>
    %58 = vector.shape_cast %55 : vector<8x128xf32> to vector<1x8x128xf32>
    tpu.vector_store %arg10[%c0_22, %c0_23, %c0_24], %58 {strides = array<i32>} : memref<4x8x128xf32, #tpu.memory_space<vmem>>, vector<1x8x128xf32>,
    %59 = vector.extract_strided_slice %55 {offsets = [0, 0], sizes = [1, 128], strides = [1, 1]} : vector<8x128xf32> to vector<1x128xf32>
    %60 = vector.extract_strided_slice %11 {offsets = [64, 0], sizes = [32, 128], strides = [1, 1]} : vector<192x1024xf32> to vector<32x128xf32>
    %61 = vector.broadcast %59 : vector<1x128xf32> to vector<32x128xf32>
    %62 = arith.mulf %61, %60 : vector<32x128xf32>
    %63 = vector.extract_strided_slice %55 {offsets = [1, 0], sizes = [1, 128], strides = [1, 1]} : vector<8x128xf32> to vector<1x128xf32>
    %64 = vector.extract_strided_slice %11 {offsets = [64, 128], sizes = [32, 128], strides = [1, 1]} : vector<192x1024xf32> to vector<32x128xf32>
    %65 = vector.broadcast %63 : vector<1x128xf32> to vector<32x128xf32>
    %66 = arith.mulf %65, %64 : vector<32x128xf32>
    %67 = arith.addf %62, %66 : vector<32x128xf32>
    %68 = vector.extract_strided_slice %55 {offsets = [2, 0], sizes = [1, 128], strides = [1, 1]} : vector<8x128xf32> to vector<1x128xf32>
    %69 = vector.extract_strided_slice %11 {offsets = [64, 256], sizes = [32, 128], strides = [1, 1]} : vector<192x1024xf32> to vector<32x128xf32>
    %70 = vector.broadcast %68 : vector<1x128xf32> to vector<32x128xf32>
    %71 = arith.mulf %70, %69 : vector<32x128xf32>
    %72 = arith.addf %67, %71 : vector<32x128xf32>
    %73 = vector.extract_strided_slice %55 {offsets = [3, 0], sizes = [1, 128], strides = [1, 1]} : vector<8x128xf32> to vector<1x128xf32>
    %74 = vector.extract_strided_slice %11 {offsets = [64, 384], sizes = [32, 128], strides = [1, 1]} : vector<192x1024xf32> to vector<32x128xf32>
    %75 = vector.broadcast %73 : vector<1x128xf32> to vector<32x128xf32>
    %76 = arith.mulf %75, %74 : vector<32x128xf32>
    %77 = arith.addf %72, %76 : vector<32x128xf32>
    %78 = vector.extract_strided_slice %55 {offsets = [4, 0], sizes = [1, 128], strides = [1, 1]} : vector<8x128xf32> to vector<1x128xf32>
    %79 = vector.extract_strided_slice %11 {offsets = [64, 512], sizes = [32, 128], strides = [1, 1]} : vector<192x1024xf32> to vector<32x128xf32>
    %80 = vector.broadcast %78 : vector<1x128xf32> to vector<32x128xf32>
    %81 = arith.mulf %80, %79 : vector<32x128xf32>
    %82 = arith.addf %77, %81 : vector<32x128xf32>
    %83 = vector.extract_strided_slice %55 {offsets = [5, 0], sizes = [1, 128], strides = [1, 1]} : vector<8x128xf32> to vector<1x128xf32>
    %84 = vector.extract_strided_slice %11 {offsets = [64, 640], sizes = [32, 128], strides = [1, 1]} : vector<192x1024xf32> to vector<32x128xf32>
    %85 = vector.broadcast %83 : vector<1x128xf32> to vector<32x128xf32>
    %86 = arith.mulf %85, %84 : vector<32x128xf32>
    %87 = arith.addf %82, %86 : vector<32x128xf32>
    %88 = vector.extract_strided_slice %55 {offsets = [6, 0], sizes = [1, 128], strides = [1, 1]} : vector<8x128xf32> to vector<1x128xf32>
    %89 = vector.extract_strided_slice %11 {offsets = [64, 768], sizes = [32, 128], strides = [1, 1]} : vector<192x1024xf32> to vector<32x128xf32>
    %90 = vector.broadcast %88 : vector<1x128xf32> to vector<32x128xf32>
    %91 = arith.mulf %90, %89 : vector<32x128xf32>
    %92 = arith.addf %87, %91 : vector<32x128xf32>
    %93 = vector.extract_strided_slice %55 {offsets = [7, 0], sizes = [1, 128], strides = [1, 1]} : vector<8x128xf32> to vector<1x128xf32>
    %94 = vector.extract_strided_slice %11 {offsets = [64, 896], sizes = [32, 128], strides = [1, 1]} : vector<192x1024xf32> to vector<32x128xf32>
    %95 = vector.broadcast %93 : vector<1x128xf32> to vector<32x128xf32>
    %96 = arith.mulf %95, %94 : vector<32x128xf32>
    %97 = arith.addf %92, %96 : vector<32x128xf32>
    %98 = vector.extract_strided_slice %5 {offsets = [16, 0], sizes = [16, 128], strides = [1, 1]} : vector<64x128xf32> to vector<16x128xf32>
    %99 = vector.extract_strided_slice %11 {offsets = [16, 0], sizes = [16, 128], strides = [1, 1]} : vector<192x1024xf32> to vector<16x128xf32>
    %100 = arith.mulf %98, %99 : vector<16x128xf32>
    %cst_25 = arith.constant dense<0.000000e+00> : vector<128xf32>
    %101 = vector.multi_reduction <add>, %100, %cst_25 [0] : vector<16x128xf32> to vector<128xf32>
    %102 = vector.shape_cast %101 : vector<128xf32> to vector<1x128xf32>
    %103 = vector.extract_strided_slice %11 {offsets = [16, 128], sizes = [16, 128], strides = [1, 1]} : vector<192x1024xf32> to vector<16x128xf32>
    %104 = arith.mulf %98, %103 : vector<16x128xf32>
    %cst_26 = arith.constant dense<0.000000e+00> : vector<128xf32>
    %105 = vector.multi_reduction <add>, %104, %cst_26 [0] : vector<16x128xf32> to vector<128xf32>
    %106 = vector.shape_cast %105 : vector<128xf32> to vector<1x128xf32>
    %107 = vector.extract_strided_slice %11 {offsets = [16, 256], sizes = [16, 128], strides = [1, 1]} : vector<192x1024xf32> to vector<16x128xf32>
    %108 = arith.mulf %98, %107 : vector<16x128xf32>
    %cst_27 = arith.constant dense<0.000000e+00> : vector<128xf32>
    %109 = vector.multi_reduction <add>, %108, %cst_27 [0] : vector<16x128xf32> to vector<128xf32>
    %110 = vector.shape_cast %109 : vector<128xf32> to vector<1x128xf32>
    %111 = vector.extract_strided_slice %11 {offsets = [16, 384], sizes = [16, 128], strides = [1, 1]} : vector<192x1024xf32> to vector<16x128xf32>
    %112 = arith.mulf %98, %111 : vector<16x128xf32>
    %cst_28 = arith.constant dense<0.000000e+00> : vector<128xf32>
    %113 = vector.multi_reduction <add>, %112, %cst_28 [0] : vector<16x128xf32> to vector<128xf32>
    %114 = vector.shape_cast %113 : vector<128xf32> to vector<1x128xf32>
    %115 = vector.extract_strided_slice %11 {offsets = [16, 512], sizes = [16, 128], strides = [1, 1]} : vector<192x1024xf32> to vector<16x128xf32>
    %116 = arith.mulf %98, %115 : vector<16x128xf32>
    %cst_29 = arith.constant dense<0.000000e+00> : vector<128xf32>
    %117 = vector.multi_reduction <add>, %116, %cst_29 [0] : vector<16x128xf32> to vector<128xf32>
    %118 = vector.shape_cast %117 : vector<128xf32> to vector<1x128xf32>
    %119 = vector.extract_strided_slice %11 {offsets = [16, 640], sizes = [16, 128], strides = [1, 1]} : vector<192x1024xf32> to vector<16x128xf32>
    %120 = arith.mulf %98, %119 : vector<16x128xf32>
    %cst_30 = arith.constant dense<0.000000e+00> : vector<128xf32>
    %121 = vector.multi_reduction <add>, %120, %cst_30 [0] : vector<16x128xf32> to vector<128xf32>
    %122 = vector.shape_cast %121 : vector<128xf32> to vector<1x128xf32>
    %123 = vector.extract_strided_slice %11 {offsets = [16, 768], sizes = [16, 128], strides = [1, 1]} : vector<192x1024xf32> to vector<16x128xf32>
    %124 = arith.mulf %98, %123 : vector<16x128xf32>
    %cst_31 = arith.constant dense<0.000000e+00> : vector<128xf32>
    %125 = vector.multi_reduction <add>, %124, %cst_31 [0] : vector<16x128xf32> to vector<128xf32>
    %126 = vector.shape_cast %125 : vector<128xf32> to vector<1x128xf32>
    %127 = vector.extract_strided_slice %11 {offsets = [16, 896], sizes = [16, 128], strides = [1, 1]} : vector<192x1024xf32> to vector<16x128xf32>
    %128 = arith.mulf %98, %127 : vector<16x128xf32>
    %cst_32 = arith.constant dense<0.000000e+00> : vector<128xf32>
    %129 = vector.multi_reduction <add>, %128, %cst_32 [0] : vector<16x128xf32> to vector<128xf32>
    %130 = vector.shape_cast %129 : vector<128xf32> to vector<1x128xf32>
    %131 = tpu.concatenate %102, %106, %110, %114, %118, %122, %126, %130 in 0 : vector<1x128xf32>, vector<1x128xf32>, vector<1x128xf32>, vector<1x128xf32>, vector<1x128xf32>, vector<1x128xf32>, vector<1x128xf32>, vector<1x128xf32> -> vector<8x128xf32>
    %cst_33 = arith.constant dense<0xFF800000> : vector<128xf32>
    %132 = vector.multi_reduction <maximumf>, %131, %cst_33 [0] : vector<8x128xf32> to vector<128xf32>
    %133 = vector.shape_cast %132 : vector<128xf32> to vector<1x128xf32>
    %134 = vector.broadcast %133 : vector<1x128xf32> to vector<8x128xf32>
    %135 = arith.subf %131, %134 : vector<8x128xf32>
    %136 = math.exp %135 : vector<8x128xf32>
    %cst_34 = arith.constant dense<0.000000e+00> : vector<128xf32>
    %137 = vector.multi_reduction <add>, %136, %cst_34 [0] : vector<8x128xf32> to vector<128xf32>
    %138 = vector.shape_cast %137 : vector<128xf32> to vector<1x128xf32>
    %139 = tpu.reciprocal %138 {approx = true} : vector<1x128xf32> -> vector<1x128xf32>
    %140 = vector.broadcast %139 : vector<1x128xf32> to vector<8x128xf32>
    %141 = arith.mulf %136, %140 : vector<8x128xf32>
    %c1 = arith.constant 1 : index
    %c0_35 = arith.constant 0 : index
    %c0_36 = arith.constant 0 : index
    %142 = vector.load %arg10[%c1, %c0_35, %c0_36] : memref<4x8x128xf32, #tpu.memory_space<vmem>>, vector<1x8x128xf32>
    %143 = vector.shape_cast %142 : vector<1x8x128xf32> to vector<8x128xf32>
    %144 = vector.shape_cast %141 : vector<8x128xf32> to vector<1x8x128xf32>
    tpu.vector_store %arg10[%c1, %c0_35, %c0_36], %144 {strides = array<i32>} : memref<4x8x128xf32, #tpu.memory_space<vmem>>, vector<1x8x128xf32>,
    %145 = vector.extract_strided_slice %141 {offsets = [0, 0], sizes = [1, 128], strides = [1, 1]} : vector<8x128xf32> to vector<1x128xf32>
    %146 = vector.extract_strided_slice %11 {offsets = [96, 0], sizes = [32, 128], strides = [1, 1]} : vector<192x1024xf32> to vector<32x128xf32>
    %147 = vector.broadcast %145 : vector<1x128xf32> to vector<32x128xf32>
    %148 = arith.mulf %147, %146 : vector<32x128xf32>
    %149 = vector.extract_strided_slice %141 {offsets = [1, 0], sizes = [1, 128], strides = [1, 1]} : vector<8x128xf32> to vector<1x128xf32>
    %150 = vector.extract_strided_slice %11 {offsets = [96, 128], sizes = [32, 128], strides = [1, 1]} : vector<192x1024xf32> to vector<32x128xf32>
    %151 = vector.broadcast %149 : vector<1x128xf32> to vector<32x128xf32>
    %152 = arith.mulf %151, %150 : vector<32x128xf32>
    %153 = arith.addf %148, %152 : vector<32x128xf32>
    %154 = vector.extract_strided_slice %141 {offsets = [2, 0], sizes = [1, 128], strides = [1, 1]} : vector<8x128xf32> to vector<1x128xf32>
    %155 = vector.extract_strided_slice %11 {offsets = [96, 256], sizes = [32, 128], strides = [1, 1]} : vector<192x1024xf32> to vector<32x128xf32>
    %156 = vector.broadcast %154 : vector<1x128xf32> to vector<32x128xf32>
    %157 = arith.mulf %156, %155 : vector<32x128xf32>
    %158 = arith.addf %153, %157 : vector<32x128xf32>
    %159 = vector.extract_strided_slice %141 {offsets = [3, 0], sizes = [1, 128], strides = [1, 1]} : vector<8x128xf32> to vector<1x128xf32>
    %160 = vector.extract_strided_slice %11 {offsets = [96, 384], sizes = [32, 128], strides = [1, 1]} : vector<192x1024xf32> to vector<32x128xf32>
    %161 = vector.broadcast %159 : vector<1x128xf32> to vector<32x128xf32>
    %162 = arith.mulf %161, %160 : vector<32x128xf32>
    %163 = arith.addf %158, %162 : vector<32x128xf32>
    %164 = vector.extract_strided_slice %141 {offsets = [4, 0], sizes = [1, 128], strides = [1, 1]} : vector<8x128xf32> to vector<1x128xf32>
    %165 = vector.extract_strided_slice %11 {offsets = [96, 512], sizes = [32, 128], strides = [1, 1]} : vector<192x1024xf32> to vector<32x128xf32>
    %166 = vector.broadcast %164 : vector<1x128xf32> to vector<32x128xf32>
    %167 = arith.mulf %166, %165 : vector<32x128xf32>
    %168 = arith.addf %163, %167 : vector<32x128xf32>
    %169 = vector.extract_strided_slice %141 {offsets = [5, 0], sizes = [1, 128], strides = [1, 1]} : vector<8x128xf32> to vector<1x128xf32>
    %170 = vector.extract_strided_slice %11 {offsets = [96, 640], sizes = [32, 128], strides = [1, 1]} : vector<192x1024xf32> to vector<32x128xf32>
    %171 = vector.broadcast %169 : vector<1x128xf32> to vector<32x128xf32>
    %172 = arith.mulf %171, %170 : vector<32x128xf32>
    %173 = arith.addf %168, %172 : vector<32x128xf32>
    %174 = vector.extract_strided_slice %141 {offsets = [6, 0], sizes = [1, 128], strides = [1, 1]} : vector<8x128xf32> to vector<1x128xf32>
    %175 = vector.extract_strided_slice %11 {offsets = [96, 768], sizes = [32, 128], strides = [1, 1]} : vector<192x1024xf32> to vector<32x128xf32>
    %176 = vector.broadcast %174 : vector<1x128xf32> to vector<32x128xf32>
    %177 = arith.mulf %176, %175 : vector<32x128xf32>
    %178 = arith.addf %173, %177 : vector<32x128xf32>
    %179 = vector.extract_strided_slice %141 {offsets = [7, 0], sizes = [1, 128], strides = [1, 1]} : vector<8x128xf32> to vector<1x128xf32>
    %180 = vector.extract_strided_slice %11 {offsets = [96, 896], sizes = [32, 128], strides = [1, 1]} : vector<192x1024xf32> to vector<32x128xf32>
    %181 = vector.broadcast %179 : vector<1x128xf32> to vector<32x128xf32>
    %182 = arith.mulf %181, %180 : vector<32x128xf32>
    %183 = arith.addf %178, %182 : vector<32x128xf32>
    %184 = vector.extract_strided_slice %5 {offsets = [32, 0], sizes = [16, 128], strides = [1, 1]} : vector<64x128xf32> to vector<16x128xf32>
    %185 = vector.extract_strided_slice %11 {offsets = [32, 0], sizes = [16, 128], strides = [1, 1]} : vector<192x1024xf32> to vector<16x128xf32>
    %186 = arith.mulf %184, %185 : vector<16x128xf32>
    %cst_37 = arith.constant dense<0.000000e+00> : vector<128xf32>
    %187 = vector.multi_reduction <add>, %186, %cst_37 [0] : vector<16x128xf32> to vector<128xf32>
    %188 = vector.shape_cast %187 : vector<128xf32> to vector<1x128xf32>
    %189 = vector.extract_strided_slice %11 {offsets = [32, 128], sizes = [16, 128], strides = [1, 1]} : vector<192x1024xf32> to vector<16x128xf32>
    %190 = arith.mulf %184, %189 : vector<16x128xf32>
    %cst_38 = arith.constant dense<0.000000e+00> : vector<128xf32>
    %191 = vector.multi_reduction <add>, %190, %cst_38 [0] : vector<16x128xf32> to vector<128xf32>
    %192 = vector.shape_cast %191 : vector<128xf32> to vector<1x128xf32>
    %193 = vector.extract_strided_slice %11 {offsets = [32, 256], sizes = [16, 128], strides = [1, 1]} : vector<192x1024xf32> to vector<16x128xf32>
    %194 = arith.mulf %184, %193 : vector<16x128xf32>
    %cst_39 = arith.constant dense<0.000000e+00> : vector<128xf32>
    %195 = vector.multi_reduction <add>, %194, %cst_39 [0] : vector<16x128xf32> to vector<128xf32>
    %196 = vector.shape_cast %195 : vector<128xf32> to vector<1x128xf32>
    %197 = vector.extract_strided_slice %11 {offsets = [32, 384], sizes = [16, 128], strides = [1, 1]} : vector<192x1024xf32> to vector<16x128xf32>
    %198 = arith.mulf %184, %197 : vector<16x128xf32>
    %cst_40 = arith.constant dense<0.000000e+00> : vector<128xf32>
    %199 = vector.multi_reduction <add>, %198, %cst_40 [0] : vector<16x128xf32> to vector<128xf32>
    %200 = vector.shape_cast %199 : vector<128xf32> to vector<1x128xf32>
    %201 = vector.extract_strided_slice %11 {offsets = [32, 512], sizes = [16, 128], strides = [1, 1]} : vector<192x1024xf32> to vector<16x128xf32>
    %202 = arith.mulf %184, %201 : vector<16x128xf32>
    %cst_41 = arith.constant dense<0.000000e+00> : vector<128xf32>
    %203 = vector.multi_reduction <add>, %202, %cst_41 [0] : vector<16x128xf32> to vector<128xf32>
    %204 = vector.shape_cast %203 : vector<128xf32> to vector<1x128xf32>
    %205 = vector.extract_strided_slice %11 {offsets = [32, 640], sizes = [16, 128], strides = [1, 1]} : vector<192x1024xf32> to vector<16x128xf32>
    %206 = arith.mulf %184, %205 : vector<16x128xf32>
    %cst_42 = arith.constant dense<0.000000e+00> : vector<128xf32>
    %207 = vector.multi_reduction <add>, %206, %cst_42 [0] : vector<16x128xf32> to vector<128xf32>
    %208 = vector.shape_cast %207 : vector<128xf32> to vector<1x128xf32>
    %209 = vector.extract_strided_slice %11 {offsets = [32, 768], sizes = [16, 128], strides = [1, 1]} : vector<192x1024xf32> to vector<16x128xf32>
    %210 = arith.mulf %184, %209 : vector<16x128xf32>
    %cst_43 = arith.constant dense<0.000000e+00> : vector<128xf32>
    %211 = vector.multi_reduction <add>, %210, %cst_43 [0] : vector<16x128xf32> to vector<128xf32>
    %212 = vector.shape_cast %211 : vector<128xf32> to vector<1x128xf32>
    %213 = vector.extract_strided_slice %11 {offsets = [32, 896], sizes = [16, 128], strides = [1, 1]} : vector<192x1024xf32> to vector<16x128xf32>
    %214 = arith.mulf %184, %213 : vector<16x128xf32>
    %cst_44 = arith.constant dense<0.000000e+00> : vector<128xf32>
    %215 = vector.multi_reduction <add>, %214, %cst_44 [0] : vector<16x128xf32> to vector<128xf32>
    %216 = vector.shape_cast %215 : vector<128xf32> to vector<1x128xf32>
    %217 = tpu.concatenate %188, %192, %196, %200, %204, %208, %212, %216 in 0 : vector<1x128xf32>, vector<1x128xf32>, vector<1x128xf32>, vector<1x128xf32>, vector<1x128xf32>, vector<1x128xf32>, vector<1x128xf32>, vector<1x128xf32> -> vector<8x128xf32>
    %cst_45 = arith.constant dense<0xFF800000> : vector<128xf32>
    %218 = vector.multi_reduction <maximumf>, %217, %cst_45 [0] : vector<8x128xf32> to vector<128xf32>
    %219 = vector.shape_cast %218 : vector<128xf32> to vector<1x128xf32>
    %220 = vector.broadcast %219 : vector<1x128xf32> to vector<8x128xf32>
    %221 = arith.subf %217, %220 : vector<8x128xf32>
    %222 = math.exp %221 : vector<8x128xf32>
    %cst_46 = arith.constant dense<0.000000e+00> : vector<128xf32>
    %223 = vector.multi_reduction <add>, %222, %cst_46 [0] : vector<8x128xf32> to vector<128xf32>
    %224 = vector.shape_cast %223 : vector<128xf32> to vector<1x128xf32>
    %225 = tpu.reciprocal %224 {approx = true} : vector<1x128xf32> -> vector<1x128xf32>
    %226 = vector.broadcast %225 : vector<1x128xf32> to vector<8x128xf32>
    %227 = arith.mulf %222, %226 : vector<8x128xf32>
    %c2 = arith.constant 2 : index
    %c0_47 = arith.constant 0 : index
    %c0_48 = arith.constant 0 : index
    %228 = vector.load %arg10[%c2, %c0_47, %c0_48] : memref<4x8x128xf32, #tpu.memory_space<vmem>>, vector<1x8x128xf32>
    %229 = vector.shape_cast %228 : vector<1x8x128xf32> to vector<8x128xf32>
    %230 = vector.shape_cast %227 : vector<8x128xf32> to vector<1x8x128xf32>
    tpu.vector_store %arg10[%c2, %c0_47, %c0_48], %230 {strides = array<i32>} : memref<4x8x128xf32, #tpu.memory_space<vmem>>, vector<1x8x128xf32>,
    %231 = vector.extract_strided_slice %227 {offsets = [0, 0], sizes = [1, 128], strides = [1, 1]} : vector<8x128xf32> to vector<1x128xf32>
    %232 = vector.extract_strided_slice %11 {offsets = [128, 0], sizes = [32, 128], strides = [1, 1]} : vector<192x1024xf32> to vector<32x128xf32>
    %233 = vector.broadcast %231 : vector<1x128xf32> to vector<32x128xf32>
    %234 = arith.mulf %233, %232 : vector<32x128xf32>
    %235 = vector.extract_strided_slice %227 {offsets = [1, 0], sizes = [1, 128], strides = [1, 1]} : vector<8x128xf32> to vector<1x128xf32>
    %236 = vector.extract_strided_slice %11 {offsets = [128, 128], sizes = [32, 128], strides = [1, 1]} : vector<192x1024xf32> to vector<32x128xf32>
    %237 = vector.broadcast %235 : vector<1x128xf32> to vector<32x128xf32>
    %238 = arith.mulf %237, %236 : vector<32x128xf32>
    %239 = arith.addf %234, %238 : vector<32x128xf32>
    %240 = vector.extract_strided_slice %227 {offsets = [2, 0], sizes = [1, 128], strides = [1, 1]} : vector<8x128xf32> to vector<1x128xf32>
    %241 = vector.extract_strided_slice %11 {offsets = [128, 256], sizes = [32, 128], strides = [1, 1]} : vector<192x1024xf32> to vector<32x128xf32>
    %242 = vector.broadcast %240 : vector<1x128xf32> to vector<32x128xf32>
    %243 = arith.mulf %242, %241 : vector<32x128xf32>
    %244 = arith.addf %239, %243 : vector<32x128xf32>
    %245 = vector.extract_strided_slice %227 {offsets = [3, 0], sizes = [1, 128], strides = [1, 1]} : vector<8x128xf32> to vector<1x128xf32>
    %246 = vector.extract_strided_slice %11 {offsets = [128, 384], sizes = [32, 128], strides = [1, 1]} : vector<192x1024xf32> to vector<32x128xf32>
    %247 = vector.broadcast %245 : vector<1x128xf32> to vector<32x128xf32>
    %248 = arith.mulf %247, %246 : vector<32x128xf32>
    %249 = arith.addf %244, %248 : vector<32x128xf32>
    %250 = vector.extract_strided_slice %227 {offsets = [4, 0], sizes = [1, 128], strides = [1, 1]} : vector<8x128xf32> to vector<1x128xf32>
    %251 = vector.extract_strided_slice %11 {offsets = [128, 512], sizes = [32, 128], strides = [1, 1]} : vector<192x1024xf32> to vector<32x128xf32>
    %252 = vector.broadcast %250 : vector<1x128xf32> to vector<32x128xf32>
    %253 = arith.mulf %252, %251 : vector<32x128xf32>
    %254 = arith.addf %249, %253 : vector<32x128xf32>
    %255 = vector.extract_strided_slice %227 {offsets = [5, 0], sizes = [1, 128], strides = [1, 1]} : vector<8x128xf32> to vector<1x128xf32>
    %256 = vector.extract_strided_slice %11 {offsets = [128, 640], sizes = [32, 128], strides = [1, 1]} : vector<192x1024xf32> to vector<32x128xf32>
    %257 = vector.broadcast %255 : vector<1x128xf32> to vector<32x128xf32>
    %258 = arith.mulf %257, %256 : vector<32x128xf32>
    %259 = arith.addf %254, %258 : vector<32x128xf32>
    %260 = vector.extract_strided_slice %227 {offsets = [6, 0], sizes = [1, 128], strides = [1, 1]} : vector<8x128xf32> to vector<1x128xf32>
    %261 = vector.extract_strided_slice %11 {offsets = [128, 768], sizes = [32, 128], strides = [1, 1]} : vector<192x1024xf32> to vector<32x128xf32>
    %262 = vector.broadcast %260 : vector<1x128xf32> to vector<32x128xf32>
    %263 = arith.mulf %262, %261 : vector<32x128xf32>
    %264 = arith.addf %259, %263 : vector<32x128xf32>
    %265 = vector.extract_strided_slice %227 {offsets = [7, 0], sizes = [1, 128], strides = [1, 1]} : vector<8x128xf32> to vector<1x128xf32>
    %266 = vector.extract_strided_slice %11 {offsets = [128, 896], sizes = [32, 128], strides = [1, 1]} : vector<192x1024xf32> to vector<32x128xf32>
    %267 = vector.broadcast %265 : vector<1x128xf32> to vector<32x128xf32>
    %268 = arith.mulf %267, %266 : vector<32x128xf32>
    %269 = arith.addf %264, %268 : vector<32x128xf32>
    %270 = vector.extract_strided_slice %5 {offsets = [48, 0], sizes = [16, 128], strides = [1, 1]} : vector<64x128xf32> to vector<16x128xf32>
    %271 = vector.extract_strided_slice %11 {offsets = [48, 0], sizes = [16, 128], strides = [1, 1]} : vector<192x1024xf32> to vector<16x128xf32>
    %272 = arith.mulf %270, %271 : vector<16x128xf32>
    %cst_49 = arith.constant dense<0.000000e+00> : vector<128xf32>
    %273 = vector.multi_reduction <add>, %272, %cst_49 [0] : vector<16x128xf32> to vector<128xf32>
    %274 = vector.shape_cast %273 : vector<128xf32> to vector<1x128xf32>
    %275 = vector.extract_strided_slice %11 {offsets = [48, 128], sizes = [16, 128], strides = [1, 1]} : vector<192x1024xf32> to vector<16x128xf32>
    %276 = arith.mulf %270, %275 : vector<16x128xf32>
    %cst_50 = arith.constant dense<0.000000e+00> : vector<128xf32>
    %277 = vector.multi_reduction <add>, %276, %cst_50 [0] : vector<16x128xf32> to vector<128xf32>
    %278 = vector.shape_cast %277 : vector<128xf32> to vector<1x128xf32>
    %279 = vector.extract_strided_slice %11 {offsets = [48, 256], sizes = [16, 128], strides = [1, 1]} : vector<192x1024xf32> to vector<16x128xf32>
    %280 = arith.mulf %270, %279 : vector<16x128xf32>
    %cst_51 = arith.constant dense<0.000000e+00> : vector<128xf32>
    %281 = vector.multi_reduction <add>, %280, %cst_51 [0] : vector<16x128xf32> to vector<128xf32>
    %282 = vector.shape_cast %281 : vector<128xf32> to vector<1x128xf32>
    %283 = vector.extract_strided_slice %11 {offsets = [48, 384], sizes = [16, 128], strides = [1, 1]} : vector<192x1024xf32> to vector<16x128xf32>
    %284 = arith.mulf %270, %283 : vector<16x128xf32>
    %cst_52 = arith.constant dense<0.000000e+00> : vector<128xf32>
    %285 = vector.multi_reduction <add>, %284, %cst_52 [0] : vector<16x128xf32> to vector<128xf32>
    %286 = vector.shape_cast %285 : vector<128xf32> to vector<1x128xf32>
    %287 = vector.extract_strided_slice %11 {offsets = [48, 512], sizes = [16, 128], strides = [1, 1]} : vector<192x1024xf32> to vector<16x128xf32>
    %288 = arith.mulf %270, %287 : vector<16x128xf32>
    %cst_53 = arith.constant dense<0.000000e+00> : vector<128xf32>
    %289 = vector.multi_reduction <add>, %288, %cst_53 [0] : vector<16x128xf32> to vector<128xf32>
    %290 = vector.shape_cast %289 : vector<128xf32> to vector<1x128xf32>
    %291 = vector.extract_strided_slice %11 {offsets = [48, 640], sizes = [16, 128], strides = [1, 1]} : vector<192x1024xf32> to vector<16x128xf32>
    %292 = arith.mulf %270, %291 : vector<16x128xf32>
    %cst_54 = arith.constant dense<0.000000e+00> : vector<128xf32>
    %293 = vector.multi_reduction <add>, %292, %cst_54 [0] : vector<16x128xf32> to vector<128xf32>
    %294 = vector.shape_cast %293 : vector<128xf32> to vector<1x128xf32>
    %295 = vector.extract_strided_slice %11 {offsets = [48, 768], sizes = [16, 128], strides = [1, 1]} : vector<192x1024xf32> to vector<16x128xf32>
    %296 = arith.mulf %270, %295 : vector<16x128xf32>
    %cst_55 = arith.constant dense<0.000000e+00> : vector<128xf32>
    %297 = vector.multi_reduction <add>, %296, %cst_55 [0] : vector<16x128xf32> to vector<128xf32>
    %298 = vector.shape_cast %297 : vector<128xf32> to vector<1x128xf32>
    %299 = vector.extract_strided_slice %11 {offsets = [48, 896], sizes = [16, 128], strides = [1, 1]} : vector<192x1024xf32> to vector<16x128xf32>
    %300 = arith.mulf %270, %299 : vector<16x128xf32>
    %cst_56 = arith.constant dense<0.000000e+00> : vector<128xf32>
    %301 = vector.multi_reduction <add>, %300, %cst_56 [0] : vector<16x128xf32> to vector<128xf32>
    %302 = vector.shape_cast %301 : vector<128xf32> to vector<1x128xf32>
    %303 = tpu.concatenate %274, %278, %282, %286, %290, %294, %298, %302 in 0 : vector<1x128xf32>, vector<1x128xf32>, vector<1x128xf32>, vector<1x128xf32>, vector<1x128xf32>, vector<1x128xf32>, vector<1x128xf32>, vector<1x128xf32> -> vector<8x128xf32>
    %cst_57 = arith.constant dense<0xFF800000> : vector<128xf32>
    %304 = vector.multi_reduction <maximumf>, %303, %cst_57 [0] : vector<8x128xf32> to vector<128xf32>
    %305 = vector.shape_cast %304 : vector<128xf32> to vector<1x128xf32>
    %306 = vector.broadcast %305 : vector<1x128xf32> to vector<8x128xf32>
    %307 = arith.subf %303, %306 : vector<8x128xf32>
    %308 = math.exp %307 : vector<8x128xf32>
    %cst_58 = arith.constant dense<0.000000e+00> : vector<128xf32>
    %309 = vector.multi_reduction <add>, %308, %cst_58 [0] : vector<8x128xf32> to vector<128xf32>
    %310 = vector.shape_cast %309 : vector<128xf32> to vector<1x128xf32>
    %311 = tpu.reciprocal %310 {approx = true} : vector<1x128xf32> -> vector<1x128xf32>
    %312 = vector.broadcast %311 : vector<1x128xf32> to vector<8x128xf32>
    %313 = arith.mulf %308, %312 : vector<8x128xf32>
    %c3 = arith.constant 3 : index
    %c0_59 = arith.constant 0 : index
    %c0_60 = arith.constant 0 : index
    %314 = vector.load %arg10[%c3, %c0_59, %c0_60] : memref<4x8x128xf32, #tpu.memory_space<vmem>>, vector<1x8x128xf32>
    %315 = vector.shape_cast %314 : vector<1x8x128xf32> to vector<8x128xf32>
    %316 = vector.shape_cast %313 : vector<8x128xf32> to vector<1x8x128xf32>
    tpu.vector_store %arg10[%c3, %c0_59, %c0_60], %316 {strides = array<i32>} : memref<4x8x128xf32, #tpu.memory_space<vmem>>, vector<1x8x128xf32>,
    %317 = vector.extract_strided_slice %313 {offsets = [0, 0], sizes = [1, 128], strides = [1, 1]} : vector<8x128xf32> to vector<1x128xf32>
    %318 = vector.extract_strided_slice %11 {offsets = [160, 0], sizes = [32, 128], strides = [1, 1]} : vector<192x1024xf32> to vector<32x128xf32>
    %319 = vector.broadcast %317 : vector<1x128xf32> to vector<32x128xf32>
    %320 = arith.mulf %319, %318 : vector<32x128xf32>
    %321 = vector.extract_strided_slice %313 {offsets = [1, 0], sizes = [1, 128], strides = [1, 1]} : vector<8x128xf32> to vector<1x128xf32>
    %322 = vector.extract_strided_slice %11 {offsets = [160, 128], sizes = [32, 128], strides = [1, 1]} : vector<192x1024xf32> to vector<32x128xf32>
    %323 = vector.broadcast %321 : vector<1x128xf32> to vector<32x128xf32>
    %324 = arith.mulf %323, %322 : vector<32x128xf32>
    %325 = arith.addf %320, %324 : vector<32x128xf32>
    %326 = vector.extract_strided_slice %313 {offsets = [2, 0], sizes = [1, 128], strides = [1, 1]} : vector<8x128xf32> to vector<1x128xf32>
    %327 = vector.extract_strided_slice %11 {offsets = [160, 256], sizes = [32, 128], strides = [1, 1]} : vector<192x1024xf32> to vector<32x128xf32>
    %328 = vector.broadcast %326 : vector<1x128xf32> to vector<32x128xf32>
    %329 = arith.mulf %328, %327 : vector<32x128xf32>
    %330 = arith.addf %325, %329 : vector<32x128xf32>
    %331 = vector.extract_strided_slice %313 {offsets = [3, 0], sizes = [1, 128], strides = [1, 1]} : vector<8x128xf32> to vector<1x128xf32>
    %332 = vector.extract_strided_slice %11 {offsets = [160, 384], sizes = [32, 128], strides = [1, 1]} : vector<192x1024xf32> to vector<32x128xf32>
    %333 = vector.broadcast %331 : vector<1x128xf32> to vector<32x128xf32>
    %334 = arith.mulf %333, %332 : vector<32x128xf32>
    %335 = arith.addf %330, %334 : vector<32x128xf32>
    %336 = vector.extract_strided_slice %313 {offsets = [4, 0], sizes = [1, 128], strides = [1, 1]} : vector<8x128xf32> to vector<1x128xf32>
    %337 = vector.extract_strided_slice %11 {offsets = [160, 512], sizes = [32, 128], strides = [1, 1]} : vector<192x1024xf32> to vector<32x128xf32>
    %338 = vector.broadcast %336 : vector<1x128xf32> to vector<32x128xf32>
    %339 = arith.mulf %338, %337 : vector<32x128xf32>
    %340 = arith.addf %335, %339 : vector<32x128xf32>
    %341 = vector.extract_strided_slice %313 {offsets = [5, 0], sizes = [1, 128], strides = [1, 1]} : vector<8x128xf32> to vector<1x128xf32>
    %342 = vector.extract_strided_slice %11 {offsets = [160, 640], sizes = [32, 128], strides = [1, 1]} : vector<192x1024xf32> to vector<32x128xf32>
    %343 = vector.broadcast %341 : vector<1x128xf32> to vector<32x128xf32>
    %344 = arith.mulf %343, %342 : vector<32x128xf32>
    %345 = arith.addf %340, %344 : vector<32x128xf32>
    %346 = vector.extract_strided_slice %313 {offsets = [6, 0], sizes = [1, 128], strides = [1, 1]} : vector<8x128xf32> to vector<1x128xf32>
    %347 = vector.extract_strided_slice %11 {offsets = [160, 768], sizes = [32, 128], strides = [1, 1]} : vector<192x1024xf32> to vector<32x128xf32>
    %348 = vector.broadcast %346 : vector<1x128xf32> to vector<32x128xf32>
    %349 = arith.mulf %348, %347 : vector<32x128xf32>
    %350 = arith.addf %345, %349 : vector<32x128xf32>
    %351 = vector.extract_strided_slice %313 {offsets = [7, 0], sizes = [1, 128], strides = [1, 1]} : vector<8x128xf32> to vector<1x128xf32>
    %352 = vector.extract_strided_slice %11 {offsets = [160, 896], sizes = [32, 128], strides = [1, 1]} : vector<192x1024xf32> to vector<32x128xf32>
    %353 = vector.broadcast %351 : vector<1x128xf32> to vector<32x128xf32>
    %354 = arith.mulf %353, %352 : vector<32x128xf32>
    %355 = arith.addf %350, %354 : vector<32x128xf32>
    %356 = tpu.concatenate %97, %183, %269, %355 in 0 : vector<32x128xf32>, vector<32x128xf32>, vector<32x128xf32>, vector<32x128xf32> -> vector<128x128xf32>
    %c0_61 = arith.constant 0 : index
    %c0_62 = arith.constant 0 : index
    %357 = vector.load %arg7[%c0_61, %c0_62] : memref<32x128xf32, #tpu.memory_space<vmem>>, vector<32x128xf32>
    %cst_63 = arith.constant dense<0.000000e+00> : vector<32x128xf32>
    %358 = tpu.matmul %357, %356, %cst_63 {dimension_numbers = #tpu.dot_dimension_numbers<[1], [0], [0], [1], [0, 0, 1, 1], [], []>} : vector<32x128xf32>, vector<128x128xf32>, vector<32x128xf32> -> vector<32x128xf32>
    %c0_64 = arith.constant 0 : index
    %c0_65 = arith.constant 0 : index
    %359 = vector.load %arg8[%c0_64, %c0_65] : memref<32x1xf32, #tpu.memory_space<vmem>>, vector<32x1xf32>
    %360 = vector.broadcast %359 : vector<32x1xf32> to vector<32x128xf32>
    %361 = arith.addf %358, %360 : vector<32x128xf32>
    %c0_66 = arith.constant 0 : index
    %c0_67 = arith.constant 0 : index
    %362 = vector.load %arg9[%c0_66, %c0_67] : memref<32x128xf32, #tpu.memory_space<vmem>>, vector<32x128xf32>
    tpu.vector_store %arg9[%c0_66, %c0_67], %361 {strides = array<i32>} : memref<32x128xf32, #tpu.memory_space<vmem>>, vector<32x128xf32>,
    return
  }
  func.func @transform_0(%arg0: i32) -> (i32, i32) {
    %c0_i32 = arith.constant 0 : i32
    %c0_i32_0 = arith.constant 0 : i32
    %c0_i32_1 = arith.constant 0 : i32
    return %c0_i32, %c0_i32_0 : i32, i32
  }
  func.func @transform_1(%arg0: i32) -> (i32, i32) {
    %c0_i32 = arith.constant 0 : i32
    %c0_i32_0 = arith.constant 0 : i32
    %c0_i32_1 = arith.constant 0 : i32
    return %c0_i32, %c0_i32_0 : i32, i32
  }
  func.func @transform_2(%arg0: i32) -> (i32, i32) {
    %c0_i32 = arith.constant 0 : i32
    %c0_i32_0 = arith.constant 0 : i32
    %c0_i32_1 = arith.constant 0 : i32
    return %c0_i32, %c0_i32_0 : i32, i32
  }
  func.func @transform_3(%arg0: i32) -> (i32, i32) {
    %c0_i32 = arith.constant 0 : i32
    %c0_i32_0 = arith.constant 0 : i32
    %c0_i32_1 = arith.constant 0 : i32
    return %c0_i32, %c0_i32_0 : i32, i32
  }
  func.func @transform_4(%arg0: i32) -> (i32, i32) {
    %c0_i32 = arith.constant 0 : i32
    %c0_i32_0 = arith.constant 0 : i32
    %c0_i32_1 = arith.constant 0 : i32
    return %c0_i32, %c0_i32_0 : i32, i32
  }
  func.func @transform_5(%arg0: i32) -> (i32, i32) {
    %c0_i32 = arith.constant 0 : i32
    %c0_i32_0 = arith.constant 0 : i32
    %c0_i32_1 = arith.constant 0 : i32
    return %c0_i32, %c0_i32_0 : i32, i32
  }
  func.func @transform_6(%arg0: i32) -> (i32, i32) {
    %c0_i32 = arith.constant 0 : i32
    %c0_i32_0 = arith.constant 0 : i32
    %c0_i32_1 = arith.constant 0 : i32
    return %c0_i32, %c0_i32_0 : i32, i32
  }
  func.func @transform_7(%arg0: i32) -> (i32, i32) {
    %c0_i32 = arith.constant 0 : i32
    %c0_i32_0 = arith.constant 0 : i32
    %c0_i32_1 = arith.constant 0 : i32
    return %c0_i32, %c0_i32_0 : i32, i32
  }
  func.func @transform_8(%arg0: i32) -> (i32, i32) {
    %c0_i32 = arith.constant 0 : i32
    %c0_i32_0 = arith.constant 0 : i32
    %c0_i32_1 = arith.constant 0 : i32
    return %c0_i32, %c0_i32_0 : i32, i32
  }
  func.func @transform_9(%arg0: i32) -> (i32, i32, i32) {
    %c0_i32 = arith.constant 0 : i32
    %c0_i32_0 = arith.constant 0 : i32
    %c0_i32_1 = arith.constant 0 : i32
    %c0_i32_2 = arith.constant 0 : i32
    return %c0_i32, %c0_i32_0, %c0_i32_1 : i32, i32, i32
  }
}

</mosaic_0001>

<bundles_post_ra>
// kernel: tpu_custom_call.1
= control target key start
LH: loop header
LB: loop body
LE: loop exit
PB: predicated region body
PF: predicated region fallthrough
CT: control target
= control target key end

     0   :  { %15 = vsyncpa [#allocation3], 0  ;;  %v2584_v7 = vmov 0.0   ;;  %v2585_v8 = vmov 0   ;;  %vm93_vm0 = vcmask 261120   ;;  %s4590_s0 = inlined_call_operand.vmem [shape: f32[32,128], index: 0, kind: input, shape index: {}]   ;;  %s4591_s1 = inlined_call_operand.vmem [shape: f32[32,1024], index: 1, kind: input, shape index: {}]   ;;  %s4592_s2 = inlined_call_operand.vmem [shape: f32[64,32], index: 2, kind: input, shape index: {}]   ;;  %s4593_s3 = inlined_call_operand.vmem [shape: f32[64,1], index: 3, kind: input, shape index: {}]   ;;  %s4594_s4 = inlined_call_operand.vmem [shape: f32[192,32], index: 4, kind: input, shape index: {}]   ;;  %s4595_s5 = inlined_call_operand.vmem [shape: f32[192,1], index: 5, kind: input, shape index: {}]   ;;  %s4596_s6 = inlined_call_operand.vmem [shape: f32[32,128], index: 6, kind: input, shape index: {}]   ;;  %s4597_s7 = inlined_call_operand.vmem [shape: f32[32,1], index: 7, kind: input, shape index: {}]   ;;  %s4598_s8 = inlined_call_operand.hbm [shape: f32[32,128], index: 8, kind: output, shape index: {0}]   ;;  %s4599_s9 = inlined_call_operand.hbm [shape: f32[4,8,128], index: 9, kind: output, shape index: {1}]  }
   0x1   :  { %v41_v0 = vld [vmem:[%s4590_s0] sm:$0xff]  ;;  %v42_v1 = vld [vmem:[%s4590_s0 + $0x8] sm:$0xff]  ;;  %559 = vmatprep.mubr.f32.mxu1 %v2584_v7  ;;  %2519 = vset.pattern.permute.xlu1 %v2585_v8  ;;  %v43_v11 = vld [vmem:[%s4590_s0 + $0x10] sm:$0xff] }
   0x2   :  { %v248_v2 = vld [vmem:[%s4591_s1 + $0x8] sm:$0xff]  ;;  %v2440_v3 = vpack.c.bf16 %v42_v1, %v41_v0  ;;  %v247_v5 = vld [vmem:[%s4591_s1] sm:$0xff]  ;;  %v44_v12 = vld [vmem:[%s4590_s0 + $0x18] sm:$0xff]  ;;  %2518 = vset.pattern.permute.xlu0 %v2585_v8 }
   0x3   :  { %v256_v4 = vld [vmem:[%s4591_s1 + $0x48] sm:$0xff]  ;;  %v255_v6 = vld [vmem:[%s4591_s1 + $0x40] sm:$0xff]  ;;  %v2444_v14 = vpack.c.bf16 %v44_v12, %v43_v11  ;;  %v250_v21 = vld [vmem:[%s4591_s1 + $0x18] sm:$0xff] }
   0x4   :  { %v2448_v9 = vpack.c.bf16 %v256_v4, %v248_v2  ;;  %v2450_v10 = vpack.c.bf16 %v255_v6, %v247_v5  ;;  %v264_v13 = vld [vmem:[%s4591_s1 + $0x88] sm:$0xff]  ;;  %2441 = vmatprep.subr.bf16.mxu0 %v2440_v3  ;;  %v263_v16 = vld [vmem:[%s4591_s1 + $0x80] sm:$0xff]  ;;  %v258_v22 = vld [vmem:[%s4591_s1 + $0x58] sm:$0xff] }
   0x5   :  { %v272_v15 = vld [vmem:[%s4591_s1 + $0xc8] sm:$0xff]  ;;  %v271_v17 = vld [vmem:[%s4591_s1 + $0xc0] sm:$0xff]  ;;  %2443 = vmatpush3.bf16.msra.mxu0 %v2440_v3  ;;  %v249_v23 = vld [vmem:[%s4591_s1 + $0x10] sm:$0xff]  ;;  %v2456_v26 = vpack.c.bf16 %v258_v22, %v250_v21 }
   0x6   :  { %2449 = vmatprep.subr.bf16.mxu1 %v2448_v9  ;;  %v2452_v18 = vpack.c.bf16 %v272_v15, %v264_v13  ;;  %v33_v19 = vld [vmem:[%s4592_s2] sm:$0xff]  ;;  %2445 = vmatprep.subr.bf16.mxu0 %v2444_v14  ;;  %v2454_v20 = vpack.c.bf16 %v271_v17, %v263_v16  ;;  %v34_v24 = vld [vmem:[%s4592_s2 + $0x8] sm:$0xff]  ;;  %v257_v27 = vld [vmem:[%s4591_s1 + $0x50] sm:$0xff] }
   0x7   :  { %2451 = vmatpush1.bf16.msra.mxu1 %v2450_v10  ;;  %2390 = vmatprep.mubr.msk.f32.mxu0 %vm93_vm0, %v33_v19  ;;  %v2696_v25 = vld [vmem:[%s4594_s4] sm:$0xff]  ;;  %v35_v28 = vld [vmem:[%s4592_s2 + $0x10] sm:$0xff]  ;;  %v2458_v29 = vpack.c.bf16 %v257_v27, %v249_v23  ;;  %v266_v30 = vld [vmem:[%s4591_s1 + $0x98] sm:$0xff] }
   0x8   :  { %2453 = vmatprep.subr.bf16.mxu1 %v2452_v18  ;;  %v274_v31 = vld [vmem:[%s4591_s1 + $0xd8] sm:$0xff]  ;;  %v265_v33 = vld [vmem:[%s4591_s1 + $0x90] sm:$0xff]  ;;  %v2727_v36 = vld [vmem:[%s4594_s4 + $0x8] sm:$0xff] }
   0x9   :  { %2447 = vmatpush3.bf16.msra.mxu0 %v2444_v14  ;;  %v2460_v32 = vpack.c.bf16 %v274_v31, %v266_v30  ;;  %v273_v34 = vld [vmem:[%s4591_s1 + $0xd0] sm:$0xff]  ;;  %v36_v35 = vld [vmem:[%s4592_s2 + $0x18] sm:$0xff]  ;;  %v37_v37 = vld [vmem:[%s4592_s2 + $0x20] sm:$0xff] }
   0xa   :  { %2457 = vmatprep.subr.bf16.mxu0 %v2456_v26  ;;  %v2462_v38 = vpack.c.bf16 %v273_v34, %v265_v33  ;;  %v279_v39 = vld [vmem:[%s4595_s5] sm:$0xff]  ;;  %v38_v40 = vld [vmem:[%s4592_s2 + $0x28] sm:$0xff]  ;;  %v2745_v41 = vld [vmem:[%s4594_s4 + $0x10] sm:$0xff] }
   0xb   :  { %2455 = vmatpush1.bf16.msra.mxu1 %v2454_v20  ;;  %v45_v42 = vld [vmem:[%s4593_s3] sm:$0xff]  ;;  %v39_v43 = vld [vmem:[%s4592_s2 + $0x30] sm:$0xff]  ;;  %v252_v44 = vld [vmem:[%s4591_s1 + $0x28] sm:$0xff]  ;;  %305 = vperm.xlu1 %2519, %v279_v39  }
   0xc   :  { %2391 = vmatmul.mubr.msk.f32.vlgmr.msra.gmra.mrb[0].mxu0 %vm93_vm0, %v34_v24  ;;  %v260_v45 = vld [vmem:[%s4591_s1 + $0x68] sm:$0xff]  ;;  %55 = vperm.xlu0 %2518, %v45_v42   ;;  %v251_v48 = vld [vmem:[%s4591_s1 + $0x20] sm:$0xff]  ;;  %v254_v52 = vld [vmem:[%s4591_s1 + $0x38] sm:$0xff] }
   0xd   :  { %2393 = vmatprep.mubr.msk.f32.mxu0 %vm93_vm0, %v35_v28  ;;  %2459 = vmatpush1.bf16.msra.mxu0 %v2458_v29  ;;  %v280_v46 = vld [vmem:[%s4595_s5 + $0x8] sm:$0xff]  ;;  %v2464_v47 = vpack.c.bf16 %v260_v45, %v252_v44  ;;  %v259_v49 = vld [vmem:[%s4591_s1 + $0x60] sm:$0xff]  ;;  %v262_v53 = vld [vmem:[%s4591_s1 + $0x78] sm:$0xff] }
   0xe   :  { %2254 = vmatmul.mubr.msk.f32.vlgmr.msra.gmra.mrb[0].mxu1 %vm93_vm0, %v2696_v25  ;;  %2461 = vmatprep.subr.bf16.mxu0 %v2460_v32  ;;  %v46_v50 = vld [vmem:[%s4593_s3 + $0x8] sm:$0xff]  ;;  %v2466_v51 = vpack.c.bf16 %v259_v49, %v251_v48  ;;  %v40_v54 = vld [vmem:[%s4592_s2 + $0x38] sm:$0xff]  ;;  %v2472_v56 = vpack.c.bf16 %v262_v53, %v254_v52  ;;  %v253_v58 = vld [vmem:[%s4591_s1 + $0x30] sm:$0xff] }
   0xf   :  { %565 = vmatprep.mubr.f32.mxu1 %v2584_v7  ;;  %v2789_v55 = vld [vmem:[%s4594_s4 + $0x18] sm:$0xff]  ;;  %2465 = vmatprep.subr.bf16.mxu1 %v2464_v47  ;;  %v261_v59 = vld [vmem:[%s4591_s1 + $0x70] sm:$0xff]  ;;  %v268_v61 = vld [vmem:[%s4591_s1 + $0xa8] sm:$0xff] }
  0x10   :  { %2394 = vmatmul.mubr.msk.f32.gmra.mrb[2].mxu0 %vm93_vm0, %v36_v35  ;;  %310 = vperm.xlu1 %2519, %v280_v46   ;;  %v48_v57 = vld [vmem:[%s4593_s3 + $0x18] sm:$0xff]  ;;  %v47_v60 = vld [vmem:[%s4593_s3 + $0x10] sm:$0xff]  ;;  %v276_v62 = vld [vmem:[%s4591_s1 + $0xe8] sm:$0xff]  ;;  %v2474_v3 = vpack.c.bf16 %v261_v59, %v253_v58 }
  0x11   :  { %2396 = vmatprep.mubr.msk.f32.mxu0 %vm93_vm0, %v37_v37  ;;  %2463 = vmatpush1.bf16.msra.mxu0 %v2462_v38  ;;  %v2468_v63 = vpack.c.bf16 %v276_v62, %v268_v61  ;;  %v267_v0 = vld [vmem:[%s4591_s1 + $0xa0] sm:$0xff]  ;;  %v270_v4 = vld [vmem:[%s4591_s1 + $0xb8] sm:$0xff]  ;;  %v281_v8 = vld [vmem:[%s4595_s5 + $0x10] sm:$0xff] }
  0x12   :  { %2255 = vmatmul.mubr.msk.f32.gmra.mrb[2].mxu1 %vm93_vm0, %v2727_v36  ;;  %60 = vperm.xlu0 %2518, %v46_v50   ;;  %v275_v1 = vld [vmem:[%s4591_s1 + $0xe0] sm:$0xff]  ;;  %v278_v5 = vld [vmem:[%s4591_s1 + $0xf8] sm:$0xff]  ;;  %v2846_v10 = vld [vmem:[%s4594_s4 + $0x28] sm:$0xff] }
  0x13   :  { %571 = vmatprep.mubr.f32.mxu1 %v2584_v7  ;;  %2467 = vmatpush1.bf16.msra.mxu1 %v2466_v51  ;;  %v2823_v2 = vld [vmem:[%s4594_s4 + $0x20] sm:$0xff]  ;;  %v282_v6 = vld [vmem:[%s4595_s5 + $0x18] sm:$0xff]  ;;  %v2470_v9 = vpack.c.bf16 %v275_v1, %v267_v0  ;;  %v2476_v11 = vpack.c.bf16 %v278_v5, %v270_v4 }
  0x14   :  { %2397 = vmatmul.mubr.msk.f32.gmra.mrb[4].mxu0 %vm93_vm0, %v38_v40  ;;  %2473 = vmatprep.subr.bf16.mxu0 %v2472_v56 }
  0x15   :  { %2399 = vmatprep.mubr.msk.f32.mxu0 %vm93_vm0, %v39_v43  ;;  %70 = vperm.xlu1 %2519, %v48_v57  }
  0x16   :  { %2256 = vmatmul.mubr.msk.f32.gmra.mrb[4].mxu1 %vm93_vm0, %v2745_v41  ;;  %65 = vperm.xlu0 %2518, %v47_v60  }
  0x17   :  { %577 = vmatprep.mubr.f32.mxu1 %v2584_v7  ;;  %2469 = vmatprep.subr.bf16.mxu1 %v2468_v63 }
  0x18   :  { %2400 = vmatmul.mubr.msk.f32.gmra.mrb[6].mxu0 %vm93_vm0, %v40_v54 }
  0x19   :  { %768 = vmatprep.mubr.f32.mxu0 %v2584_v7 }
  0x1a   :  { %2257 = vmatmul.mubr.msk.f32.gmra.mrb[6].mxu1 %vm93_vm0, %v2789_v55 }
  0x1b   :  { %583 = vmatprep.mubr.f32.mxu1 %v2584_v7 }
  0x1c   :  { %2278 = vmatmul.mubr.msk.f32.vlgmr.msra.gmra.mrb[8].mxu0 %vm93_vm0, %v2696_v25 }
  0x1d   :  { %774 = vmatprep.mubr.f32.mxu0 %v2584_v7  ;;  %2475 = vmatpush1.bf16.msra.mxu0 %v2474_v3 }
  0x1e   :  { %2258 = vmatmul.mubr.msk.f32.gmra.mrb[8].mxu1 %vm93_vm0, %v2823_v2 }
  0x1f   :  { %589 = vmatprep.mubr.f32.mxu1 %v2584_v7 }
  0x20   :  { %16 = vsyncpa [#allocation5], 0  ;;  %320 = vperm.xlu1 %2519, %v282_v6   ;;  %315 = vperm.xlu0 %2518, %v281_v8   ;;  %v269_v12 = vld [vmem:[%s4591_s1 + $0xb0] sm:$0xff]  ;;  %v50_v14 = vld [vmem:[%s4593_s3 + $0x28] sm:$0xff]  ;;  %vm1403_vm1 = vcmask 1040384   ;;  %vm1405_vm2 = vcmask 1041408  }
  0x21   :  { %v277_v13 = vld [vmem:[%s4591_s1 + $0xf0] sm:$0xff]  ;;  %2279 = vmatmul.mubr.msk.f32.gmra.mrb[10].mxu0 %vm93_vm0, %v2727_v36  ;;  %v49_v15 = vld [vmem:[%s4593_s3 + $0x20] sm:$0xff]  ;;  %2471 = vmatpush1.bf16.msra.mxu1 %v2470_v9  ;;  %v284_v18 = vld [vmem:[%s4595_s5 + $0x28] sm:$0xff]  ;;  %vm1407_vm3 = vcmask 1042432   ;;  %vm1409_vm4 = vcmask 1043456   ;;  %vm1411_vm5 = vcmask 1044480  }
  0x22   :  { %2259 = vmatmul.mubr.msk.f32.gmra.mrb[10].mxu1 %vm93_vm0, %v2846_v10  ;;  %780 = vmatprep.mubr.f32.mxu0 %v2584_v7  ;;  %v2869_v16 = vld [vmem:[%s4594_s4 + $0x30] sm:$0xff]  ;;  %v2478_v17 = vpack.c.bf16 %v277_v13, %v269_v12  ;;  %v283_v19 = vld [vmem:[%s4595_s5 + $0x20] sm:$0xff]  ;;  %v2886_v20 = vld [vmem:[%s4594_s4 + $0x38] sm:$0xff]  ;;  %vm1413_vm6 = vcmask 1045504   ;;  %vm1415_vm7 = vcmask 1046528   ;;  %s2586_s11 = smov [#allocation4]  }
  0x23   :  { %595 = vmatprep.mubr.f32.mxu1 %v2584_v7  ;;  %2477 = vmatprep.subr.bf16.mxu0 %v2476_v11  ;;  %v52_v21 = vld [vmem:[%s4593_s3 + $0x38] sm:$0xff]  ;;  %v51_v22 = vld [vmem:[%s4593_s3 + $0x30] sm:$0xff]  ;;  %v2903_v23 = vld [vmem:[%s4594_s4 + $0x40] sm:$0xff]  ;;  %s2231_s0 = sshll.u32 %s2586_s11, 4  ;;  %s2232_s0 = int_to_ptr.vmem [resolvable:$true] %s2231_s0 }
  0x24   :  { %80 = vperm.xlu1 %2519, %v50_v14   ;;  %75 = vperm.xlu0 %2518, %v49_v15   ;;  %v285_v24 = vld [vmem:[%s4595_s5 + $0x30] sm:$0xff]  ;;  %v286_v26 = vld [vmem:[%s4595_s5 + $0x38] sm:$0xff]  ;;  %v2920_v27 = vld [vmem:[%s4594_s4 + $0x48] sm:$0xff]  ;;  %p2541_p1 = scmp.lt.s32.totalorder %s2232_s0, %s2232_s0 }
  0x25   :  { %2280 = vmatmul.mubr.msk.f32.gmra.mrb[12].mxu0 %vm93_vm0, %v2745_v41  ;;  %v287_v28 = vld [vmem:[%s4595_s5 + $0x40] sm:$0xff]  ;;  %v288_v29 = vld [vmem:[%s4595_s5 + $0x48] sm:$0xff]  ;;  %v2937_v30 = vld [vmem:[%s4594_s4 + $0x50] sm:$0xff] }
  0x26   :  { %2260 = vmatmul.mubr.msk.f32.gmra.mrb[12].mxu1 %vm93_vm0, %v2869_v16  ;;  %786 = vmatprep.mubr.f32.mxu0 %v2584_v7  ;;  %v289_v31 = vld [vmem:[%s4595_s5 + $0x50] sm:$0xff]  ;;  %v290_v32 = vld [vmem:[%s4595_s5 + $0x58] sm:$0xff]  ;;  %v291_v34 = vld [vmem:[%s4595_s5 + $0x60] sm:$0xff] }
  0x27   :  { %601 = vmatprep.mubr.f32.mxu1 %v2584_v7  ;;  %2479 = vmatpush1.bf16.msra.mxu0 %v2478_v17  ;;  %v2954_v33 = vld [vmem:[%s4594_s4 + $0x58] sm:$0xff]  ;;  %v292_v35 = vld [vmem:[%s4595_s5 + $0x68] sm:$0xff]  ;;  %v2971_v37 = vld [vmem:[%s4594_s4 + $0x60] sm:$0xff] }
  0x28   :  { %330 = vperm.xlu1 %2519, %v284_v18   ;;  %325 = vperm.xlu0 %2518, %v283_v19   ;;  %v293_v38 = vld [vmem:[%s4595_s5 + $0x70] sm:$0xff]  ;;  %v294_v39 = vld [vmem:[%s4595_s5 + $0x78] sm:$0xff]  ;;  %v2988_v40 = vld [vmem:[%s4594_s4 + $0x68] sm:$0xff] }
  0x29   :  { %2281 = vmatmul.mubr.msk.f32.gmra.mrb[14].mxu0 %vm93_vm0, %v2789_v55  ;;  %v295_v42 = vld [vmem:[%s4595_s5 + $0x80] sm:$0xff]  ;;  %v296_v43 = vld [vmem:[%s4595_s5 + $0x88] sm:$0xff]  ;;  %v3005_v44 = vld [vmem:[%s4594_s4 + $0x70] sm:$0xff] }
  0x2a   :  { %2261 = vmatmul.mubr.msk.f32.gmra.mrb[14].mxu1 %vm93_vm0, %v2886_v20  ;;  %792 = vmatprep.mubr.f32.mxu0 %v2584_v7  ;;  %v297_v45 = vld [vmem:[%s4595_s5 + $0x90] sm:$0xff]  ;;  %v298_v46 = vld [vmem:[%s4595_s5 + $0x98] sm:$0xff]  ;;  %v299_v48 = vld [vmem:[%s4595_s5 + $0xa0] sm:$0xff] }
  0x2b   :  { %607 = vmatprep.mubr.f32.mxu1 %v2584_v7  ;;  %v3022_v47 = vld [vmem:[%s4594_s4 + $0x78] sm:$0xff]  ;;  %v300_v49 = vld [vmem:[%s4595_s5 + $0xa8] sm:$0xff]  ;;  %v3039_v50 = vld [vmem:[%s4594_s4 + $0x80] sm:$0xff] }
  0x2c   :  { %90 = vperm.xlu1 %2519, %v52_v21   ;;  %85 = vperm.xlu0 %2518, %v51_v22   ;;  %v302_v51 = vld [vmem:[%s4595_s5 + $0xb8] sm:$0xff]  ;;  %v301_v52 = vld [vmem:[%s4595_s5 + $0xb0] sm:$0xff]  ;;  %v3056_v53 = vld [vmem:[%s4594_s4 + $0x88] sm:$0xff]  ;;  %s2536_s5 = scalar_lea.vmem %s2232_s0, 512 }
  0x2d   :  { %2282 = vmatmul.mubr.msk.f32.gmra.mrb[16].mxu0 %vm93_vm0, %v2823_v2  ;;  %v2102_v54 = vld [vmem:[%s4597_s7 + $0x8] sm:$0xff]  ;;  %v2101_v56 = vld [vmem:[%s4597_s7] sm:$0xff]  ;;  %v3073_v57 = vld [vmem:[%s4594_s4 + $0x90] sm:$0xff]  ;;  %p2537_p0 = scmp.ne.s32.totalorder %s2232_s0, %s2536_s5  ;;  %p2542_p2 = scmp.lt.s32.totalorder %s2536_s5, %s2536_s5 }
  0x2e   :  { %2262 = vmatmul.mubr.msk.f32.gmra.mrb[16].mxu1 %vm93_vm0, %v2903_v23  ;;  %798 = vmatprep.mubr.f32.mxu0 %v2584_v7  ;;  %v2104_v58 = vld [vmem:[%s4597_s7 + $0x18] sm:$0xff]  ;;  %v2103_v59 = vld [vmem:[%s4597_s7 + $0x10] sm:$0xff]  ;;  %v3101_v61 = vld [vmem:[%s4594_s4 + $0xa0] sm:$0xff] }
  0x2f   :  { %613 = vmatprep.mubr.f32.mxu1 %v2584_v7  ;;  %v3090_v60 = vld [vmem:[%s4594_s4 + $0x98] sm:$0xff]  ;;  %v3112_v62 = vld [vmem:[%s4594_s4 + $0xa8] sm:$0xff]  ;;  %v3123_v63 = vld [vmem:[%s4594_s4 + $0xb0] sm:$0xff]  ;;  %p2543_p3 = por %p2542_p2, %p2541_p1 }
  0x30   :  { %335 = vperm.xlu0 %2518, %v285_v24   ;;  %340 = vperm.xlu1 %2519, %v286_v26   ;;  %v3134_v0 = vld [vmem:[%s4594_s4 + $0xb8] sm:$0xff] }
  0x31   :  { %2283 = vmatmul.mubr.msk.f32.gmra.mrb[18].mxu0 %vm93_vm0, %v2846_v10  ;;  %p2544_p4 = pnand %p2543_p3, %p2537_p0 }
  0x32   :  { %2263 = vmatmul.mubr.msk.f32.gmra.mrb[18].mxu1 %vm93_vm0, %v2920_v27  ;;  %804 = vmatprep.mubr.f32.mxu0 %v2584_v7 }
  0x33   :  { %619 = vmatprep.mubr.f32.mxu1 %v2584_v7 }
  0x34   :  { %345 = vperm.xlu0 %2518, %v287_v28   ;;  %350 = vperm.xlu1 %2519, %v288_v29  }
  0x35   :  { %2284 = vmatmul.mubr.msk.f32.gmra.mrb[20].mxu0 %vm93_vm0, %v2869_v16 }
  0x36   :  { %2264 = vmatmul.mubr.msk.f32.gmra.mrb[20].mxu1 %vm93_vm0, %v2937_v30  ;;  %810 = vmatprep.mubr.f32.mxu0 %v2584_v7 }
  0x37   :  { %625 = vmatprep.mubr.f32.mxu1 %v2584_v7 }
  0x38   :  { %355 = vperm.xlu0 %2518, %v289_v31   ;;  %360 = vperm.xlu1 %2519, %v290_v32  }
  0x39   :  { %2285 = vmatmul.mubr.msk.f32.gmra.mrb[22].mxu0 %vm93_vm0, %v2886_v20 }
  0x3a   :  { %2265 = vmatmul.mubr.msk.f32.gmra.mrb[22].mxu1 %vm93_vm0, %v2954_v33  ;;  %816 = vmatprep.mubr.f32.mxu0 %v2584_v7 }
  0x3b   :  { %631 = vmatprep.mubr.f32.mxu1 %v2584_v7 }
  0x3c   :  { %365 = vperm.xlu0 %2518, %v291_v34   ;;  %370 = vperm.xlu1 %2519, %v292_v35  }
  0x3d   :  { %2286 = vmatmul.mubr.msk.f32.gmra.mrb[24].mxu0 %vm93_vm0, %v2903_v23 }
  0x3e   :  { %2266 = vmatmul.mubr.msk.f32.gmra.mrb[24].mxu1 %vm93_vm0, %v2971_v37  ;;  %822 = vmatprep.mubr.f32.mxu0 %v2584_v7 }
  0x3f   :  { %637 = vmatprep.mubr.f32.mxu1 %v2584_v7 }
  0x40   :  { %375 = vperm.xlu0 %2518, %v293_v38   ;;  %380 = vperm.xlu1 %2519, %v294_v39  }
  0x41   :  { %2287 = vmatmul.mubr.msk.f32.gmra.mrb[26].mxu0 %vm93_vm0, %v2920_v27 }
  0x42   :  { %2267 = vmatmul.mubr.msk.f32.gmra.mrb[26].mxu1 %vm93_vm0, %v2988_v40  ;;  %828 = vmatprep.mubr.f32.mxu0 %v2584_v7 }
  0x43   :  { %643 = vmatprep.mubr.f32.mxu1 %v2584_v7 }
  0x44   :  { %385 = vperm.xlu0 %2518, %v295_v42   ;;  %390 = vperm.xlu1 %2519, %v296_v43  }
  0x45   :  { %2288 = vmatmul.mubr.msk.f32.gmra.mrb[28].mxu0 %vm93_vm0, %v2937_v30 }
  0x46   :  { %2268 = vmatmul.mubr.msk.f32.gmra.mrb[28].mxu1 %vm93_vm0, %v3005_v44  ;;  %834 = vmatprep.mubr.f32.mxu0 %v2584_v7 }
  0x47   :  { %649 = vmatprep.mubr.f32.mxu1 %v2584_v7 }
  0x48   :  { %395 = vperm.xlu0 %2518, %v297_v45   ;;  %400 = vperm.xlu1 %2519, %v298_v46  }
  0x49   :  { %2289 = vmatmul.mubr.msk.f32.gmra.mrb[30].mxu0 %vm93_vm0, %v2954_v33 }
  0x4a   :  { %2269 = vmatmul.mubr.msk.f32.gmra.mrb[30].mxu1 %vm93_vm0, %v3022_v47  ;;  %840 = vmatprep.mubr.f32.mxu0 %v2584_v7 }
  0x4b   :  { %655 = vmatprep.mubr.f32.mxu1 %v2584_v7 }
  0x4c   :  { %405 = vperm.xlu0 %2518, %v299_v48   ;;  %410 = vperm.xlu1 %2519, %v300_v49  }
  0x4d   :  { %2290 = vmatmul.mubr.msk.f32.gmra.mrb[32].mxu0 %vm93_vm0, %v2971_v37 }
  0x4e   :  { %2270 = vmatmul.mubr.msk.f32.gmra.mrb[32].mxu1 %vm93_vm0, %v3039_v50  ;;  %846 = vmatprep.mubr.f32.mxu0 %v2584_v7 }
  0x4f   :  { %661 = vmatprep.mubr.f32.mxu1 %v2584_v7 }
  0x50   :  { %420 = vperm.xlu1 %2519, %v302_v51   ;;  %415 = vperm.xlu0 %2518, %v301_v52  }
  0x51   :  { %2291 = vmatmul.mubr.msk.f32.gmra.mrb[34].mxu0 %vm93_vm0, %v2988_v40 }
  0x52   :  { %2271 = vmatmul.mubr.msk.f32.gmra.mrb[34].mxu1 %vm93_vm0, %v3056_v53  ;;  %852 = vmatprep.mubr.f32.mxu0 %v2584_v7 }
  0x53   :  { %667 = vmatprep.mubr.f32.mxu1 %v2584_v7 }
  0x54   :  { %2112 = vperm.xlu1 %2519, %v2102_v54   ;;  %2107 = vperm.xlu0 %2518, %v2101_v56  }
  0x55   :  { %2292 = vmatmul.mubr.msk.f32.gmra.mrb[36].mxu0 %vm93_vm0, %v3005_v44 }
  0x56   :  { %2272 = vmatmul.mubr.msk.f32.gmra.mrb[36].mxu1 %vm93_vm0, %v3073_v57  ;;  %858 = vmatprep.mubr.f32.mxu0 %v2584_v7 }
  0x57   :  { %673 = vmatprep.mubr.f32.mxu1 %v2584_v7 }
  0x58   :  { %2122 = vperm.xlu1 %2519, %v2104_v58   ;;  %2117 = vperm.xlu0 %2518, %v2103_v59  }
  0x59   :  { %2293 = vmatmul.mubr.msk.f32.gmra.mrb[38].mxu0 %vm93_vm0, %v3022_v47 }
  0x5a   :  { %2273 = vmatmul.mubr.msk.f32.gmra.mrb[38].mxu1 %vm93_vm0, %v3090_v60  ;;  %864 = vmatprep.mubr.f32.mxu0 %v2584_v7 }
  0x5b   :  { %679 = vmatprep.mubr.f32.mxu1 %v2584_v7 }
  0x5d   :  { %2294 = vmatmul.mubr.msk.f32.gmra.mrb[40].mxu0 %vm93_vm0, %v3039_v50 }
  0x5e   :  { %2274 = vmatmul.mubr.msk.f32.gmra.mrb[40].mxu1 %vm93_vm0, %v3101_v61  ;;  %870 = vmatprep.mubr.f32.mxu0 %v2584_v7 }
  0x5f   :  { %685 = vmatprep.mubr.f32.mxu1 %v2584_v7 }
  0x61   :  { %2295 = vmatmul.mubr.msk.f32.gmra.mrb[42].mxu0 %vm93_vm0, %v3056_v53 }
  0x62   :  { %2275 = vmatmul.mubr.msk.f32.gmra.mrb[42].mxu1 %vm93_vm0, %v3112_v62  ;;  %876 = vmatprep.mubr.f32.mxu0 %v2584_v7 }
  0x63   :  { %691 = vmatprep.mubr.f32.mxu1 %v2584_v7 }
  0x65   :  { %2296 = vmatmul.mubr.msk.f32.gmra.mrb[44].mxu0 %vm93_vm0, %v3073_v57 }
  0x66   :  { %2276 = vmatmul.mubr.msk.f32.gmra.mrb[44].mxu1 %vm93_vm0, %v3123_v63  ;;  %882 = vmatprep.mubr.f32.mxu0 %v2584_v7 }
  0x67   :  { %697 = vmatprep.mubr.f32.mxu1 %v2584_v7 }
  0x69   :  { %2297 = vmatmul.mubr.msk.f32.gmra.mrb[46].mxu0 %vm93_vm0, %v3090_v60 }
  0x6a   :  { %2277 = vmatmul.mubr.msk.f32.gmra.mrb[46].mxu1 %vm93_vm0, %v3134_v0  ;;  %888 = vmatprep.mubr.f32.mxu0 %v2584_v7 }
  0x6b   :  { %977 = vmatprep.mubr.f32.mxu1 %v2584_v7 }
  0x6d   :  { %2298 = vmatmul.mubr.msk.f32.gmra.mrb[48].mxu0 %vm93_vm0, %v3101_v61 }
  0x6e   :  { %2302 = vmatmul.mubr.msk.f32.vlgmr.msra.gmra.mrb[48].mxu1 %vm93_vm0, %v2696_v25  ;;  %894 = vmatprep.mubr.f32.mxu0 %v2584_v7 }
  0x6f   :  { %983 = vmatprep.mubr.f32.mxu1 %v2584_v7 }
  0x71   :  { %2299 = vmatmul.mubr.msk.f32.gmra.mrb[50].mxu0 %vm93_vm0, %v3112_v62 }
  0x72   :  { %2303 = vmatmul.mubr.msk.f32.gmra.mrb[50].mxu1 %vm93_vm0, %v2727_v36  ;;  %900 = vmatprep.mubr.f32.mxu0 %v2584_v7 }
  0x73   :  { %989 = vmatprep.mubr.f32.mxu1 %v2584_v7 }
  0x75   :  { %2300 = vmatmul.mubr.msk.f32.gmra.mrb[52].mxu0 %vm93_vm0, %v3123_v63 }
  0x76   :  { %2304 = vmatmul.mubr.msk.f32.gmra.mrb[52].mxu1 %vm93_vm0, %v2745_v41  ;;  %906 = vmatprep.mubr.f32.mxu0 %v2584_v7 }
  0x77   :  { %995 = vmatprep.mubr.f32.mxu1 %v2584_v7 }
  0x79   :  { %2301 = vmatmul.mubr.msk.f32.gmra.mrb[54].mxu0 %vm93_vm0, %v3134_v0 }
  0x7a   :  { %2305 = vmatmul.mubr.msk.f32.gmra.mrb[54].mxu1 %vm93_vm0, %v2789_v55  ;;  %1186 = vmatprep.mubr.f32.mxu0 %v2584_v7 }
  0x7b   :  { %1001 = vmatprep.mubr.f32.mxu1 %v2584_v7 }
  0x7d   :  { %2326 = vmatmul.mubr.msk.f32.vlgmr.msra.gmra.mrb[56].mxu0 %vm93_vm0, %v2696_v25 }
  0x7e   :  { %2306 = vmatmul.mubr.msk.f32.gmra.mrb[56].mxu1 %vm93_vm0, %v2823_v2  ;;  %1192 = vmatprep.mubr.f32.mxu0 %v2584_v7 }
  0x7f   :  { %1007 = vmatprep.mubr.f32.mxu1 %v2584_v7 }
  0x81   :  { %2327 = vmatmul.mubr.msk.f32.gmra.mrb[58].mxu0 %vm93_vm0, %v2727_v36 }
  0x82   :  { %2307 = vmatmul.mubr.msk.f32.gmra.mrb[58].mxu1 %vm93_vm0, %v2846_v10  ;;  %1198 = vmatprep.mubr.f32.mxu0 %v2584_v7 }
  0x83   :  { %1013 = vmatprep.mubr.f32.mxu1 %v2584_v7 }
  0x85   :  { %2328 = vmatmul.mubr.msk.f32.gmra.mrb[60].mxu0 %vm93_vm0, %v2745_v41 }
  0x86   :  { %2308 = vmatmul.mubr.msk.f32.gmra.mrb[60].mxu1 %vm93_vm0, %v2869_v16  ;;  %1204 = vmatprep.mubr.f32.mxu0 %v2584_v7 }
  0x87   :  { %1019 = vmatprep.mubr.f32.mxu1 %v2584_v7 }
  0x89   :  { %2329 = vmatmul.mubr.msk.f32.gmra.mrb[62].mxu0 %vm93_vm0, %v2789_v55 }
  0x8a   :  { %2309 = vmatmul.mubr.msk.f32.gmra.mrb[62].mxu1 %vm93_vm0, %v2886_v20  ;;  %1210 = vmatprep.mubr.f32.mxu0 %v2584_v7  ;;  %v3285_v25 = vpop.permute.xlu1 %305 }
  0x8b   :  { %1025 = vmatprep.mubr.f32.mxu1 %v2584_v7  ;;  %v56_v36 = vpop.permute.xlu0 %55 }
  0x8d   :  { %2330 = vmatmul.mubr.msk.f32.gmra.mrb[64].mxu0 %vm93_vm0, %v2823_v2 }
  0x8e   :  { %2310 = vmatmul.mubr.msk.f32.gmra.mrb[64].mxu1 %vm93_vm0, %v2903_v23  ;;  %1216 = vmatprep.mubr.f32.mxu0 %v2584_v7 }
  0x8f   :  { %1031 = vmatprep.mubr.f32.mxu1 %v2584_v7  ;;  %v3290_v41 = vpop.permute.xlu1 %310 }
  0x91   :  { %2331 = vmatmul.mubr.msk.f32.gmra.mrb[66].mxu0 %vm93_vm0, %v2846_v10  ;;  %v61_v55 = vpop.permute.xlu0 %60 }
  0x92   :  { %2311 = vmatmul.mubr.msk.f32.gmra.mrb[66].mxu1 %vm93_vm0, %v2920_v27  ;;  %1222 = vmatprep.mubr.f32.mxu0 %v2584_v7 }
  0x93   :  { %1037 = vmatprep.mubr.f32.mxu1 %v2584_v7 }
  0x94   :  { %v71_v1 = vpop.permute.xlu1 %70 }
  0x95   :  { %2332 = vmatmul.mubr.msk.f32.gmra.mrb[68].mxu0 %vm93_vm0, %v2869_v16  ;;  %v66_v2 = vpop.permute.xlu0 %65 }
  0x96   :  { %2312 = vmatmul.mubr.msk.f32.gmra.mrb[68].mxu1 %vm93_vm0, %v2937_v30  ;;  %1228 = vmatprep.mubr.f32.mxu0 %v2584_v7 }
  0x97   :  { %1043 = vmatprep.mubr.f32.mxu1 %v2584_v7 }
  0x99   :  { %2333 = vmatmul.mubr.msk.f32.gmra.mrb[70].mxu0 %vm93_vm0, %v2886_v20 }
  0x9a   :  { %2313 = vmatmul.mubr.msk.f32.gmra.mrb[70].mxu1 %vm93_vm0, %v2954_v33  ;;  %1234 = vmatprep.mubr.f32.mxu0 %v2584_v7 }
  0x9b   :  { %1049 = vmatprep.mubr.f32.mxu1 %v2584_v7 }
  0x9d   :  { %2334 = vmatmul.mubr.msk.f32.gmra.mrb[72].mxu0 %vm93_vm0, %v2903_v23 }
  0x9e   :  { %2314 = vmatmul.mubr.msk.f32.gmra.mrb[72].mxu1 %vm93_vm0, %v2971_v37  ;;  %1240 = vmatprep.mubr.f32.mxu0 %v2584_v7 }
  0x9f   :  { %1055 = vmatprep.mubr.f32.mxu1 %v2584_v7  ;;  %v3300_v3 = vpop.permute.xlu1 %320  ;;  %v3302_v5 = vpop.permute.xlu0 %315 }
  0xa1   :  { %2335 = vmatmul.mubr.msk.f32.gmra.mrb[74].mxu0 %vm93_vm0, %v2920_v27 }
  0xa2   :  { %2315 = vmatmul.mubr.msk.f32.gmra.mrb[74].mxu1 %vm93_vm0, %v2988_v40  ;;  %1246 = vmatprep.mubr.f32.mxu0 %v2584_v7 }
  0xa3   :  { %1061 = vmatprep.mubr.f32.mxu1 %v2584_v7  ;;  %v81_v12 = vpop.permute.xlu1 %80  ;;  %v76_v21 = vpop.permute.xlu0 %75 }
  0xa5   :  { %2336 = vmatmul.mubr.msk.f32.gmra.mrb[76].mxu0 %vm93_vm0, %v2937_v30 }
  0xa6   :  { %2316 = vmatmul.mubr.msk.f32.gmra.mrb[76].mxu1 %vm93_vm0, %v3005_v44  ;;  %1252 = vmatprep.mubr.f32.mxu0 %v2584_v7 }
  0xa7   :  { %1067 = vmatprep.mubr.f32.mxu1 %v2584_v7  ;;  %v3315_v24 = vpop.permute.xlu1 %330  ;;  %v3323_v39 = vpop.permute.xlu0 %325 }
  0xa9   :  { %2337 = vmatmul.mubr.msk.f32.gmra.mrb[78].mxu0 %vm93_vm0, %v2954_v33 }
  0xaa   :  { %2317 = vmatmul.mubr.msk.f32.gmra.mrb[78].mxu1 %vm93_vm0, %v3022_v47  ;;  %1258 = vmatprep.mubr.f32.mxu0 %v2584_v7 }
  0xab   :  { %1073 = vmatprep.mubr.f32.mxu1 %v2584_v7  ;;  %v91_v49 = vpop.permute.xlu1 %90 }
  0xad   :  { %2338 = vmatmul.mubr.msk.f32.gmra.mrb[80].mxu0 %vm93_vm0, %v2971_v37 }
  0xae   :  { %2318 = vmatmul.mubr.msk.f32.gmra.mrb[80].mxu1 %vm93_vm0, %v3039_v50  ;;  %1264 = vmatprep.mubr.f32.mxu0 %v2584_v7 }
  0xaf   :  { %1079 = vmatprep.mubr.f32.mxu1 %v2584_v7 }
  0xb1   :  { %2339 = vmatmul.mubr.msk.f32.gmra.mrb[82].mxu0 %vm93_vm0, %v2988_v40 }
  0xb2   :  { %2319 = vmatmul.mubr.msk.f32.gmra.mrb[82].mxu1 %vm93_vm0, %v3056_v53  ;;  %1270 = vmatprep.mubr.f32.mxu0 %v2584_v7 }
  0xb3   :  { %1085 = vmatprep.mubr.f32.mxu1 %v2584_v7 }
  0xb5   :  { %2340 = vmatmul.mubr.msk.f32.gmra.mrb[84].mxu0 %vm93_vm0, %v3005_v44 }
  0xb6   :  { %2320 = vmatmul.mubr.msk.f32.gmra.mrb[84].mxu1 %vm93_vm0, %v3073_v57  ;;  %1276 = vmatprep.mubr.f32.mxu0 %v2584_v7 }
  0xb7   :  { %1091 = vmatprep.mubr.f32.mxu1 %v2584_v7 }
  0xb9   :  { %2341 = vmatmul.mubr.msk.f32.gmra.mrb[86].mxu0 %vm93_vm0, %v3022_v47 }
  0xba   :  { %2321 = vmatmul.mubr.msk.f32.gmra.mrb[86].mxu1 %vm93_vm0, %v3090_v60  ;;  %1282 = vmatprep.mubr.f32.mxu0 %v2584_v7 }
  0xbb   :  { %1097 = vmatprep.mubr.f32.mxu1 %v2584_v7 }
  0xbd   :  { %2342 = vmatmul.mubr.msk.f32.gmra.mrb[88].mxu0 %vm93_vm0, %v3039_v50 }
  0xbe   :  { %2322 = vmatmul.mubr.msk.f32.gmra.mrb[88].mxu1 %vm93_vm0, %v3101_v61  ;;  %1288 = vmatprep.mubr.f32.mxu0 %v2584_v7 }
  0xbf   :  { %1103 = vmatprep.mubr.f32.mxu1 %v2584_v7 }
  0xc1   :  { %2343 = vmatmul.mubr.msk.f32.gmra.mrb[90].mxu0 %vm93_vm0, %v3056_v53 }
  0xc2   :  { %2323 = vmatmul.mubr.msk.f32.gmra.mrb[90].mxu1 %vm93_vm0, %v3112_v62  ;;  %1294 = vmatprep.mubr.f32.mxu0 %v2584_v7 }
  0xc3   :  { %1109 = vmatprep.mubr.f32.mxu1 %v2584_v7 }
  0xc5   :  { %2344 = vmatmul.mubr.msk.f32.gmra.mrb[92].mxu0 %vm93_vm0, %v3073_v57 }
  0xc6   :  { %2324 = vmatmul.mubr.msk.f32.gmra.mrb[92].mxu1 %vm93_vm0, %v3123_v63  ;;  %1300 = vmatprep.mubr.f32.mxu0 %v2584_v7 }
  0xc7   :  { %1115 = vmatprep.mubr.f32.mxu1 %v2584_v7 }
  0xc9   :  { %2345 = vmatmul.mubr.msk.f32.gmra.mrb[94].mxu0 %vm93_vm0, %v3090_v60 }
  0xca   :  { %2325 = vmatmul.mubr.msk.f32.gmra.mrb[94].mxu1 %vm93_vm0, %v3134_v0  ;;  %1306 = vmatprep.mubr.f32.mxu0 %v2584_v7 }
  0xcd   :  { %2346 = vmatmul.mubr.msk.f32.gmra.mrb[96].mxu0 %vm93_vm0, %v3101_v61 }
  0xce   :  { %1312 = vmatprep.mubr.f32.mxu0 %v2584_v7 }
  0xd1   :  { %2347 = vmatmul.mubr.msk.f32.gmra.mrb[98].mxu0 %vm93_vm0, %v3112_v62 }
  0xd2   :  { %1318 = vmatprep.mubr.f32.mxu0 %v2584_v7 }
  0xd5   :  { %2348 = vmatmul.mubr.msk.f32.gmra.mrb[100].mxu0 %vm93_vm0, %v3123_v63 }
  0xd6   :  { %1324 = vmatprep.mubr.f32.mxu0 %v2584_v7 }
  0xd9   :  { %2349 = vmatmul.mubr.msk.f32.gmra.mrb[102].mxu0 %vm93_vm0, %v3134_v0 }
  0xdf   :  { %v2392_v4 = vpop.f32.mrb[0].mxu0 }
  0xe0   :  { %v184_v8 = vpop.f32.mrb[1].mxu0  ;;  %v3310_v18 = vadd.f32 %v2392_v4, %v61_v55 }
  0xe1   :  { %v561_v6 = vpop.f32.mrb[0].mxu1  ;;  %v3305_v11 = vadd.f32 %v184_v8, %v56_v36 }
  0xe2   :  { %v562_v9 = vadd.f32 %v561_v6, %v3285_v25  ;;  %v563_v10 = vpop.f32.mrb[1].mxu1 }
  0xe3   :  { %v564_v7 = vadd.f32 %v563_v10, %v3285_v25  ;;  %v2395_v14 = vpop.f32.mrb[2].mxu0 }
  0xe4   :  { %v1331_v13 = vmul.f32 %v562_v9, %v3305_v11  ;;  %v194_v17 = vpop.f32.mrb[3].mxu0  ;;  %v3326_v47 = vadd.f32 %v2395_v14, %v71_v1  ;;  %v86_v9 = vpop.permute.xlu0 %85 }
  0xe5   :  { %v567_v15 = vpop.f32.mrb[2].mxu1  ;;  %v1340_v16 = vmul.f32 %v564_v7, %v3305_v11  ;;  %v3318_v31 = vadd.f32 %v194_v17, %v66_v2 }
  0xe6   :  { %v568_v19 = vadd.f32 %v567_v15, %v3290_v41  ;;  %v569_v20 = vpop.f32.mrb[3].mxu1 }
  0xe7   :  { %v570_v22 = vadd.f32 %v569_v20, %v3290_v41  ;;  %v2398_v26 = vpop.f32.mrb[4].mxu0 }
  0xe8   :  { %v1332_v23 = vmul.f32 %v568_v19, %v3310_v18  ;;  %v204_v29 = vpop.f32.mrb[5].mxu0  ;;  %v3330_v54 = vadd.f32 %v2398_v26, %v81_v12 }
  0xe9   :  { %v1341_v27 = vmul.f32 %v570_v22, %v3310_v18  ;;  %v573_v28 = vpop.f32.mrb[4].mxu1  ;;  %v3332_v56 = vadd.f32 %v204_v29, %v76_v21 }
  0xea   :  { %v1333_v30 = vadd.f32 %v1332_v23, %v1331_v13  ;;  %v574_v32 = vadd.f32 %v573_v28, %v3302_v5  ;;  %v575_v33 = vpop.f32.mrb[5].mxu1 }
  0xeb   :  { %v1342_v34 = vadd.f32 %v1341_v27, %v1340_v16  ;;  %v576_v35 = vadd.f32 %v575_v33, %v3302_v5  ;;  %v2401_v40 = vpop.f32.mrb[6].mxu0 }
  0xec   :  { %v1334_v37 = vrot.slane %v1333_v30, 4  ;;  %v1527_v38 = vmul.f32 %v574_v32, %v3318_v31  ;;  %v214_v45 = vpop.f32.mrb[7].mxu0  ;;  %v3335_v60 = vadd.f32 %v2401_v40, %v91_v49 }
  0xed   :  { %v1343_v42 = vrot.slane %v1342_v34, 4  ;;  %v1536_v43 = vmul.f32 %v576_v35, %v3318_v31  ;;  %v579_v44 = vpop.f32.mrb[6].mxu1  ;;  %v3353_v40 = vadd.f32 %v214_v45, %v86_v9 }
  0xee   :  { %v1335_v46 = vadd.f32 %v1334_v37, %v1333_v30  ;;  %v580_v48 = vadd.f32 %v579_v44, %v3300_v3  ;;  %v581_v50 = vpop.f32.mrb[7].mxu1  ;;  %4634 = vst [vmem:[#allocation8_spill] sm:$0xff] %v3335_v60  ;;  %v3351_v37 = vpop.permute.xlu0 %335 }
  0xef   :  { %v1344_v51 = vadd.f32 %v1343_v42, %v1342_v34  ;;  %v582_v52 = vadd.f32 %v581_v50, %v3300_v3  ;;  %v770_v58 = vpop.f32.mrb[8].mxu0 }
  0xf0   :  { %v1336_v53 = vrot.slane %v1335_v46, 2  ;;  %v1528_v57 = vmul.f32 %v580_v48, %v3326_v47  ;;  %v771_v63 = vadd.f32 %v770_v58, %v3285_v25  ;;  %v772_v0 = vpop.f32.mrb[9].mxu0 }
  0xf1   :  { %v1345_v59 = vrot.slane %v1344_v51, 2  ;;  %v1537_v61 = vmul.f32 %v582_v52, %v3326_v47  ;;  %v585_v62 = vpop.f32.mrb[8].mxu1  ;;  %v773_v4 = vadd.f32 %v772_v0, %v3285_v25 }
  0xf2   :  { %v1337_v36 = vadd.f32 %v1336_v53, %v1335_v46  ;;  %v1529_v55 = vadd.f32 %v1528_v57, %v1527_v38  ;;  %v586_v1 = vadd.f32 %v585_v62, %v3323_v39  ;;  %v587_v2 = vpop.f32.mrb[9].mxu1  ;;  %v1349_v10 = vmul.f32 %v771_v63, %v3305_v11 }
  0xf3   :  { %v1346_v6 = vadd.f32 %v1345_v59, %v1344_v51  ;;  %v1538_v8 = vadd.f32 %v1537_v61, %v1536_v43  ;;  %v588_v12 = vadd.f32 %v587_v2, %v3323_v39  ;;  %v1358_v15 = vmul.f32 %v773_v4, %v3305_v11  ;;  %v3364_v4 = vpop.permute.xlu1 %340 }
  0xf4   :  { %v1338_v7 = vrot.slane %v1337_v36, 1  ;;  %v1530_v13 = vrot.slane %v1529_v55, 4  ;;  %v1717_v14 = vmul.f32 %v586_v1, %v3332_v56  ;;  %v776_v16 = vpop.f32.mrb[10].mxu0  ;;  %4635 = vst [vmem:[#allocation9_spill] sm:$0xff] %v3364_v4 }
  0xf5   :  { %v1347_v17 = vrot.slane %v1346_v6, 1  ;;  %v1539_v19 = vrot.slane %v1538_v8, 4  ;;  %v1726_v20 = vmul.f32 %v588_v12, %v3332_v56  ;;  %v591_v21 = vpop.f32.mrb[10].mxu1  ;;  %v777_v22 = vadd.f32 %v776_v16, %v3290_v41  ;;  %v778_v23 = vpop.f32.mrb[11].mxu0 }
  0xf6   :  { %v1339_v26 = vadd.f32 %v1338_v7, %v1337_v36  ;;  %v1531_v27 = vadd.f32 %v1530_v13, %v1529_v55  ;;  %v592_v28 = vadd.f32 %v591_v21, %v3315_v24  ;;  %v593_v29 = vpop.f32.mrb[11].mxu1  ;;  %v779_v30 = vadd.f32 %v778_v23, %v3290_v41 }
  0xf7   :  { %v1348_v32 = vadd.f32 %v1347_v17, %v1346_v6  ;;  %v1540_v33 = vadd.f32 %v1539_v19, %v1538_v8  ;;  %v1350_v34 = vmul.f32 %v777_v22, %v3310_v18  ;;  %v594_v35 = vadd.f32 %v593_v29, %v3315_v24 }
  0xf8   :  { %v1532_v38 = vrot.slane %v1531_v27, 2  ;;  %v1718_v42 = vmul.f32 %v592_v28, %v3330_v54  ;;  %v1359_v43 = vmul.f32 %v779_v30, %v3310_v18  ;;  %v782_v44 = vpop.f32.mrb[12].mxu0 }
  0xf9   :  { %v3358_v46 = vsel %vm1403_vm1, %v1339_v26, %v1348_v32  ;;  %v1541_v48 = vrot.slane %v1540_v33, 2  ;;  %v1351_v49 = vadd.f32 %v1350_v34, %v1349_v10  ;;  %v1727_v50 = vmul.f32 %v594_v35, %v3330_v54  ;;  %v597_v51 = vpop.f32.mrb[12].mxu1  ;;  %v784_v52 = vpop.f32.mrb[13].mxu0 }
  0xfa   :  { %v1533_v53 = vadd.f32 %v1532_v38, %v1531_v27  ;;  %v1719_v57 = vadd.f32 %v1718_v42, %v1717_v14  ;;  %v1360_v58 = vadd.f32 %v1359_v43, %v1358_v15  ;;  %v598_v45 = vadd.f32 %v597_v51, %v3351_v37  ;;  %v599_v59 = vpop.f32.mrb[13].mxu1 }
  0xfb   :  { %v1542_v61 = vadd.f32 %v1541_v48, %v1540_v33  ;;  %v1352_v62 = vrot.slane %v1351_v49, 4  ;;  %v1728_v63 = vadd.f32 %v1727_v50, %v1726_v20  ;;  %v783_v0 = vadd.f32 %v782_v44, %v3302_v5 }
  0xfc   :  { %v1534_v36 = vrot.slane %v1533_v53, 1  ;;  %v1720_v55 = vrot.slane %v1719_v57, 4  ;;  %v1361_v1 = vrot.slane %v1360_v58, 4  ;;  %v1907_v2 = vmul.f32 %v598_v45, %v3353_v40  ;;  %v788_v6 = vpop.f32.mrb[14].mxu0 }
  0xfd   :  { %v1543_v8 = vrot.slane %v1542_v61, 1  ;;  %v1353_v9 = vadd.f32 %v1352_v62, %v1351_v49  ;;  %v1729_v10 = vrot.slane %v1728_v63, 4  ;;  %v1545_v12 = vmul.f32 %v783_v0, %v3318_v31  ;;  %v603_v7 = vpop.f32.mrb[14].mxu1  ;;  %v790_v13 = vpop.f32.mrb[15].mxu0 }
  0xfe   :  { %v1535_v14 = vadd.f32 %v1534_v36, %v1533_v53  ;;  %v1721_v15 = vadd.f32 %v1720_v55, %v1719_v57  ;;  %v1362_v16 = vadd.f32 %v1361_v1, %v1360_v58  ;;  %v600_v17 = vadd.f32 %v599_v59, %v3351_v37  ;;  %v605_v19 = vpop.f32.mrb[15].mxu1 }
  0xff   :  { %v1544_v20 = vadd.f32 %v1543_v8, %v1542_v61  ;;  %v1354_v21 = vrot.slane %v1353_v9, 2  ;;  %v1730_v22 = vadd.f32 %v1729_v10, %v1728_v63  ;;  %v785_v23 = vadd.f32 %v784_v52, %v3302_v5 }
 0x100   :  { %v1722_v26 = vrot.slane %v1721_v15, 2  ;;  %v1363_v27 = vrot.slane %v1362_v16, 2  ;;  %v1916_v28 = vmul.f32 %v600_v17, %v3353_v40  ;;  %v604_v29 = vadd.f32 %v603_v7, %v3364_v4  ;;  %v794_v30 = vpop.f32.mrb[16].mxu0 }
 0x101   :  { %v3372_v32 = vsel %vm1403_vm1, %v1535_v14, %v1544_v20  ;;  %v1355_v33 = vadd.f32 %v1354_v21, %v1353_v9  ;;  %v1731_v34 = vrot.slane %v1730_v22, 2  ;;  %v1554_v35 = vmul.f32 %v785_v23, %v3318_v31  ;;  %v796_v38 = vpop.f32.mrb[17].mxu0  ;;  %v3375_v42 = vpop.f32.mrb[16].mxu1 }
 0x102   :  { %v1723_v43 = vadd.f32 %v1722_v26, %v1721_v15  ;;  %v1364_v44 = vadd.f32 %v1363_v27, %v1362_v16  ;;  %v1908_v48 = vmul.f32 %v604_v29, %v3335_v60  ;;  %v789_v49 = vadd.f32 %v788_v6, %v3300_v3  ;;  %v3379_v50 = vpop.f32.mrb[17].mxu1 }
 0x103   :  { %v1356_v51 = vrot.slane %v1355_v33, 1  ;;  %v1732_v52 = vadd.f32 %v1731_v34, %v1730_v22  ;;  %v606_v53 = vadd.f32 %v605_v19, %v3364_v4  ;;  %v791_v57 = vadd.f32 %v790_v13, %v3300_v3 }
 0x104   :  { %v1724_v58 = vrot.slane %v1723_v43, 1  ;;  %v1365_v45 = vrot.slane %v1364_v44, 1  ;;  %v1909_v59 = vadd.f32 %v1908_v48, %v1907_v2  ;;  %v1546_v61 = vmul.f32 %v789_v49, %v3326_v47  ;;  %v800_v62 = vpop.f32.mrb[18].mxu0 }
 0x105   :  { %v1357_v63 = vadd.f32 %v1356_v51, %v1355_v33  ;;  %v1733_v0 = vrot.slane %v1732_v52, 1  ;;  %v1917_v36 = vmul.f32 %v606_v53, %v3335_v60  ;;  %v1555_v55 = vmul.f32 %v791_v57, %v3326_v47  ;;  %v802_v1 = vpop.f32.mrb[19].mxu0  ;;  %v3386_v6 = vpop.f32.mrb[18].mxu1 }
 0x106   :  { %v1725_v8 = vadd.f32 %v1724_v58, %v1723_v43  ;;  %v1366_v9 = vadd.f32 %v1365_v45, %v1364_v44  ;;  %v1910_v10 = vrot.slane %v1909_v59, 4  ;;  %v1547_v7 = vadd.f32 %v1546_v61, %v1545_v12  ;;  %v3388_v13 = vpop.f32.mrb[19].mxu1 }
 0x107   :  { %v1406_v2 = vsel %vm1405_vm2, %v3358_v46, %v1357_v63  ;;  %v1734_v14 = vadd.f32 %v1733_v0, %v1732_v52  ;;  %v1918_v15 = vadd.f32 %v1917_v36, %v1916_v28  ;;  %v1556_v16 = vadd.f32 %v1555_v55, %v1554_v35 }
 0x108   :  { %v3393_v17 = vsel %vm1407_vm3, %v1406_v2, %v1366_v9  ;;  %v1548_v19 = vrot.slane %v1547_v7, 4  ;;  %v1911_v20 = vadd.f32 %v1910_v10, %v1909_v59  ;;  %v795_v21 = vadd.f32 %v794_v30, %v3323_v39  ;;  %v806_v22 = vpop.f32.mrb[20].mxu0 }
 0x109   :  { %v3397_v23 = vsel %vm1403_vm1, %v1725_v8, %v1734_v14  ;;  %v1919_v12 = vrot.slane %v1918_v15, 4  ;;  %v1557_v26 = vrot.slane %v1556_v16, 4  ;;  %v797_v27 = vadd.f32 %v796_v38, %v3323_v39  ;;  %v808_v29 = vpop.f32.mrb[21].mxu0  ;;  %v3400_v46 = vpop.f32.mrb[20].mxu1 }
 0x10a   :  { %v1549_v28 = vadd.f32 %v1548_v19, %v1547_v7  ;;  %v1912_v33 = vrot.slane %v1911_v20, 2  ;;  %v1735_v34 = vmul.f32 %v795_v21, %v3332_v56  ;;  %v801_v35 = vadd.f32 %v800_v62, %v3315_v24  ;;  %v3404_v43 = vpop.f32.mrb[21].mxu1 }
 0x10b   :  { %v1920_v30 = vadd.f32 %v1919_v12, %v1918_v15  ;;  %v1558_v44 = vadd.f32 %v1557_v26, %v1556_v16  ;;  %v1744_v48 = vmul.f32 %v797_v27, %v3332_v56  ;;  %v803_v49 = vadd.f32 %v802_v1, %v3315_v24 }
 0x10c   :  { %v1550_v51 = vrot.slane %v1549_v28, 2  ;;  %v1913_v52 = vadd.f32 %v1912_v33, %v1911_v20  ;;  %v1736_v38 = vmul.f32 %v801_v35, %v3330_v54  ;;  %v807_v53 = vadd.f32 %v806_v22, %v3351_v37  ;;  %v812_v57 = vpop.f32.mrb[22].mxu0 }
 0x10d   :  { %v1921_v58 = vrot.slane %v1920_v30, 2  ;;  %v1559_v45 = vrot.slane %v1558_v44, 2  ;;  %v1745_v59 = vmul.f32 %v803_v49, %v3330_v54  ;;  %v809_v61 = vadd.f32 %v808_v29, %v3351_v37  ;;  %v814_v62 = vpop.f32.mrb[23].mxu0  ;;  %v3412_v63 = vpop.f32.mrb[22].mxu1 }
 0x10e   :  { %v1551_v0 = vadd.f32 %v1550_v51, %v1549_v28  ;;  %v1914_v36 = vrot.slane %v1913_v52, 1  ;;  %v1737_v55 = vadd.f32 %v1736_v38, %v1735_v34  ;;  %v1925_v1 = vmul.f32 %v807_v53, %v3353_v40  ;;  %v3415_v8 = vpop.f32.mrb[23].mxu1 }
 0x10f   :  { %v1922_v9 = vadd.f32 %v1921_v58, %v1920_v30  ;;  %v1560_v10 = vadd.f32 %v1559_v45, %v1558_v44  ;;  %v1746_v7 = vadd.f32 %v1745_v59, %v1744_v48  ;;  %v1934_v2 = vmul.f32 %v809_v61, %v3353_v40 }
 0x110   :  { %v1552_v14 = vrot.slane %v1551_v0, 1  ;;  %v1915_v15 = vadd.f32 %v1914_v36, %v1913_v52  ;;  %v1738_v16 = vrot.slane %v1737_v55, 4  ;;  %v813_v19 = vadd.f32 %v812_v57, %v3364_v4  ;;  %v3419_v20 = vpop.f32.mrb[24].mxu0 }
 0x111   :  { %v1923_v21 = vrot.slane %v1922_v9, 1  ;;  %v1561_v22 = vrot.slane %v1560_v10, 1  ;;  %v1747_v12 = vrot.slane %v1746_v7, 4  ;;  %v815_v26 = vadd.f32 %v814_v62, %v3364_v4  ;;  %v3422_v27 = vpop.f32.mrb[25].mxu0  ;;  %v3424_v29 = vpop.f32.mrb[24].mxu1 }
 0x112   :  { %v1553_v28 = vadd.f32 %v1552_v14, %v1551_v0  ;;  %v1739_v33 = vadd.f32 %v1738_v16, %v1737_v55  ;;  %v1926_v34 = vmul.f32 %v813_v19, %v3335_v60  ;;  %v3427_v35 = vpop.f32.mrb[25].mxu1 }
 0x113   :  { %v1924_v30 = vadd.f32 %v1923_v21, %v1922_v9  ;;  %v1562_v44 = vadd.f32 %v1561_v22, %v1560_v10  ;;  %v1748_v48 = vadd.f32 %v1747_v12, %v1746_v7  ;;  %v1935_v49 = vmul.f32 %v815_v26, %v3335_v60 }
 0x114   :  { %v1600_v51 = vsel %vm1405_vm2, %v3372_v32, %v1553_v28  ;;  %v1740_v52 = vrot.slane %v1739_v33, 2  ;;  %v1927_v38 = vadd.f32 %v1926_v34, %v1925_v1  ;;  %v3432_v53 = vpop.f32.mrb[26].mxu0 }
 0x115   :  { %v1979_v57 = vsel %vm1403_vm1, %v1915_v15, %v1924_v30  ;;  %v3436_v58 = vsel %vm1407_vm3, %v1600_v51, %v1562_v44  ;;  %v1749_v45 = vrot.slane %v1748_v48, 2  ;;  %v1936_v59 = vadd.f32 %v1935_v49, %v1934_v2  ;;  %v3438_v61 = vpop.f32.mrb[27].mxu0  ;;  %v3440_v62 = vpop.f32.mrb[26].mxu1 }
 0x116   :  { %v1741_v0 = vadd.f32 %v1740_v52, %v1739_v33  ;;  %v1928_v36 = vrot.slane %v1927_v38, 4  ;;  %v3442_v55 = vpop.f32.mrb[27].mxu1 }
 0x117   :  { %v1750_v32 = vadd.f32 %v1749_v45, %v1748_v48  ;;  %v1937_v9 = vrot.slane %v1936_v59, 4 }
 0x118   :  { %v1742_v1 = vrot.slane %v1741_v0, 1  ;;  %v1929_v10 = vadd.f32 %v1928_v36, %v1927_v38  ;;  %v3444_v7 = vpop.f32.mrb[28].mxu0 }
 0x119   :  { %v1751_v14 = vrot.slane %v1750_v32, 1  ;;  %v1938_v15 = vadd.f32 %v1937_v9, %v1936_v59  ;;  %v3446_v16 = vpop.f32.mrb[29].mxu0  ;;  %v3448_v19 = vpop.f32.mrb[28].mxu1 }
 0x11a   :  { %v1743_v2 = vadd.f32 %v1742_v1, %v1741_v0  ;;  %v1930_v21 = vrot.slane %v1929_v10, 2  ;;  %v3450_v22 = vpop.f32.mrb[29].mxu1 }
 0x11b   :  { %v1752_v12 = vadd.f32 %v1751_v14, %v1750_v32  ;;  %v1939_v26 = vrot.slane %v1938_v15, 2 }
 0x11c   :  { %v1790_v28 = vsel %vm1405_vm2, %v3397_v23, %v1743_v2  ;;  %v1931_v33 = vadd.f32 %v1930_v21, %v1929_v10  ;;  %v3454_v34 = vpop.f32.mrb[30].mxu0 }
 0x11d   :  { %v3457_v30 = vsel %vm1407_vm3, %v1790_v28, %v1752_v12  ;;  %v1940_v44 = vadd.f32 %v1939_v26, %v1938_v15  ;;  %v3459_v48 = vpop.f32.mrb[31].mxu0  ;;  %v3461_v49 = vpop.f32.mrb[30].mxu1 }
 0x11e   :  { %4636 = vst [vmem:[#allocation10_spill] sm:$0xff] %v3457_v30  ;;  %v1932_v51 = vrot.slane %v1931_v33, 1  ;;  %v3463_v52 = vpop.f32.mrb[31].mxu1 }
 0x11f   :  { %v1941_v38 = vrot.slane %v1940_v44, 1 }
 0x120   :  { %v1933_v45 = vadd.f32 %v1932_v51, %v1931_v33  ;;  %v3465_v59 = vpop.f32.mrb[32].mxu0 }
 0x121   :  { %v1942_v0 = vadd.f32 %v1941_v38, %v1940_v44  ;;  %v3467_v23 = vpop.f32.mrb[33].mxu0  ;;  %v3469_v36 = vpop.f32.mrb[32].mxu1 }
 0x122   :  { %v1980_v32 = vsel %vm1405_vm2, %v1979_v57, %v1933_v45  ;;  %v3472_v9 = vpop.f32.mrb[33].mxu1 }
 0x123   :  { %v3475_v1 = vsel %vm1407_vm3, %v1980_v32, %v1942_v0 }
 0x124   :  { %4637 = vst [vmem:[#allocation11_spill] sm:$0xff] %v3475_v1  ;;  %v3477_v10 = vpop.f32.mrb[34].mxu0 }
 0x125   :  { %v3479_v14 = vpop.f32.mrb[35].mxu0  ;;  %v3481_v15 = vpop.f32.mrb[34].mxu1 }
 0x126   :  { %v3483_v2 = vpop.f32.mrb[35].mxu1 }
 0x128   :  { %v3485_v21 = vpop.f32.mrb[36].mxu0 }
 0x129   :  { %v3487_v12 = vpop.f32.mrb[37].mxu0  ;;  %v3489_v26 = vpop.f32.mrb[36].mxu1 }
 0x12a   :  { %4638 = vst [vmem:[#allocation12_spill] sm:$0xff] %v3489_v26  ;;  %v3491_v57 = vpop.f32.mrb[37].mxu1 }
 0x12b   :  { %4639 = vst [vmem:[#allocation13_spill] sm:$0xff] %v3491_v57 }
 0x12c   :  { %v3493_v28 = vpop.f32.mrb[38].mxu0 }
 0x12d   :  { %4640 = vst [vmem:[#allocation14_spill] sm:$0xff] %v3493_v28  ;;  %v3495_v33 = vpop.f32.mrb[39].mxu0  ;;  %v3497_v44 = vpop.f32.mrb[38].mxu1 }
 0x12e   :  { %4641 = vst [vmem:[#allocation15_spill] sm:$0xff] %v3495_v33  ;;  %4642 = vst [vmem:[#allocation16_spill] sm:$0xff] %v3497_v44  ;;  %v3499_v51 = vpop.f32.mrb[39].mxu1  ;;  %v3517_v33 = vpop.permute.xlu0 %345 }
 0x12f   :  { %4643 = vst [vmem:[#allocation17_spill] sm:$0xff] %v3499_v51  ;;  %v3519_v44 = vpop.permute.xlu1 %350 }
 0x130   :  { %v3501_v38 = vpop.f32.mrb[40].mxu0 }
 0x131   :  { %4644 = vst [vmem:[#allocation18_spill] sm:$0xff] %v3501_v38  ;;  %v3503_v45 = vpop.f32.mrb[41].mxu0  ;;  %v3505_v0 = vpop.f32.mrb[40].mxu1 }
 0x132   :  { %4645 = vst [vmem:[#allocation19_spill] sm:$0xff] %v3503_v45  ;;  %4646 = vst [vmem:[#allocation20_spill] sm:$0xff] %v3505_v0  ;;  %v3507_v32 = vpop.f32.mrb[41].mxu1 }
 0x133   :  { %4647 = vst [vmem:[#allocation21_spill] sm:$0xff] %v3507_v32  ;;  %v3529_v32 = vpop.permute.xlu0 %355 }
 0x134   :  { %v3509_v1 = vpop.f32.mrb[42].mxu0 }
 0x135   :  { %4648 = vst [vmem:[#allocation22_spill] sm:$0xff] %v3509_v1  ;;  %v3511_v26 = vpop.f32.mrb[43].mxu0  ;;  %v3513_v57 = vpop.f32.mrb[42].mxu1 }
 0x136   :  { %4649 = vst [vmem:[#allocation23_spill] sm:$0xff] %v3511_v26  ;;  %4650 = vst [vmem:[#allocation24_spill] sm:$0xff] %v3513_v57  ;;  %v3515_v28 = vpop.f32.mrb[43].mxu1  ;;  %v3531_v1 = vpop.permute.xlu1 %360 }
 0x137   :  { %4651 = vst [vmem:[#allocation25_spill] sm:$0xff] %v3515_v28  ;;  %v3541_v60 = vpop.permute.xlu0 %365 }
 0x138   :  { %v3521_v51 = vpop.f32.mrb[44].mxu0  ;;  %4660 = vst [vmem:[#allocation34_spill] sm:$0xff] %v3541_v60 }
 0x139   :  { %4652 = vst [vmem:[#allocation26_spill] sm:$0xff] %v3521_v51  ;;  %v3523_v38 = vpop.f32.mrb[45].mxu0  ;;  %v3525_v45 = vpop.f32.mrb[44].mxu1 }
 0x13a   :  { %4653 = vst [vmem:[#allocation27_spill] sm:$0xff] %v3523_v38  ;;  %4654 = vst [vmem:[#allocation28_spill] sm:$0xff] %v3525_v45  ;;  %v3527_v0 = vpop.f32.mrb[45].mxu1  ;;  %v3543_v51 = vpop.permute.xlu1 %370  ;;  %v3553_v45 = vadd.f32 %v3422_v27, %v3517_v33  ;;  %v3572_v27 = vadd.f32 %v3379_v50, %v3517_v33  ;;  %v3591_v50 = vadd.f32 %v3446_v16, %v3529_v32 }
 0x13b   :  { %4655 = vst [vmem:[#allocation29_spill] sm:$0xff] %v3527_v0  ;;  %4661 = vst [vmem:[#allocation35_spill] sm:$0xff] %v3543_v51  ;;  %v3549_v0 = vadd.f32 %v3419_v20, %v3517_v33  ;;  %v3568_v20 = vadd.f32 %v3375_v42, %v3517_v33  ;;  %v3587_v42 = vadd.f32 %v3388_v13, %v3519_v44 }
 0x13c   :  { %v3533_v26 = vpop.f32.mrb[46].mxu0  ;;  %4664 = vst [vmem:[#allocation38_spill] sm:$0xff] %v3553_v45  ;;  %4668 = vst [vmem:[#allocation42_spill] sm:$0xff] %v3572_v27  ;;  %v3611_v16 = vadd.f32 %v3412_v63, %v3531_v1  ;;  %v3632_v63 = vadd.f32 %v3440_v62, %v3543_v51 }
 0x13d   :  { %4656 = vst [vmem:[#allocation30_spill] sm:$0xff] %v3533_v26  ;;  %v3535_v57 = vpop.f32.mrb[47].mxu0  ;;  %v3537_v28 = vpop.f32.mrb[46].mxu1  ;;  %4663 = vst [vmem:[#allocation37_spill] sm:$0xff] %v3549_v0 }
 0x13e   :  { %4657 = vst [vmem:[#allocation31_spill] sm:$0xff] %v3535_v57  ;;  %4658 = vst [vmem:[#allocation32_spill] sm:$0xff] %v3537_v28  ;;  %v3539_v30 = vpop.f32.mrb[47].mxu1  ;;  %v3557_v57 = vadd.f32 %v3432_v53, %v3519_v44  ;;  %v3576_v53 = vadd.f32 %v3386_v6, %v3519_v44  ;;  %v3593_v45 = vpop.permute.xlu1 %380 }
 0x13f   :  { %4659 = vst [vmem:[#allocation33_spill] sm:$0xff] %v3539_v30  ;;  %v3561_v30 = vadd.f32 %v3438_v61, %v3519_v44  ;;  %4667 = vst [vmem:[#allocation41_spill] sm:$0xff] %v3568_v20  ;;  %v3580_v61 = vadd.f32 %v3444_v7, %v3529_v32  ;;  %v3600_v7 = vadd.f32 %v3400_v46, %v3529_v32 }
 0x140   :  { %v3545_v38 = vpop.f32.mrb[48].mxu0  ;;  %4665 = vst [vmem:[#allocation39_spill] sm:$0xff] %v3557_v57  ;;  %4669 = vst [vmem:[#allocation43_spill] sm:$0xff] %v3576_v53  ;;  %v1435_v57 = vlaneseq  ;;  %v3619_v46 = vadd.f32 %v3424_v29, %v3541_v60 }
 0x141   :  { %4662 = vst [vmem:[#allocation36_spill] sm:$0xff] %v3545_v38  ;;  %4666 = vst [vmem:[#allocation40_spill] sm:$0xff] %v3561_v30  ;;  %v979_v28 = vpop.f32.mrb[48].mxu1  ;;  %v3563_v26 = vpop.f32.mrb[49].mxu0 }
 0x142   :  { %v980_v38 = vadd.f32 %v979_v28, %v3285_v25  ;;  %v981_v4 = vpop.f32.mrb[49].mxu1  ;;  %4670 = vst [vmem:[#allocation44_spill] sm:$0xff] %v3580_v61  ;;  %v3582_v30 = vpop.permute.xlu0 %375  ;;  %4672 = vst [vmem:[#allocation46_spill] sm:$0xff] %v3587_v42 }
 0x143   :  { %4671 = vst [vmem:[#allocation45_spill] sm:$0xff] %v3582_v30  ;;  %v982_v28 = vadd.f32 %v981_v4, %v3285_v25  ;;  %4673 = vst [vmem:[#allocation47_spill] sm:$0xff] %v3591_v50  ;;  %v3604_v4 = vadd.f32 %v3404_v43, %v3529_v32  ;;  %v3623_v43 = vadd.f32 %v3454_v34, %v3531_v1 }
 0x144   :  { %4674 = vst [vmem:[#allocation48_spill] sm:$0xff] %v3593_v45  ;;  %v1367_v6 = vmul.f32 %v980_v38, %v3305_v11  ;;  %v3596_v53 = vpop.f32.mrb[50].mxu0  ;;  %4675 = vst [vmem:[#allocation49_spill] sm:$0xff] %v3600_v7  ;;  %v3615_v38 = vadd.f32 %v3415_v8, %v3531_v1  ;;  %v3636_v8 = vadd.f32 %v3459_v48, %v3531_v1 }
 0x145   :  { %4676 = vst [vmem:[#allocation50_spill] sm:$0xff] %v3604_v4  ;;  %v1376_v13 = vmul.f32 %v982_v28, %v3305_v11  ;;  %v985_v61 = vpop.f32.mrb[50].mxu1  ;;  %v3607_v42 = vpop.f32.mrb[51].mxu0  ;;  %4677 = vst [vmem:[#allocation51_spill] sm:$0xff] %v3611_v16  ;;  %v3628_v4 = vadd.f32 %v3427_v35, %v3541_v60  ;;  %v3652_v62 = vadd.f32 %v3448_v19, %v3582_v30 }
 0x146   :  { %4678 = vst [vmem:[#allocation52_spill] sm:$0xff] %v3615_v38  ;;  %4679 = vst [vmem:[#allocation53_spill] sm:$0xff] %v3619_v46  ;;  %v986_v28 = vadd.f32 %v985_v61, %v3290_v41  ;;  %v987_v50 = vpop.f32.mrb[51].mxu1  ;;  %v3638_v29 = vpop.permute.xlu0 %385  ;;  %v3641_v46 = vshrl.u32 %v1435_v57, 7  ;;  %v3645_v61 = vadd.f32 %v3442_v55, %v3543_v51  ;;  %v3656_v48 = vadd.f32 %v3450_v22, %v3582_v30 }
 0x147   :  { %4680 = vst [vmem:[#allocation54_spill] sm:$0xff] %v3623_v43  ;;  %4681 = vst [vmem:[#allocation55_spill] sm:$0xff] %v3628_v4  ;;  %v988_v34 = vadd.f32 %v987_v50, %v3290_v41  ;;  %v3660_v57 = vadd.f32 %v3461_v49, %v3593_v45  ;;  %v3664_v55 = vadd.f32 %v3465_v59, %v3541_v60 }
 0x148   :  { %4682 = vst [vmem:[#allocation56_spill] sm:$0xff] %v3632_v63  ;;  %4683 = vst [vmem:[#allocation57_spill] sm:$0xff] %v3636_v8  ;;  %v1368_v35 = vmul.f32 %v986_v28, %v3310_v18  ;;  %v3648_v4 = vpop.f32.mrb[52].mxu0  ;;  %v3668_v50 = vadd.f32 %v3467_v23, %v3541_v60  ;;  %v3675_v22 = vadd.f32 %v3463_v52, %v3593_v45  ;;  %v3688_v63 = vsub.s32 0, %v3641_v46 }
 0x149   :  { %4684 = vst [vmem:[#allocation58_spill] sm:$0xff] %v3645_v61  ;;  %4685 = vst [vmem:[#allocation59_spill] sm:$0xff] %v3652_v62  ;;  %v1377_v28 = vmul.f32 %v988_v34, %v3310_v18  ;;  %v991_v19 = vpop.f32.mrb[52].mxu1  ;;  %v3671_v62 = vpop.f32.mrb[53].mxu0  ;;  %v3680_v59 = vadd.f32 %v3469_v36, %v3638_v29  ;;  %v3684_v23 = vadd.f32 %v3472_v9, %v3638_v29  ;;  %v3691_v52 = vsub.s32 1, %v3641_v46 }
 0x14a   :  { %4686 = vst [vmem:[#allocation60_spill] sm:$0xff] %v3656_v48  ;;  %4687 = vst [vmem:[#allocation61_spill] sm:$0xff] %v3660_v57  ;;  %v1369_v48 = vadd.f32 %v1368_v35, %v1367_v6  ;;  %v992_v49 = vadd.f32 %v991_v19, %v3302_v5  ;;  %v993_v57 = vpop.f32.mrb[53].mxu1  ;;  %v3693_v6 = vpop.permute.xlu1 %390  ;;  %v3702_v9 = vsub.s32 3, %v3641_v46 }
 0x14b   :  { %4688 = vst [vmem:[#allocation62_spill] sm:$0xff] %v3664_v55  ;;  %4689 = vst [vmem:[#allocation63_spill] sm:$0xff] %v3668_v50  ;;  %v1378_v34 = vadd.f32 %v1377_v28, %v1376_v13  ;;  %v994_v61 = vadd.f32 %v993_v57, %v3302_v5  ;;  %v3706_v13 = vadd.f32 %v3477_v10, %v3543_v51 }
 0x14c   :  { %4690 = vst [vmem:[#allocation64_spill] sm:$0xff] %v3675_v22  ;;  %4691 = vst [vmem:[#allocation65_spill] sm:$0xff] %v3680_v59  ;;  %v1370_v35 = vrot.slane %v1369_v48, 4  ;;  %v1563_v19 = vmul.f32 %v992_v49, %v3318_v31  ;;  %v3696_v36 = vpop.f32.mrb[54].mxu0  ;;  %v3699_v59 = vsub.s32 2, %v3641_v46  ;;  %v3712_v49 = vsub.s32 4, %v3641_v46 }
 0x14d   :  { %4692 = vst [vmem:[#allocation66_spill] sm:$0xff] %v3684_v23  ;;  %4693 = vst [vmem:[#allocation67_spill] sm:$0xff] %v3688_v63  ;;  %v1379_v57 = vrot.slane %v1378_v34, 4  ;;  %v1572_v28 = vmul.f32 %v994_v61, %v3318_v31  ;;  %v997_v23 = vpop.f32.mrb[54].mxu1  ;;  %v3709_v22 = vpop.f32.mrb[55].mxu0  ;;  %v3716_v50 = vadd.f32 %v3479_v14, %v3543_v51  ;;  %v3725_v38 = vadd.f32 %v3481_v15, %v3693_v6 }
 0x14e   :  { %4694 = vst [vmem:[#allocation68_spill] sm:$0xff] %v3691_v52  ;;  %4695 = vst [vmem:[#allocation69_spill] sm:$0xff] %v3693_v6  ;;  %v1371_v55 = vadd.f32 %v1370_v35, %v1369_v48  ;;  %v998_v8 = vadd.f32 %v997_v23, %v3300_v3  ;;  %v999_v10 = vpop.f32.mrb[55].mxu1  ;;  %v3729_v16 = vadd.f32 %v3483_v2, %v3693_v6  ;;  %v3794_v52 = vpop.permute.xlu0 %395 }
 0x14f   :  { %4696 = vst [vmem:[#allocation70_spill] sm:$0xff] %v3699_v59  ;;  %4697 = vst [vmem:[#allocation71_spill] sm:$0xff] %v3702_v9  ;;  %v1380_v43 = vadd.f32 %v1379_v57, %v1378_v34  ;;  %v1000_v61 = vadd.f32 %v999_v10, %v3300_v3  ;;  %v3733_v14 = vadd.f32 %v3485_v21, %v3582_v30  ;;  %v3737_v34 = vsub.s32 6, %v3641_v46 }
 0x150   :  { %4698 = vst [vmem:[#allocation72_spill] sm:$0xff] %v3706_v13  ;;  %4699 = vst [vmem:[#allocation73_spill] sm:$0xff] %v3712_v49  ;;  %v3720_v13 = vsub.s32 5, %v3641_v46  ;;  %v1372_v48 = vrot.slane %v1371_v55, 2  ;;  %v1564_v23 = vmul.f32 %v998_v8, %v3326_v47  ;;  %v1188_v35 = vpop.f32.mrb[56].mxu0  ;;  %v3741_v57 = vadd.f32 %v3487_v12, %v3582_v30 }
 0x151   :  { %4700 = vst [vmem:[#allocation74_spill] sm:$0xff] %v3716_v50  ;;  %4702 = vst [vmem:[#allocation76_spill] sm:$0xff] %v3725_v38  ;;  %v1381_v15 = vrot.slane %v1380_v43, 2  ;;  %v1573_v10 = vmul.f32 %v1000_v61, %v3326_v47  ;;  %v1003_v2 = vpop.f32.mrb[56].mxu1  ;;  %v1190_v38 = vpop.f32.mrb[57].mxu0 }
 0x152   :  { %4701 = vst [vmem:[#allocation75_spill] sm:$0xff] %v3720_v13  ;;  %4703 = vst [vmem:[#allocation77_spill] sm:$0xff] %v3729_v16  ;;  %v1189_v16 = vadd.f32 %v1188_v35, %v3285_v25  ;;  %v1373_v21 = vadd.f32 %v1372_v48, %v1371_v55  ;;  %v1004_v50 = vadd.f32 %v1003_v2, %v3323_v39  ;;  %v1005_v8 = vpop.f32.mrb[57].mxu1 }
 0x153   :  { %4704 = vst [vmem:[#allocation78_spill] sm:$0xff] %v3733_v14  ;;  %4705 = vst [vmem:[#allocation79_spill] sm:$0xff] %v3737_v34  ;;  %v1565_v14 = vadd.f32 %v1564_v23, %v1563_v19  ;;  %v1191_v7 = vadd.f32 %v1190_v38, %v3285_v25  ;;  %v1382_v0 = vadd.f32 %v1381_v15, %v1380_v43 }
 0x154   :  { %4706 = vst [vmem:[#allocation80_spill] sm:$0xff] %v3741_v57  ;;  %v1574_v34 = vadd.f32 %v1573_v10, %v1572_v28  ;;  %v1385_v27 = vmul.f32 %v1189_v16, %v3305_v11  ;;  %v1006_v12 = vadd.f32 %v1005_v8, %v3323_v39  ;;  %v1374_v57 = vrot.slane %v1373_v21, 1  ;;  %v1194_v13 = vpop.f32.mrb[58].mxu0 }
 0x155   :  { %v1566_v20 = vrot.slane %v1565_v14, 4  ;;  %v1753_v61 = vmul.f32 %v1004_v50, %v3332_v56  ;;  %v1394_v35 = vmul.f32 %v1191_v7, %v3305_v11  ;;  %v1383_v55 = vrot.slane %v1382_v0, 1  ;;  %v1009_v23 = vpop.f32.mrb[58].mxu1  ;;  %v1196_v38 = vpop.f32.mrb[59].mxu0 }
 0x156   :  { %v1575_v19 = vrot.slane %v1574_v34, 4  ;;  %v1762_v48 = vmul.f32 %v1006_v12, %v3332_v56  ;;  %v1195_v25 = vadd.f32 %v1194_v13, %v3290_v41  ;;  %v1375_v43 = vadd.f32 %v1374_v57, %v1373_v21  ;;  %v1011_v15 = vpop.f32.mrb[59].mxu1 }
 0x157   :  { %v1567_v28 = vadd.f32 %v1566_v20, %v1565_v14  ;;  %v1010_v16 = vadd.f32 %v1009_v23, %v3315_v24  ;;  %v1197_v10 = vadd.f32 %v1196_v38, %v3290_v41  ;;  %v1384_v2 = vadd.f32 %v1383_v55, %v1382_v0 }
 0x158   :  { %v1576_v50 = vadd.f32 %v1575_v19, %v1574_v34  ;;  %v1386_v11 = vmul.f32 %v1195_v25, %v3310_v18  ;;  %v1012_v7 = vadd.f32 %v1011_v15, %v3315_v24  ;;  %v1410_v8 = vsel %vm1409_vm4, %v3393_v17, %v1375_v43  ;;  %v1200_v20 = vpop.f32.mrb[60].mxu0 }
 0x159   :  { %v1568_v12 = vrot.slane %v1567_v28, 2  ;;  %v1754_v13 = vmul.f32 %v1010_v16, %v3330_v54  ;;  %v1395_v57 = vmul.f32 %v1197_v10, %v3310_v18  ;;  %v3762_v14 = vsel %vm1411_vm5, %v1410_v8, %v1384_v2  ;;  %v1015_v34 = vpop.f32.mrb[60].mxu1  ;;  %v1202_v55 = vpop.f32.mrb[61].mxu0 }
 0x15a   :  { %v1577_v21 = vrot.slane %v1576_v50, 2  ;;  %v1387_v41 = vadd.f32 %v1386_v11, %v1385_v27  ;;  %v1763_v0 = vmul.f32 %v1012_v7, %v3330_v54  ;;  %v1016_v17 = vadd.f32 %v1015_v34, %v3351_v37  ;;  %v1017_v38 = vpop.f32.mrb[61].mxu1 }
 0x15b   :  { %v1569_v19 = vadd.f32 %v1568_v12, %v1567_v28  ;;  %v1755_v23 = vadd.f32 %v1754_v13, %v1753_v61  ;;  %v1396_v25 = vadd.f32 %v1395_v57, %v1394_v35  ;;  %v1201_v18 = vadd.f32 %v1200_v20, %v3302_v5 }
 0x15c   :  { %v1578_v43 = vadd.f32 %v1577_v21, %v1576_v50  ;;  %v1388_v16 = vrot.slane %v1387_v41, 4  ;;  %v1764_v15 = vadd.f32 %v1763_v0, %v1762_v48  ;;  %v1943_v27 = vmul.f32 %v1016_v17, %v3353_v40  ;;  %v1206_v11 = vpop.f32.mrb[62].mxu0 }
 0x15d   :  { %v1570_v10 = vrot.slane %v1569_v19, 1  ;;  %v1756_v2 = vrot.slane %v1755_v23, 4  ;;  %v1397_v8 = vrot.slane %v1396_v25, 4  ;;  %v1581_v61 = vmul.f32 %v1201_v18, %v3318_v31  ;;  %v1021_v35 = vpop.f32.mrb[62].mxu1  ;;  %v1208_v12 = vpop.f32.mrb[63].mxu0 }
 0x15e   :  { %v1579_v7 = vrot.slane %v1578_v43, 1  ;;  %v1389_v49 = vadd.f32 %v1388_v16, %v1387_v41  ;;  %v1765_v28 = vrot.slane %v1764_v15, 4  ;;  %v1018_v57 = vadd.f32 %v1017_v38, %v3351_v37  ;;  %v1023_v20 = vpop.f32.mrb[63].mxu1 }
 0x15f   :  { %v1571_v50 = vadd.f32 %v1570_v10, %v1569_v19  ;;  %v1757_v13 = vadd.f32 %v1756_v2, %v1755_v23  ;;  %v1398_v48 = vadd.f32 %v1397_v8, %v1396_v25  ;;  %v1203_v17 = vadd.f32 %v1202_v55, %v3302_v5  ;;  %v4707_v55 = vld [vmem:[#allocation9_spill] sm:$0xff] }
 0x160   :  { %v1580_v21 = vadd.f32 %v1579_v7, %v1578_v43  ;;  %v1390_v0 = vrot.slane %v1389_v49, 2  ;;  %v1766_v34 = vadd.f32 %v1765_v28, %v1764_v15  ;;  %v1952_v18 = vmul.f32 %v1018_v57, %v3353_v40  ;;  %v1212_v59 = vpop.f32.mrb[64].mxu0  ;;  %4709 = vst [vmem:[#allocation9_spill] sm:$0xff] %v3794_v52 }
 0x161   :  { %v1602_v41 = vsel %vm1409_vm4, %v3436_v58, %v1571_v50  ;;  %v1758_v16 = vrot.slane %v1757_v13, 2  ;;  %v1399_v9 = vrot.slane %v1398_v48, 2  ;;  %v1590_v38 = vmul.f32 %v1203_v17, %v3318_v31  ;;  %v3778_v43 = vpop.f32.mrb[64].mxu1  ;;  %v1214_v15 = vpop.f32.mrb[65].mxu0  ;;  %v4708_v31 = vld [vmem:[#allocation8_spill] sm:$0xff] }
 0x162   :  { %v3775_v19 = vsel %vm1411_vm5, %v1602_v41, %v1580_v21  ;;  %v1391_v23 = vadd.f32 %v1390_v0, %v1389_v49  ;;  %v1767_v25 = vrot.slane %v1766_v34, 2  ;;  %v1022_v2 = vadd.f32 %v1021_v35, %v4707_v55  ;;  %v3782_v8 = vpop.f32.mrb[65].mxu1 }
 0x163   :  { %v1759_v10 = vadd.f32 %v1758_v16, %v1757_v13  ;;  %v1400_v5 = vadd.f32 %v1399_v9, %v1398_v48  ;;  %v1207_v58 = vadd.f32 %v1206_v11, %v3300_v3  ;;  %v1024_v50 = vadd.f32 %v1023_v20, %v4707_v55 }
 0x164   :  { %v1392_v7 = vrot.slane %v1391_v23, 1  ;;  %v1768_v28 = vadd.f32 %v1767_v25, %v1766_v34  ;;  %v1209_v49 = vadd.f32 %v1208_v12, %v3300_v3  ;;  %v1944_v0 = vmul.f32 %v1022_v2, %v4708_v31  ;;  %v1218_v13 = vpop.f32.mrb[66].mxu0 }
 0x165   :  { %v1760_v57 = vrot.slane %v1759_v10, 1  ;;  %v1401_v21 = vrot.slane %v1400_v5, 1  ;;  %v1582_v17 = vmul.f32 %v1207_v58, %v3326_v47  ;;  %v1953_v35 = vmul.f32 %v1024_v50, %v4708_v31  ;;  %v3790_v41 = vpop.f32.mrb[66].mxu1  ;;  %v1220_v34 = vpop.f32.mrb[67].mxu0  ;;  %v4710_v50 = vld [vmem:[#allocation10_spill] sm:$0xff] }
 0x166   :  { %v1393_v9 = vadd.f32 %v1392_v7, %v1391_v23  ;;  %v1769_v48 = vrot.slane %v1768_v28, 1  ;;  %v1591_v11 = vmul.f32 %v1209_v49, %v3326_v47  ;;  %v1945_v25 = vadd.f32 %v1944_v0, %v1943_v27  ;;  %v3792_v12 = vpop.f32.mrb[67].mxu1 }
 0x167   :  { %v1761_v16 = vadd.f32 %v1760_v57, %v1759_v10  ;;  %v1402_v20 = vadd.f32 %v1401_v21, %v1400_v5  ;;  %v1583_v3 = vadd.f32 %v1582_v17, %v1581_v61  ;;  %v1954_v58 = vadd.f32 %v1953_v35, %v1952_v18 }
 0x168   :  { %v1414_v2 = vsel %vm1413_vm6, %v3762_v14, %v1393_v9  ;;  %v1770_v23 = vadd.f32 %v1769_v48, %v1768_v28  ;;  %v1592_v7 = vadd.f32 %v1591_v11, %v1590_v38  ;;  %v1946_v10 = vrot.slane %v1945_v25, 4  ;;  %v1224_v27 = vpop.f32.mrb[68].mxu0  ;;  %v4711_v48 = vld [vmem:[#allocation12_spill] sm:$0xff] }
 0x169   :  { %v1792_v47 = vsel %vm1409_vm4, %v4710_v50, %v1761_v16  ;;  %v3801_v49 = vsel %vm1415_vm7, %v1414_v2, %v1402_v20  ;;  %v1584_v5 = vrot.slane %v1583_v3, 4  ;;  %v1955_v21 = vrot.slane %v1954_v58, 4  ;;  %v3807_v14 = vpop.f32.mrb[68].mxu1  ;;  %v3809_v18 = vpop.f32.mrb[69].mxu0  ;;  %v4713_v2 = vld [vmem:[#allocation13_spill] sm:$0xff] }
 0x16a   :  { %v3804_v61 = vsel %vm1411_vm5, %v1792_v47, %v1770_v23  ;;  %v1417_v57 = vrot.slane %v3801_v49, 4  ;;  %v1593_v0 = vrot.slane %v1592_v7, 4  ;;  %v1947_v38 = vadd.f32 %v1946_v10, %v1945_v25  ;;  %v3812_v9 = vpop.f32.mrb[69].mxu1 }
 0x16b   :  { %v1585_v28 = vadd.f32 %v1584_v5, %v1583_v3  ;;  %v1213_v17 = vadd.f32 %v1212_v59, %v3323_v39  ;;  %v3816_v35 = vadd.f32 %v4711_v48, %v3794_v52  ;;  %v1956_v16 = vadd.f32 %v1955_v21, %v1954_v58 }
 0x16c   :  { %v1418_v11 = vmax.f32 %v3801_v49, %v1417_v57  ;;  %v1594_v20 = vadd.f32 %v1593_v0, %v1592_v7  ;;  %v3821_v23 = vadd.f32 %v4713_v2, %v3794_v52  ;;  %v1948_v50 = vrot.slane %v1947_v38, 2  ;;  %v1230_v3 = vpop.f32.mrb[70].mxu0 }
 0x16d   :  { %4712 = vst [vmem:[#allocation8_spill] sm:$0xff] %v3816_v35  ;;  %v1586_v47 = vrot.slane %v1585_v28, 2  ;;  %v1771_v25 = vmul.f32 %v1213_v17, %v3332_v56  ;;  %v1215_v59 = vadd.f32 %v1214_v15, %v3323_v39  ;;  %v1957_v5 = vrot.slane %v1956_v16, 2  ;;  %v3825_v48 = vpop.f32.mrb[70].mxu1  ;;  %v1232_v35 = vpop.f32.mrb[71].mxu0  ;;  %v4716_v39 = vld [vmem:[#allocation14_spill] sm:$0xff] }
 0x16e   :  { %4714 = vst [vmem:[#allocation10_spill] sm:$0xff] %v3821_v23  ;;  %v1419_v10 = vrot.slane %v1418_v11, 2  ;;  %v1595_v63 = vrot.slane %v1594_v20, 2  ;;  %v3828_v58 = vsub.s32 7, %v3641_v46  ;;  %v1949_v7 = vadd.f32 %v1948_v50, %v1947_v38  ;;  %v3832_v2 = vpop.f32.mrb[71].mxu1 }
 0x16f   :  { %v1587_v57 = vadd.f32 %v1586_v47, %v1585_v28  ;;  %v1780_v21 = vmul.f32 %v1215_v59, %v3332_v56  ;;  %v1219_v0 = vadd.f32 %v1218_v13, %v3315_v24  ;;  %v3836_v15 = vadd.f32 %v4716_v39, %v3593_v45  ;;  %v4718_v56 = vld [vmem:[#allocation15_spill] sm:$0xff] }
 0x170   :  { %4715 = vst [vmem:[#allocation12_spill] sm:$0xff] %v3828_v58  ;;  %v1420_v17 = vmax.f32 %v1418_v11, %v1419_v10  ;;  %v1958_v23 = vadd.f32 %v1957_v5, %v1956_v16  ;;  %v1596_v30 = vadd.f32 %v1595_v63, %v1594_v20  ;;  %v1950_v51 = vrot.slane %v1949_v7, 1  ;;  %v3840_v28 = vpop.f32.mrb[72].mxu0 }
 0x171   :  { %4717 = vst [vmem:[#allocation13_spill] sm:$0xff] %v3836_v15  ;;  %v1588_v60 = vrot.slane %v1587_v57, 1  ;;  %v1772_v46 = vmul.f32 %v1219_v0, %v3330_v54  ;;  %v1221_v38 = vadd.f32 %v1220_v34, %v3315_v24  ;;  %v3844_v13 = vadd.f32 %v4718_v56, %v3593_v45  ;;  %v3846_v39 = vpop.f32.mrb[72].mxu1  ;;  %v3848_v11 = vpop.f32.mrb[73].mxu0  ;;  %v4721_v15 = vld [vmem:[#allocation11_spill] sm:$0xff] }
 0x172   :  { %v1421_v50 = vrot.slane %v1420_v17, 1  ;;  %v1959_v47 = vrot.slane %v1958_v23, 1  ;;  %v1597_v59 = vrot.slane %v1596_v30, 1  ;;  %v1951_v63 = vadd.f32 %v1950_v51, %v1949_v7  ;;  %v3851_v5 = vpop.f32.mrb[73].mxu1  ;;  %v3853_v24 = vpop.permute.xlu1 %400 }
 0x173   :  { %4719 = vst [vmem:[#allocation14_spill] sm:$0xff] %v3844_v13  ;;  %v1589_v16 = vadd.f32 %v1588_v60, %v1587_v57  ;;  %v1773_v20 = vadd.f32 %v1772_v46, %v1771_v25  ;;  %v1781_v10 = vmul.f32 %v1221_v38, %v3330_v54  ;;  %4720 = vst [vmem:[#allocation15_spill] sm:$0xff] %v3853_v24 }
 0x174   :  { %v1422_v34 = vmax.f32 %v1420_v17, %v1421_v50  ;;  %v1960_v0 = vadd.f32 %v1959_v47, %v1958_v23  ;;  %v1598_v56 = vadd.f32 %v1597_v59, %v1596_v30  ;;  %v1225_v13 = vadd.f32 %v1224_v27, %v3351_v37  ;;  %v3860_v25 = vpop.f32.mrb[74].mxu0  ;;  %v4726_v47 = vld [vmem:[#allocation18_spill] sm:$0xff] }
 0x175   :  { %v1982_v58 = vsel %vm1409_vm4, %v4721_v15, %v1951_v63  ;;  %v1604_v45 = vsel %vm1413_vm6, %v3775_v19, %v1589_v16  ;;  %v1774_v51 = vrot.slane %v1773_v20, 4  ;;  %v1782_v60 = vadd.f32 %v1781_v10, %v1780_v21  ;;  %v3870_v27 = vpop.f32.mrb[74].mxu1  ;;  %v3872_v57 = vpop.f32.mrb[75].mxu0 }
 0x176   :  { %v1423_v54 = vsub.f32 %v3801_v49, %v1422_v34  ;;  %v3864_v7 = vsel %vm1411_vm5, %v1982_v58, %v1960_v0  ;;  %v3867_v23 = vsel %vm1415_vm7, %v1604_v45, %v1598_v56  ;;  %v1961_v30 = vmul.f32 %v1225_v13, %v3353_v40  ;;  %v3875_v17 = vpop.f32.mrb[75].mxu1  ;;  %v4722_v49 = vld [vmem:[#allocation16_spill] sm:$0xff]  ;;  %v4724_v13 = vld [vmem:[#allocation17_spill] sm:$0xff]  ;;  %v3892_v63 = vpop.permute.xlu0 %405 }
 0x177   :  { %v1606_v19 = vrot.slane %v3867_v23, 4  ;;  %v1775_v15 = vadd.f32 %v1774_v51, %v1773_v20  ;;  %v1783_v21 = vrot.slane %v1782_v60, 4  ;;  %v3879_v46 = vadd.f32 %v4722_v49, %v3853_v24  ;;  %4728 = vst [vmem:[#allocation18_spill] sm:$0xff] %v3892_v63  ;;  %v4729_v51 = vld [vmem:[#allocation19_spill] sm:$0xff] }
 0x178   :  { %v1424_v58 = vmul.f32 1.442695, %v1423_v54  ;;  %v1227_v45 = vadd.f32 %v3809_v18, %v3351_v37  ;;  %v1231_v38 = vadd.f32 %v1230_v3, %v4707_v55  ;;  %v3886_v50 = vadd.f32 %v4724_v13, %v3853_v24  ;;  %v3895_v34 = vpop.f32.mrb[76].mxu0 }
 0x179   :  { %4723 = vst [vmem:[#allocation11_spill] sm:$0xff] %v3879_v46  ;;  %v3890_v59 = vadd.f32 %v4726_v47, %v3638_v29  ;;  %v1607_v16 = vmax.f32 %v3867_v23, %v1606_v19  ;;  %v1776_v20 = vrot.slane %v1775_v15, 2  ;;  %v1784_v10 = vadd.f32 %v1783_v21, %v1782_v60  ;;  %v3900_v0 = vpop.f32.mrb[76].mxu1  ;;  %v3902_v56 = vpop.f32.mrb[77].mxu0  ;;  %v4736_v47 = vld [vmem:[#allocation22_spill] sm:$0xff] }
 0x17a   :  { %4725 = vst [vmem:[#allocation16_spill] sm:$0xff] %v3886_v50  ;;  %2520 = vpow2.f32 %v1424_v58  ;;  %v1970_v37 = vmul.f32 %v1227_v45, %v3353_v40  ;;  %v1962_v18 = vmul.f32 %v1231_v38, %v4708_v31  ;;  %v1233_v3 = vadd.f32 %v1232_v35, %v4707_v55  ;;  %v3908_v19 = vpop.permute.xlu1 %410  ;;  %v3910_v58 = vpop.f32.mrb[77].mxu1  ;;  %v4732_v55 = vld [vmem:[#allocation20_spill] sm:$0xff]  ;;  %v4734_v38 = vld [vmem:[#allocation21_spill] sm:$0xff] }
 0x17b   :  { %4727 = vst [vmem:[#allocation17_spill] sm:$0xff] %v3890_v59  ;;  %v3906_v54 = vadd.f32 %v4729_v51, %v3638_v29  ;;  %4731 = vst [vmem:[#allocation81_spill] sm:$0xff] %v3908_v19  ;;  %v1608_v60 = vrot.slane %v1607_v16, 2  ;;  %v1777_v21 = vadd.f32 %v1776_v20, %v1775_v15  ;;  %v1785_v49 = vrot.slane %v1784_v10, 2 }
 0x17c   :  { %v1963_v40 = vadd.f32 %v1962_v18, %v1961_v30  ;;  %v1971_v45 = vmul.f32 %v1233_v3, %v4708_v31  ;;  %v3915_v35 = vadd.f32 %v4732_v55, %v3892_v63  ;;  %v3919_v13 = vadd.f32 %v4734_v38, %v3892_v63  ;;  %v3925_v46 = vpop.f32.mrb[78].mxu0  ;;  %v4738_v30 = vld [vmem:[#allocation23_spill] sm:$0xff]  ;;  %v4740_v38 = vld [vmem:[#allocation24_spill] sm:$0xff] }
 0x17d   :  { %4730 = vst [vmem:[#allocation19_spill] sm:$0xff] %v3906_v54  ;;  %v3923_v51 = vadd.f32 %v4736_v47, %v3693_v6  ;;  %v1609_v50 = vmax.f32 %v1607_v16, %v1608_v60  ;;  %v1778_v15 = vrot.slane %v1777_v21, 1  ;;  %v1786_v20 = vadd.f32 %v1785_v49, %v1784_v10  ;;  %v3931_v55 = vpop.f32.mrb[78].mxu1  ;;  %v4742_v49 = vld [vmem:[#allocation25_spill] sm:$0xff]  ;;  %v3953_v54 = vpop.permute.xlu0 %415 }
 0x17e   :  { %4733 = vst [vmem:[#allocation20_spill] sm:$0xff] %v3915_v35  ;;  %4735 = vst [vmem:[#allocation21_spill] sm:$0xff] %v3919_v13  ;;  %v3929_v31 = vadd.f32 %v4738_v30, %v3693_v6  ;;  %v1964_v18 = vrot.slane %v1963_v40, 4  ;;  %v1972_v3 = vadd.f32 %v1971_v45, %v1970_v37  ;;  %v3933_v35 = vpop.f32.mrb[79].mxu0  ;;  %v3937_v13 = vadd.f32 %v4740_v38, %v3908_v19  ;;  %v3939_v10 = vpop.f32.mrb[79].mxu1  ;;  %v4744_v30 = vld [vmem:[#allocation26_spill] sm:$0xff] }
 0x17f   :  { %4737 = vst [vmem:[#allocation22_spill] sm:$0xff] %v3923_v51  ;;  %v1610_v47 = vrot.slane %v1609_v50, 1  ;;  %v1779_v16 = vadd.f32 %v1778_v15, %v1777_v21  ;;  %v1787_v60 = vrot.slane %v1786_v20, 1  ;;  %v3943_v51 = vadd.f32 %v4742_v49, %v3908_v19  ;;  %v4746_v45 = vld [vmem:[#allocation27_spill] sm:$0xff]  ;;  %4748 = vst [vmem:[#allocation82_spill] sm:$0xff] %v3953_v54  ;;  %v3955_v21 = vpop.permute.xlu1 %420 }
 0x180   :  { %4739 = vst [vmem:[#allocation23_spill] sm:$0xff] %v3929_v31  ;;  %4741 = vst [vmem:[#allocation24_spill] sm:$0xff] %v3937_v13  ;;  %v3947_v37 = vadd.f32 %v4744_v30, %v3794_v52  ;;  %v3951_v31 = vadd.f32 %v4746_v45, %v3794_v52  ;;  %v1965_v38 = vadd.f32 %v1964_v18, %v1963_v40  ;;  %v1973_v13 = vrot.slane %v1972_v3, 4  ;;  %v4750_v30 = vld [vmem:[#allocation28_spill] sm:$0xff]  ;;  %v4752_v45 = vld [vmem:[#allocation30_spill] sm:$0xff] }
 0x181   :  { %4743 = vst [vmem:[#allocation25_spill] sm:$0xff] %v3943_v51  ;;  %4749 = vst [vmem:[#allocation83_spill] sm:$0xff] %v3955_v21  ;;  %v1611_v15 = vmax.f32 %v1609_v50, %v1610_v47  ;;  %v1794_v59 = vsel %vm1413_vm6, %v3804_v61, %v1779_v16  ;;  %v1788_v49 = vadd.f32 %v1787_v60, %v1786_v20  ;;  %v3959_v51 = vpop.f32.mrb[80].mxu0  ;;  %v3969_v18 = vpop.f32.mrb[80].mxu1  ;;  %v4754_v50 = vld [vmem:[#allocation29_spill] sm:$0xff]  ;;  %v4756_v20 = vld [vmem:[#allocation31_spill] sm:$0xff] }
 0x182   :  { %4745 = vst [vmem:[#allocation26_spill] sm:$0xff] %v3947_v37  ;;  %4747 = vst [vmem:[#allocation27_spill] sm:$0xff] %v3951_v31  ;;  %v3963_v37 = vadd.f32 %v4750_v30, %v3953_v54  ;;  %v3967_v31 = vadd.f32 %v4752_v45, %v3853_v24  ;;  %v1966_v52 = vrot.slane %v1965_v38, 2  ;;  %v1974_v40 = vadd.f32 %v1973_v13, %v1972_v3  ;;  %v3971_v6 = vpop.f32.mrb[81].mxu0  ;;  %v3985_v30 = vpop.f32.mrb[81].mxu1  ;;  %v4758_v13 = vld [vmem:[#allocation32_spill] sm:$0xff] }
 0x183   :  { %v3975_v61 = vadd.f32 %v4754_v50, %v3953_v54  ;;  %v3979_v47 = vadd.f32 %v4756_v20, %v3853_v24  ;;  %v1612_v16 = vsub.f32 %v3867_v23, %v1611_v15  ;;  %v3983_v60 = vsel %vm1415_vm7, %v1794_v59, %v1788_v49  ;;  %v4760_v20 = vld [vmem:[#allocation33_spill] sm:$0xff]  ;;  %v4762_v23 = vld [vmem:[#allocation36_spill] sm:$0xff] }
 0x184   :  { %4751 = vst [vmem:[#allocation28_spill] sm:$0xff] %v3963_v37  ;;  %4753 = vst [vmem:[#allocation30_spill] sm:$0xff] %v3967_v31  ;;  %v3989_v3 = vadd.f32 %v4758_v13, %v3955_v21  ;;  %v3991_v45 = vpop.eup %2520  ;;  %v1796_v50 = vrot.slane %v3983_v60, 4  ;;  %v1975_v37 = vrot.slane %v1974_v40, 2  ;;  %v4000_v59 = vadd.f32 %v4762_v23, %v3892_v63 }
 0x185   :  { %4755 = vst [vmem:[#allocation29_spill] sm:$0xff] %v3975_v61  ;;  %4757 = vst [vmem:[#allocation31_spill] sm:$0xff] %v3979_v47  ;;  %v1967_v61 = vadd.f32 %v1966_v52, %v1965_v38  ;;  %v3996_v47 = vadd.f32 %v4760_v20, %v3955_v21  ;;  %v4004_v15 = vadd.f32 %v3563_v26, %v3892_v63  ;;  %v1426_v49 = vrot.slane %v3991_v45, 4  ;;  %v4014_v31 = vpop.f32.mrb[82].mxu1  ;;  %v2097_v26 = vld [vmem:[%s4596_s6] sm:$0xff] }
 0x186   :  { %4759 = vst [vmem:[#allocation32_spill] sm:$0xff] %v3989_v3  ;;  %4763 = vst [vmem:[#allocation36_spill] sm:$0xff] %v4000_v59  ;;  %v1613_v13 = vmul.f32 1.442695, %v1612_v16  ;;  %v4007_v3 = vpop.f32.mrb[82].mxu0  ;;  %v4011_v52 = vadd.f32 %v3596_v53, %v3908_v19  ;;  %v1797_v38 = vmax.f32 %v3983_v60, %v1796_v50  ;;  %v4023_v16 = vadd.f32 %v3607_v42, %v3908_v19 }
 0x187   :  { %4761 = vst [vmem:[#allocation33_spill] sm:$0xff] %v3996_v47  ;;  %4764 = vst [vmem:[#allocation84_spill] sm:$0xff] %v4004_v15  ;;  %v1968_v20 = vrot.slane %v1967_v61, 1  ;;  %v1976_v47 = vadd.f32 %v1975_v37, %v1974_v40  ;;  %v4016_v23 = vpop.f32.mrb[83].mxu0  ;;  %v4027_v53 = vadd.f32 %v3648_v4, %v3953_v54  ;;  %v1427_v50 = vadd.f32 %v3991_v45, %v1426_v49  ;;  %v4030_v37 = vpop.f32.mrb[83].mxu1 }
 0x188   :  { %4765 = vst [vmem:[#allocation85_spill] sm:$0xff] %v4011_v52  ;;  %4766 = vst [vmem:[#allocation86_spill] sm:$0xff] %v4023_v16  ;;  %2522 = vpow2.f32 %v1613_v13  ;;  %2434 = vmatprep.mubr.f32.mxu1 %v2097_v26  ;;  %v4034_v40 = vadd.f32 %v3671_v62, %v3953_v54  ;;  %v1798_v52 = vrot.slane %v1797_v38, 2  ;;  %v4038_v42 = vadd.f32 %v3696_v36, %v3955_v21  ;;  %v4048_v26 = vpop.f32.mrb[84].mxu0  ;;  %v4772_v16 = vld [vmem:[#allocation35_spill] sm:$0xff] }
 0x189   :  { %4767 = vst [vmem:[#allocation87_spill] sm:$0xff] %v4027_v53  ;;  %v1969_v15 = vadd.f32 %v1968_v20, %v1967_v61  ;;  %v1977_v59 = vrot.slane %v1976_v47, 1  ;;  %v4042_v4 = vadd.f32 %v3709_v22, %v3955_v21  ;;  %v1428_v49 = vrot.slane %v1427_v50, 2  ;;  %v4058_v22 = vpop.f32.mrb[85].mxu0 }
 0x18a   :  { %4768 = vst [vmem:[#allocation88_spill] sm:$0xff] %v4034_v40  ;;  %4769 = vst [vmem:[#allocation89_spill] sm:$0xff] %v4038_v42  ;;  %v4046_v13 = vadd.f32 %v3778_v43, %v3517_v33  ;;  %v4052_v62 = vadd.f32 %v3782_v8, %v3517_v33  ;;  %v1799_v61 = vmax.f32 %v1797_v38, %v1798_v52  ;;  %v4056_v42 = vpop.f32.mrb[84].mxu1  ;;  %v4771_v38 = vld [vmem:[#allocation34_spill] sm:$0xff] }
 0x18b   :  { %4770 = vst [vmem:[#allocation90_spill] sm:$0xff] %v4042_v4  ;;  %v1984_v36 = vsel %vm1413_vm6, %v3864_v7, %v1969_v15  ;;  %v1978_v20 = vadd.f32 %v1977_v59, %v1976_v47  ;;  %v1429_v4 = vadd.f32 %v1428_v49, %v1427_v50  ;;  %v4062_v43 = vadd.f32 %v3790_v41, %v3519_v44  ;;  %v4072_v52 = vpop.f32.mrb[85].mxu1 }
 0x18c   :  { %v4066_v21 = vadd.f32 %v3792_v12, %v3519_v44  ;;  %v4070_v8 = vadd.f32 %v3807_v14, %v3529_v32  ;;  %v1800_v7 = vrot.slane %v1799_v61, 1  ;;  %v4076_v47 = vadd.f32 %v3812_v9, %v3529_v32  ;;  %v1278_v9 = vpop.f32.mrb[86].mxu0 }
 0x18d   :  { %v4080_v59 = vadd.f32 %v3825_v48, %v3531_v1  ;;  %v4083_v41 = vsel %vm1415_vm7, %v1984_v36, %v1978_v20  ;;  %v1430_v12 = vrot.slane %v1429_v4, 1  ;;  %v4087_v15 = vadd.f32 %v3832_v2, %v3531_v1  ;;  %v1093_v20 = vpop.f32.mrb[86].mxu1  ;;  %v1280_v40 = vpop.f32.mrb[87].mxu0 }
 0x18e   :  { %v1986_v14 = vrot.slane %v4083_v41, 4  ;;  %v4092_v50 = vadd.f32 %v3846_v39, %v4771_v38  ;;  %v1801_v49 = vmax.f32 %v1799_v61, %v1800_v7  ;;  %v4096_v48 = vadd.f32 %v3840_v28, %v3517_v33  ;;  %v1095_v7 = vpop.f32.mrb[87].mxu1 }
 0x18f   :  { %v4100_v36 = vadd.f32 %v3851_v5, %v4771_v38  ;;  %v4104_v2 = vadd.f32 %v3848_v11, %v3517_v33  ;;  %v1431_v53 = vadd.f32 %v1430_v12, %v1429_v4  ;;  %v4109_v61 = vadd.f32 %v3870_v27, %v4772_v16  ;;  %v4774_v4 = vld [vmem:[#allocation45_spill] sm:$0xff] }
 0x190   :  { %v1987_v39 = vmax.f32 %v4083_v41, %v1986_v14  ;;  %v4113_v28 = vadd.f32 %v3860_v25, %v3519_v44  ;;  %v1802_v5 = vsub.f32 %v3983_v60, %v1801_v49  ;;  %v4118_v33 = vadd.f32 %v3875_v17, %v4772_v16  ;;  %v1284_v60 = vpop.f32.mrb[88].mxu0  ;;  %v4777_v49 = vld [vmem:[#allocation48_spill] sm:$0xff] }
 0x191   :  { %v4122_v11 = vadd.f32 %v3872_v57, %v3519_v44  ;;  %v4126_v12 = vadd.f32 %v3900_v0, %v4774_v4  ;;  %2524 = vrcp.f32 %v1431_v53  ;;  %v4132_v14 = vadd.f32 %v3895_v34, %v3529_v32 }
 0x192   :  { %v4128_v27 = vpop.eup %2522  ;;  %v1988_v25 = vrot.slane %v1987_v39, 2  ;;  %v4136_v17 = vadd.f32 %v3910_v58, %v4774_v4  ;;  %v1803_v57 = vmul.f32 1.442695, %v1802_v5  ;;  %v4141_v0 = vadd.f32 %v3902_v56, %v3529_v32 }
 0x193   :  { %4773 = vst [vmem:[#allocation34_spill] sm:$0xff] %v4122_v11  ;;  %4775 = vst [vmem:[#allocation35_spill] sm:$0xff] %v4126_v12  ;;  %v1615_v44 = vrot.slane %v4128_v27, 4  ;;  %v4145_v53 = vadd.f32 %v3931_v55, %v4777_v49  ;;  %v1099_v12 = vpop.f32.mrb[88].mxu1  ;;  %v1286_v11 = vpop.f32.mrb[89].mxu0  ;;  %v4153_v58 = vadd.f32 %v3939_v10, %v4777_v49  ;;  %v4157_v5 = vadd.f32 %v3933_v35, %v3531_v1  ;;  %v4782_v35 = vld [vmem:[#allocation69_spill] sm:$0xff] }
 0x194   :  { %4776 = vst [vmem:[#allocation45_spill] sm:$0xff] %v4132_v14  ;;  %v1989_v34 = vmax.f32 %v1987_v39, %v1988_v25  ;;  %v4149_v14 = vadd.f32 %v3925_v46, %v3531_v1  ;;  %v1101_v32 = vpop.f32.mrb[89].mxu1  ;;  %2526 = vpow2.f32 %v1803_v57  ;;  %v4162_v55 = vadd.f32 %v3969_v18, %v3638_v29 }
 0x195   :  { %v1616_v56 = vadd.f32 %v4128_v27, %v1615_v44  ;;  %v4166_v46 = vadd.f32 %v3959_v51, %v4771_v38  ;;  %v4170_v10 = vadd.f32 %v3985_v30, %v3638_v29  ;;  %v4174_v1 = vadd.f32 %v3971_v6, %v4771_v38  ;;  %v1290_v44 = vpop.f32.mrb[90].mxu0  ;;  %v1105_v6 = vpop.f32.mrb[90].mxu1 }
 0x196   :  { %4778 = vst [vmem:[#allocation48_spill] sm:$0xff] %v4162_v55  ;;  %v1990_v39 = vrot.slane %v1989_v34, 1  ;;  %v4178_v25 = vadd.f32 %v4014_v31, %v4782_v35  ;;  %v4182_v57 = vadd.f32 %v4007_v3, %v4772_v16  ;;  %v4186_v51 = vadd.f32 %v4030_v37, %v4782_v35  ;;  %v1292_v38 = vpop.f32.mrb[91].mxu0  ;;  %v1107_v37 = vpop.f32.mrb[91].mxu1 }
 0x197   :  { %4779 = vst [vmem:[#allocation91_spill] sm:$0xff] %v4166_v46  ;;  %4780 = vst [vmem:[#allocation92_spill] sm:$0xff] %v4170_v10  ;;  %v1617_v18 = vrot.slane %v1616_v56, 2  ;;  %v4190_v30 = vadd.f32 %v4016_v23, %v4772_v16  ;;  %v4787_v10 = vld [vmem:[#allocation9_spill] sm:$0xff]  ;;  %v4202_v3 = vadd.f32 %v4058_v22, %v4774_v4  ;;  %v4209_v16 = vadd.f32 %v1093_v20, %v3853_v24 }
 0x198   :  { %4781 = vst [vmem:[#allocation93_spill] sm:$0xff] %v4174_v1  ;;  %4783 = vst [vmem:[#allocation69_spill] sm:$0xff] %v4178_v25  ;;  %v1991_v1 = vmax.f32 %v1989_v34, %v1990_v39  ;;  %v4194_v31 = vadd.f32 %v4056_v42, %v4787_v10  ;;  %v4198_v25 = vadd.f32 %v4048_v26, %v4774_v4 }
 0x199   :  { %4784 = vst [vmem:[#allocation94_spill] sm:$0xff] %v4182_v57  ;;  %4785 = vst [vmem:[#allocation95_spill] sm:$0xff] %v4186_v51  ;;  %v1618_v51 = vadd.f32 %v1617_v18, %v1616_v56  ;;  %v4206_v23 = vadd.f32 %v4072_v52, %v4787_v10  ;;  %v4212_v42 = vadd.f32 %v1278_v9, %v4777_v49  ;;  %v1296_v56 = vpop.f32.mrb[92].mxu0  ;;  %v4836_v57 = vld [vmem:[#allocation57_spill] sm:$0xff] }
 0x19a   :  { %4786 = vst [vmem:[#allocation96_spill] sm:$0xff] %v4190_v30  ;;  %4788 = vst [vmem:[#allocation9_spill] sm:$0xff] %v4194_v31  ;;  %v1992_v34 = vsub.f32 %v4083_v41, %v1991_v1  ;;  %v4216_v26 = vadd.f32 %v1095_v7, %v3853_v24  ;;  %v4219_v22 = vadd.f32 %v1280_v40, %v4777_v49  ;;  %v1111_v41 = vpop.f32.mrb[92].mxu1  ;;  %v1298_v7 = vpop.f32.mrb[93].mxu0 }
 0x19b   :  { %4789 = vst [vmem:[#allocation97_spill] sm:$0xff] %v4198_v25  ;;  %4790 = vst [vmem:[#allocation98_spill] sm:$0xff] %v4202_v3  ;;  %v4222_v4 = vadd.f32 %v1284_v60, %v3638_v29  ;;  %v1619_v52 = vrot.slane %v1618_v51, 1  ;;  %v4225_v39 = vadd.f32 %v1099_v12, %v3892_v63  ;;  %v4228_v20 = vadd.f32 %v1101_v32, %v3892_v63  ;;  %v2525_v1 = vpop.eup %2524  ;;  %v1113_v12 = vpop.f32.mrb[93].mxu1  ;;  %v4828_v3 = vld [vmem:[#allocation49_spill] sm:$0xff] }
 0x19c   :  { %4791 = vst [vmem:[#allocation99_spill] sm:$0xff] %v4206_v23  ;;  %4792 = vst [vmem:[#allocation100_spill] sm:$0xff] %v4209_v16  ;;  %v4231_v9 = vadd.f32 %v1286_v11, %v3638_v29  ;;  %v1993_v18 = vmul.f32 1.442695, %v1992_v34  ;;  %v4234_v40 = vadd.f32 %v1105_v6, %v3908_v19  ;;  %v4237_v60 = vadd.f32 %v1290_v44, %v4782_v35  ;;  %v4810_v34 = vld [vmem:[#allocation68_spill] sm:$0xff] }
 0x19d   :  { %4793 = vst [vmem:[#allocation101_spill] sm:$0xff] %v4212_v42  ;;  %4794 = vst [vmem:[#allocation102_spill] sm:$0xff] %v4216_v26  ;;  %v4240_v49 = vadd.f32 %v1292_v38, %v4782_v35  ;;  %v4243_v32 = vmul.f32 %v2525_v1, %v3991_v45  ;;  %v1620_v63 = vadd.f32 %v1619_v52, %v1618_v51  ;;  %v4260_v38 = vpop.f32.mrb[94].mxu0  ;;  %v4809_v51 = vld [vmem:[#allocation67_spill] sm:$0xff]  ;;  %v4811_v52 = vld [vmem:[#allocation70_spill] sm:$0xff]  ;;  %v4271_v1 = vpop.f32.mrb[94].mxu1 }
 0x19e   :  { %4795 = vst [vmem:[#allocation103_spill] sm:$0xff] %v4219_v22  ;;  %4796 = vst [vmem:[#allocation104_spill] sm:$0xff] %v4222_v4  ;;  %v4246_v29 = vadd.f32 %v1107_v37, %v3908_v19  ;;  %v4249_v11 = vadd.f32 %v1296_v56, %v4787_v10  ;;  %2528 = vpow2.f32 %v1993_v18  ;;  %v4252_v6 = vadd.f32 %v1111_v41, %v3953_v54  ;;  %v4262_v45 = vpop.eup %2526  ;;  %v4282_v24 = vpop.f32.mrb[95].mxu1  ;;  %v4823_v4 = vld [vmem:[#allocation46_spill] sm:$0xff] }
 0x19f   :  { %4797 = vst [vmem:[#allocation105_spill] sm:$0xff] %v4225_v39  ;;  %4798 = vst [vmem:[#allocation106_spill] sm:$0xff] %v4228_v20  ;;  %v4255_v44 = vadd.f32 %v1113_v12, %v3953_v54  ;;  %v4258_v35 = vadd.f32 %v1298_v7, %v4787_v10  ;;  %2530 = vrcp.f32 %v1620_v63  ;;  %v1438_v37 = vrot.slane %v4243_v32, %v4809_v51  ;;  %v4273_v10 = vpop.f32.mrb[95].mxu0  ;;  %v4814_v7 = vld [vmem:[#allocation71_spill] sm:$0xff]  ;;  %v4815_v12 = vld [vmem:[#allocation73_spill] sm:$0xff] }
 0x1a0   :  { %4799 = vst [vmem:[#allocation107_spill] sm:$0xff] %v4231_v9  ;;  %4800 = vst [vmem:[#allocation108_spill] sm:$0xff] %v4234_v40  ;;  %v1446_v56 = vrot.slane %v4243_v32, %v4810_v34  ;;  %v1458_v41 = vrot.slane %v4243_v32, %v4811_v52  ;;  %v1470_v18 = vrot.slane %v4243_v32, %v4814_v7  ;;  %v4816_v63 = vld [vmem:[#allocation75_spill] sm:$0xff]  ;;  %v4292_v22 = vpop.f32.mrb[96].mxu0 }
 0x1a1   :  { %4801 = vst [vmem:[#allocation109_spill] sm:$0xff] %v4237_v60  ;;  %4802 = vst [vmem:[#allocation110_spill] sm:$0xff] %v4240_v49  ;;  %v1482_v54 = vrot.slane %v4243_v32, %v4815_v12  ;;  %v1494_v19 = vrot.slane %v4243_v32, %v4816_v63  ;;  %v4822_v60 = vld [vmem:[#allocation38_spill] sm:$0xff] }
 0x1a2   :  { %4803 = vst [vmem:[#allocation111_spill] sm:$0xff] %v4246_v29  ;;  %4804 = vst [vmem:[#allocation112_spill] sm:$0xff] %v4249_v11  ;;  %v4819_v11 = vld [vmem:[#allocation42_spill] sm:$0xff]  ;;  %v1471_v40 = vmul.f32 %v1470_v18, %v4822_v60  ;;  %v1448_v39 = vmul.f32 %v1446_v56, %v4823_v4 }
 0x1a3   :  { %4805 = vst [vmem:[#allocation113_spill] sm:$0xff] %v4252_v6  ;;  %4806 = vst [vmem:[#allocation114_spill] sm:$0xff] %v4255_v44  ;;  %v1447_v6 = vmul.f32 %v1446_v56, %v4819_v11  ;;  %v1483_v9 = vmul.f32 %v1482_v54, %v4046_v13  ;;  %v1495_v20 = vmul.f32 %v1494_v19, %v4052_v62  ;;  %v4829_v4 = vld [vmem:[#allocation50_spill] sm:$0xff] }
 0x1a4   :  { %4807 = vst [vmem:[#allocation115_spill] sm:$0xff] %v4258_v35  ;;  %4808 = vst [vmem:[#allocation116_spill] sm:$0xff] %v4260_v38  ;;  %v1805_v38 = vrot.slane %v4262_v45, 4  ;;  %v4818_v35 = vld [vmem:[#allocation41_spill] sm:$0xff]  ;;  %v1484_v11 = vmul.f32 %v1482_v54, %v4062_v43  ;;  %v1496_v60 = vmul.f32 %v1494_v19, %v4066_v21  ;;  %v1441_v62 = vmul.f32 %v1438_v37, %v4828_v3  ;;  %v4834_v3 = vld [vmem:[#allocation52_spill] sm:$0xff] }
 0x1a5   :  { %1434 = vst [vmem:[#allocation4] sm:$0xff] %v4243_v32  ;;  %4812 = vst [vmem:[#allocation67_spill] sm:$0xff] %v4271_v1  ;;  %v1439_v44 = vmul.f32 %v1438_v37, %v4818_v35  ;;  %v4820_v1 = vld [vmem:[#allocation37_spill] sm:$0xff]  ;;  %v4826_v35 = vld [vmem:[#allocation40_spill] sm:$0xff]  ;;  %v1449_v25 = vmul.f32 %v1446_v56, %v4829_v4  ;;  %v1485_v43 = vmul.f32 %v1482_v54, %v4070_v8 }
 0x1a6   :  { %4813 = vst [vmem:[#allocation68_spill] sm:$0xff] %v4273_v10  ;;  %4817 = vst [vmem:[#allocation70_spill] sm:$0xff] %v4282_v24  ;;  %v1459_v49 = vmul.f32 %v1458_v41, %v4820_v1  ;;  %v4821_v10 = vld [vmem:[#allocation43_spill] sm:$0xff]  ;;  %v1472_v16 = vmul.f32 %v1470_v18, %v4826_v35  ;;  %v4297_v1 = vpop.f32.mrb[97].mxu0  ;;  %v1806_v13 = vadd.f32 %v4262_v45, %v1805_v38 }
 0x1a7   :  { %v1440_v29 = vmul.f32 %v1438_v37, %v4821_v10  ;;  %4824 = vst [vmem:[#allocation71_spill] sm:$0xff] %v4292_v22  ;;  %v1451_v26 = vadd.f32 %v1447_v6, %v1439_v44  ;;  %v4825_v24 = vld [vmem:[#allocation39_spill] sm:$0xff]  ;;  %4827 = vst [vmem:[#allocation73_spill] sm:$0xff] %v4297_v1  ;;  %v4830_v22 = vld [vmem:[#allocation44_spill] sm:$0xff]  ;;  %v1497_v1 = vmul.f32 %v1494_v19, %v4076_v47 }
 0x1a8   :  { %v1460_v42 = vmul.f32 %v1458_v41, %v4825_v24  ;;  %v1461_v6 = vmul.f32 %v1458_v41, %v4830_v22  ;;  %v4831_v44 = vld [vmem:[#allocation47_spill] sm:$0xff]  ;;  %v1807_v35 = vrot.slane %v1806_v13, 2  ;;  %v4313_v4 = vpop.eup %2528  ;;  %v1474_v8 = vmul.f32 %v1470_v18, %v4836_v57 }
 0x1a9   :  { %v1452_v10 = vadd.f32 %v1448_v39, %v1440_v29  ;;  %v1463_v23 = vadd.f32 %v1459_v49, %v1451_v26  ;;  %v1473_v24 = vmul.f32 %v1470_v18, %v4831_v44  ;;  %v4307_v39 = vpop.f32.mrb[98].mxu0  ;;  %v1453_v29 = vadd.f32 %v1449_v25, %v1441_v62  ;;  %v4833_v38 = vld [vmem:[#allocation51_spill] sm:$0xff]  ;;  %v2531_v46 = vpop.eup %2530 }
 0x1aa   :  { %4832 = vst [vmem:[#allocation75_spill] sm:$0xff] %v4307_v39  ;;  %v1442_v30 = vmul.f32 %v1438_v37, %v4833_v38  ;;  %v1450_v26 = vmul.f32 %v1446_v56, %v4834_v3  ;;  %v4311_v49 = vpop.f32.mrb[99].mxu0  ;;  %v1808_v44 = vadd.f32 %v1807_v35, %v1806_v13  ;;  %v1486_v25 = vmul.f32 %v1482_v54, %v4080_v59  ;;  %v4840_v3 = vld [vmem:[#allocation63_spill] sm:$0xff] }
 0x1ab   :  { %v1464_v31 = vadd.f32 %v1460_v42, %v1452_v10  ;;  %v1475_v21 = vadd.f32 %v1471_v40, %v1463_v23  ;;  %v4835_v42 = vld [vmem:[#allocation54_spill] sm:$0xff]  ;;  %v1465_v55 = vadd.f32 %v1461_v6, %v1453_v29  ;;  %v4319_v23 = vmul.f32 %v2531_v46, %v4128_v27  ;;  %v4322_v62 = vpop.f32.mrb[100].mxu0 }
 0x1ac   :  { %v1462_v10 = vmul.f32 %v1458_v41, %v4835_v42  ;;  %v1454_v39 = vadd.f32 %v1450_v26, %v1442_v30  ;;  %v1809_v37 = vrot.slane %v1808_v44, 1  ;;  %v1498_v56 = vmul.f32 %v1494_v19, %v4087_v15  ;;  %v4325_v18 = vpop.f32.mrb[101].mxu0 }
 0x1ad   :  { %v1476_v22 = vadd.f32 %v1472_v16, %v1464_v31  ;;  %v1487_v47 = vadd.f32 %v1483_v9, %v1475_v21  ;;  %v1477_v16 = vadd.f32 %v1473_v24, %v1465_v55  ;;  %v1995_v57 = vrot.slane %v4313_v4, 4  ;;  %1624 = vst [vmem:[#allocation4 + $0x8] sm:$0xff] %v4319_v23  ;;  %v4345_v6 = vpop.f32.mrb[102].mxu0 }
 0x1ae   :  { %v1466_v41 = vadd.f32 %v1462_v10, %v1454_v39  ;;  %v1810_v54 = vadd.f32 %v1809_v37, %v1808_v44  ;;  %v4330_v59 = vrot.slane %v4319_v23, %v4809_v51  ;;  %v4334_v19 = vrot.slane %v4319_v23, %v4810_v34  ;;  %v4839_v39 = vld [vmem:[#allocation62_spill] sm:$0xff]  ;;  %v4348_v29 = vpop.f32.mrb[103].mxu0  ;;  %v4841_v44 = vld [vmem:[#allocation79_spill] sm:$0xff] }
 0x1af   :  { %v1488_v40 = vadd.f32 %v1484_v11, %v1476_v22  ;;  %v1499_v31 = vadd.f32 %v1495_v20, %v1487_v47  ;;  %v1489_v15 = vadd.f32 %v1485_v43, %v1477_v16  ;;  %v1996_v55 = vadd.f32 %v4313_v4, %v1995_v57  ;;  %v4837_v20 = vld [vmem:[#allocation53_spill] sm:$0xff]  ;;  %v4838_v11 = vld [vmem:[#allocation55_spill] sm:$0xff]  ;;  %v4842_v47 = vld [vmem:[#allocation12_spill] sm:$0xff] }
 0x1b0   :  { %v1478_v27 = vadd.f32 %v1474_v8, %v1466_v41  ;;  %v1648_v46 = vrot.slane %v4319_v23, %v4811_v52  ;;  %2532 = vrcp.f32 %v1810_v54  ;;  %v1629_v9 = vmul.f32 %v4330_v59, %v4837_v20  ;;  %v4843_v41 = vld [vmem:[#allocation56_spill] sm:$0xff] }
 0x1b1   :  { %v1500_v30 = vadd.f32 %v1496_v60, %v1488_v40  ;;  %v1637_v60 = vmul.f32 %v4334_v19, %v4838_v11  ;;  %v1660_v13 = vrot.slane %v4319_v23, %v4814_v7  ;;  %v1501_v24 = vadd.f32 %v1497_v1, %v1489_v15  ;;  %v4845_v11 = vld [vmem:[#allocation72_spill] sm:$0xff] }
 0x1b2   :  { %v1490_v35 = vadd.f32 %v1486_v25, %v1478_v27  ;;  %v1997_v43 = vrot.slane %v1996_v55, 2  ;;  %v1649_v21 = vmul.f32 %v1648_v46, %v4839_v39  ;;  %v1672_v22 = vrot.slane %v4319_v23, %v4815_v12  ;;  %v4844_v27 = vld [vmem:[#allocation58_spill] sm:$0xff] }
 0x1b3   :  { %v1641_v38 = vadd.f32 %v1637_v60, %v1629_v9  ;;  %v1661_v26 = vmul.f32 %v1660_v13, %v4840_v3  ;;  %v1506_v42 = vrot.slane %v4243_v32, %v4841_v44  ;;  %v1684_v1 = vrot.slane %v4319_v23, %v4816_v63  ;;  %v4846_v60 = vld [vmem:[#allocation74_spill] sm:$0xff] }
 0x1b4   :  { %v1502_v10 = vadd.f32 %v1498_v56, %v1490_v35  ;;  %v1998_v8 = vadd.f32 %v1997_v43, %v1996_v55  ;;  %v1518_v25 = vrot.slane %v4243_v32, %v4842_v47  ;;  %v1673_v37 = vmul.f32 %v1672_v22, %v4092_v50 }
 0x1b5   :  { %v1653_v40 = vadd.f32 %v1649_v21, %v1641_v38  ;;  %v1507_v16 = vmul.f32 %v1506_v42, %v4096_v48  ;;  %v1630_v57 = vmul.f32 %v4330_v59, %v4843_v41  ;;  %v1685_v15 = vmul.f32 %v1684_v1, %v4100_v36 }
 0x1b6   :  { %v1999_v54 = vrot.slane %v1998_v8, 1  ;;  %v1519_v56 = vmul.f32 %v1518_v25, %v4104_v2  ;;  %v1638_v55 = vmul.f32 %v4334_v19, %v4844_v27  ;;  %v1650_v32 = vmul.f32 %v1648_v46, %v4845_v11  ;;  %v4847_v2 = vld [vmem:[#allocation34_spill] sm:$0xff]  ;;  %v4853_v11 = vld [vmem:[#allocation45_spill] sm:$0xff] }
 0x1b7   :  { %v1665_v20 = vadd.f32 %v1661_v26, %v1653_v40  ;;  %v1511_v9 = vadd.f32 %v1507_v16, %v1499_v31  ;;  %v1662_v35 = vmul.f32 %v1660_v13, %v4846_v60  ;;  %v1674_v48 = vmul.f32 %v1672_v22, %v4109_v61  ;;  %v4848_v40 = vld [vmem:[#allocation59_spill] sm:$0xff] }
 0x1b8   :  { %v2000_v50 = vadd.f32 %v1999_v54, %v1998_v8  ;;  %v1642_v43 = vadd.f32 %v1638_v55, %v1630_v57  ;;  %v1508_v39 = vmul.f32 %v1506_v42, %v4113_v28  ;;  %v1686_v36 = vmul.f32 %v1684_v1, %v4118_v33  ;;  %v4849_v57 = vld [vmem:[#allocation60_spill] sm:$0xff]  ;;  %v4850_v28 = vld [vmem:[#allocation78_spill] sm:$0xff] }
 0x1b9   :  { %v1677_v21 = vadd.f32 %v1673_v37, %v1665_v20  ;;  %v4371_v38 = vadd.f32 %v1519_v56, %v1511_v9  ;;  %v1520_v3 = vmul.f32 %v1518_v25, %v4847_v2  ;;  %v1631_v16 = vmul.f32 %v4330_v59, %v4848_v40  ;;  %v4851_v54 = vld [vmem:[#allocation80_spill] sm:$0xff] }
 0x1ba   :  { %2534 = vrcp.f32 %v2000_v50  ;;  %v1654_v26 = vadd.f32 %v1650_v32, %v1642_v43  ;;  %v1512_v31 = vadd.f32 %v1508_v39, %v1500_v30  ;;  %v2533_v41 = vpop.eup %2532  ;;  %v1639_v61 = vmul.f32 %v4334_v19, %v4849_v57  ;;  %v4852_v30 = vld [vmem:[#allocation35_spill] sm:$0xff]  ;;  %v4854_v43 = vld [vmem:[#allocation61_spill] sm:$0xff] }
 0x1bb   :  { %v4377_v8 = vadd.f32 %v1685_v15, %v1677_v21  ;;  %v1651_v37 = vmul.f32 %v1648_v46, %v4850_v28  ;;  %v1663_v56 = vmul.f32 %v1660_v13, %v4851_v54  ;;  %v4384_v33 = vmul.f32 %v2533_v41, %v4262_v45  ;;  %v4855_v45 = vld [vmem:[#allocation64_spill] sm:$0xff]  ;;  %v4856_v21 = vld [vmem:[#allocation13_spill] sm:$0xff] }
 0x1bc   :  { %v1666_v27 = vadd.f32 %v1662_v35, %v1654_v26  ;;  %v4386_v55 = vadd.f32 %v1520_v3, %v1512_v31  ;;  %v1675_v20 = vmul.f32 %v1672_v22, %v4852_v30  ;;  %v1643_v9 = vadd.f32 %v1639_v61, %v1631_v16  ;;  %v4857_v31 = vld [vmem:[#allocation14_spill] sm:$0xff]  ;;  %v4861_v30 = vld [vmem:[#allocation19_spill] sm:$0xff] }
 0x1bd   :  { %v1509_v32 = vmul.f32 %v1506_v42, %v4853_v11  ;;  %v1687_v15 = vmul.f32 %v1684_v1, %v4136_v17  ;;  %v1521_v60 = vmul.f32 %v1518_v25, %v4141_v0  ;;  %1814 = vst [vmem:[#allocation4 + $0x10] sm:$0xff] %v4384_v33  ;;  %v1632_v39 = vmul.f32 %v4330_v59, %v4854_v43 }
 0x1be   :  { %v1678_v50 = vadd.f32 %v1674_v48, %v1666_v27  ;;  %v1640_v35 = vmul.f32 %v4334_v19, %v4855_v45  ;;  %v1652_v2 = vmul.f32 %v1648_v46, %v4856_v21  ;;  %v1655_v3 = vadd.f32 %v1651_v37, %v1643_v9  ;;  %v4860_v37 = vld [vmem:[#allocation17_spill] sm:$0xff]  ;;  %v4862_v9 = vld [vmem:[#allocation48_spill] sm:$0xff]  ;;  %v4865_v21 = vld [vmem:[#allocation22_spill] sm:$0xff] }
 0x1bf   :  { %v1513_v26 = vadd.f32 %v1509_v32, %v1501_v24  ;;  %v1664_v40 = vmul.f32 %v1660_v13, %v4857_v31  ;;  %v1676_v16 = vmul.f32 %v1672_v22, %v4145_v53  ;;  %v1510_v0 = vmul.f32 %v1506_v42, %v4149_v14  ;;  %v4858_v14 = vld [vmem:[#allocation65_spill] sm:$0xff]  ;;  %v4866_v31 = vld [vmem:[#allocation91_spill] sm:$0xff] }
 0x1c0   :  { %v1690_v17 = vadd.f32 %v1686_v36, %v1678_v50  ;;  %v1644_v41 = vadd.f32 %v1640_v35, %v1632_v39  ;;  %v1688_v48 = vmul.f32 %v1684_v1, %v4153_v58  ;;  %v1667_v57 = vadd.f32 %v1663_v56, %v1655_v3 }
 0x1c1   :  { %v4402_v61 = vadd.f32 %v1521_v60, %v1513_v26  ;;  %v1522_v59 = vmul.f32 %v1518_v25, %v4157_v5  ;;  %v1818_v19 = vrot.slane %v4384_v33, %v4809_v51  ;;  %v1514_v24 = vadd.f32 %v1510_v0, %v1502_v10  ;;  %v4859_v10 = vld [vmem:[#allocation66_spill] sm:$0xff]  ;;  %v4868_v0 = vld [vmem:[#allocation93_spill] sm:$0xff] }
 0x1c2   :  { %v1656_v46 = vadd.f32 %v1652_v2, %v1644_v41  ;;  %v1826_v13 = vrot.slane %v4384_v33, %v4810_v34  ;;  %v1838_v53 = vrot.slane %v4384_v33, %v4811_v52  ;;  %v1679_v22 = vadd.f32 %v1675_v20, %v1667_v57 }
 0x1c3   :  { %v1819_v42 = vmul.f32 %v1818_v19, %v4858_v14  ;;  %v1850_v58 = vrot.slane %v4384_v33, %v4814_v7  ;;  %v1862_v5 = vrot.slane %v4384_v33, %v4815_v12  ;;  %v4416_v36 = vadd.f32 %v1522_v59, %v1514_v24 }
 0x1c4   :  { %v2535_v1 = vpop.eup %2534  ;;  %v1668_v25 = vadd.f32 %v1664_v40, %v1656_v46  ;;  %v1827_v28 = vmul.f32 %v1826_v13, %v4859_v10  ;;  %v1839_v54 = vmul.f32 %v1838_v53, %v4860_v37  ;;  %v1691_v27 = vadd.f32 %v1687_v15, %v1679_v22  ;;  %v4864_v15 = vld [vmem:[#allocation77_spill] sm:$0xff]  ;;  %v4869_v46 = vld [vmem:[#allocation23_spill] sm:$0xff]  ;;  %v4873_v37 = vld [vmem:[#allocation96_spill] sm:$0xff] }
 0x1c5   :  { %v4421_v56 = vmul.f32 %v2535_v1, %v4313_v4  ;;  %v1851_v20 = vmul.f32 %v1850_v58, %v4861_v30  ;;  %v1863_v11 = vmul.f32 %v1862_v5, %v4862_v9  ;;  %v1696_v50 = vrot.slane %v4319_v23, %v4841_v44  ;;  %v4863_v4 = vld [vmem:[#allocation76_spill] sm:$0xff]  ;;  %v4870_v22 = vld [vmem:[#allocation69_spill] sm:$0xff]  ;;  %v4871_v1 = vld [vmem:[#allocation94_spill] sm:$0xff] }
 0x1c6   :  { %v1680_v32 = vadd.f32 %v1676_v16, %v1668_v25  ;;  %v1831_v60 = vadd.f32 %v1827_v28, %v1819_v42  ;;  %v1874_v43 = vrot.slane %v4384_v33, %v4816_v63  ;;  %v1708_v39 = vrot.slane %v4319_v23, %v4842_v47  ;;  %v4867_v16 = vld [vmem:[#allocation92_spill] sm:$0xff]  ;;  %v4872_v10 = vld [vmem:[#allocation95_spill] sm:$0xff] }
 0x1c7   :  { %2004 = vst [vmem:[#allocation4 + $0x18] sm:$0xff] %v4421_v56  ;;  %v1820_v45 = vmul.f32 %v1818_v19, %v4863_v4  ;;  %v1828_v35 = vmul.f32 %v1826_v13, %v4864_v15  ;;  %v1840_v2 = vmul.f32 %v1838_v53, %v4865_v21  ;;  %v1697_v40 = vmul.f32 %v1696_v50, %v4866_v31  ;;  %v4874_v30 = vld [vmem:[#allocation8_spill] sm:$0xff] }
 0x1c8   :  { %v1692_v3 = vadd.f32 %v1688_v48, %v1680_v32  ;;  %v1843_v26 = vadd.f32 %v1839_v54, %v1831_v60  ;;  %v1875_v41 = vmul.f32 %v1874_v43, %v4867_v16  ;;  %v1709_v57 = vmul.f32 %v1708_v39, %v4868_v0  ;;  %v4875_v32 = vld [vmem:[#allocation10_spill] sm:$0xff] }
 0x1c9   :  { %v1832_v59 = vadd.f32 %v1828_v35, %v1820_v45  ;;  %v1852_v24 = vmul.f32 %v1850_v58, %v4869_v46  ;;  %v1864_v14 = vmul.f32 %v1862_v5, %v4870_v22  ;;  %v1701_v42 = vadd.f32 %v1697_v40, %v4377_v8  ;;  %v4876_v35 = vld [vmem:[#allocation26_spill] sm:$0xff]  ;;  %v4877_v8 = vld [vmem:[#allocation27_spill] sm:$0xff]  ;;  %v4878_v40 = vld [vmem:[#allocation9_spill] sm:$0xff] }
 0x1ca   :  { %v1855_v23 = vadd.f32 %v1851_v20, %v1843_v26  ;;  %v1698_v25 = vmul.f32 %v1696_v50, %v4871_v1  ;;  %v1876_v28 = vmul.f32 %v1874_v43, %v4872_v10  ;;  %v1710_v54 = vmul.f32 %v1708_v39, %v4873_v37  ;;  %v4880_v22 = vld [vmem:[#allocation99_spill] sm:$0xff]  ;;  %v4884_v37 = vld [vmem:[#allocation30_spill] sm:$0xff] }
 0x1cb   :  { %v1844_v48 = vadd.f32 %v1840_v2, %v1832_v59  ;;  %v1821_v9 = vmul.f32 %v1818_v19, %v4874_v30  ;;  %v1829_v60 = vmul.f32 %v1826_v13, %v4875_v32  ;;  %v4446_v45 = vadd.f32 %v1709_v57, %v1701_v42  ;;  %v4879_v59 = vld [vmem:[#allocation97_spill] sm:$0xff]  ;;  %v4881_v57 = vld [vmem:[#allocation98_spill] sm:$0xff] }
 0x1cc   :  { %v1867_v4 = vadd.f32 %v1863_v11, %v1855_v23  ;;  %v1702_v15 = vadd.f32 %v1698_v25, %v1690_v17  ;;  %v1841_v21 = vmul.f32 %v1838_v53, %v4876_v35  ;;  %v1853_v31 = vmul.f32 %v1850_v58, %v4877_v8  ;;  %v4882_v17 = vld [vmem:[#allocation11_spill] sm:$0xff] }
 0x1cd   :  { %v1856_v20 = vadd.f32 %v1852_v24, %v1844_v48  ;;  %v1833_v26 = vadd.f32 %v1829_v60, %v1821_v9  ;;  %v1865_v16 = vmul.f32 %v1862_v5, %v4878_v40  ;;  %v1699_v46 = vmul.f32 %v1696_v50, %v4879_v59  ;;  %v4883_v24 = vld [vmem:[#allocation16_spill] sm:$0xff]  ;;  %v4885_v9 = vld [vmem:[#allocation31_spill] sm:$0xff] }
 0x1ce   :  { %v1879_v0 = vadd.f32 %v1875_v41, %v1867_v4  ;;  %v4451_v2 = vadd.f32 %v1710_v54, %v1702_v15  ;;  %v1877_v1 = vmul.f32 %v1874_v43, %v4880_v22  ;;  %v1711_v23 = vmul.f32 %v1708_v39, %v4881_v57  ;;  %v4886_v60 = vld [vmem:[#allocation100_spill] sm:$0xff]  ;;  %v4887_v15 = vld [vmem:[#allocation101_spill] sm:$0xff] }
 0x1cf   :  { %v1868_v10 = vadd.f32 %v1864_v14, %v1856_v20  ;;  %v1845_v11 = vadd.f32 %v1841_v21, %v1833_v26  ;;  %v1822_v42 = vmul.f32 %v1818_v19, %v4882_v17  ;;  %v1703_v25 = vadd.f32 %v1699_v46, %v1691_v27  ;;  %v4888_v21 = vld [vmem:[#allocation102_spill] sm:$0xff]  ;;  %v4889_v26 = vld [vmem:[#allocation103_spill] sm:$0xff]  ;;  %v4892_v46 = vld [vmem:[#allocation36_spill] sm:$0xff] }
 0x1d0   :  { %v1830_v48 = vmul.f32 %v1826_v13, %v4883_v24  ;;  %v1842_v30 = vmul.f32 %v1838_v53, %v4884_v37  ;;  %v1854_v32 = vmul.f32 %v1850_v58, %v4885_v9  ;;  %v1866_v4 = vmul.f32 %v1862_v5, %v4886_v60  ;;  %v4893_v22 = vld [vmem:[#allocation84_spill] sm:$0xff] }
 0x1d1   :  { %v1880_v41 = vadd.f32 %v1876_v28, %v1868_v10  ;;  %v1857_v54 = vadd.f32 %v1853_v31, %v1845_v11  ;;  %v1700_v35 = vmul.f32 %v1696_v50, %v4887_v15  ;;  %v4462_v8 = vadd.f32 %v1711_v23, %v1703_v25  ;;  %v4894_v11 = vld [vmem:[#allocation105_spill] sm:$0xff]  ;;  %v4895_v17 = vld [vmem:[#allocation24_spill] sm:$0xff]  ;;  %v4900_v15 = vld [vmem:[#allocation107_spill] sm:$0xff] }
 0x1d2   :  { %v1834_v14 = vadd.f32 %v1830_v48, %v1822_v42  ;;  %v1878_v20 = vmul.f32 %v1874_v43, %v4888_v21  ;;  %v1712_v19 = vmul.f32 %v1708_v39, %v4889_v26  ;;  %v2008_v13 = vrot.slane %v4421_v56, %v4809_v51  ;;  %v4896_v25 = vld [vmem:[#allocation25_spill] sm:$0xff]  ;;  %v4898_v9 = vld [vmem:[#allocation104_spill] sm:$0xff] }
 0x1d3   :  { %v1869_v27 = vadd.f32 %v1865_v16, %v1857_v54  ;;  %v1704_v40 = vadd.f32 %v1700_v35, %v1692_v3  ;;  %v2016_v53 = vrot.slane %v4421_v56, %v4810_v34  ;;  %v2028_v5 = vrot.slane %v4421_v56, %v4811_v52  ;;  %v4890_v3 = vld [vmem:[#allocation20_spill] sm:$0xff]  ;;  %v4891_v16 = vld [vmem:[#allocation21_spill] sm:$0xff]  ;;  %v4899_v54 = vld [vmem:[#allocation106_spill] sm:$0xff] }
 0x1d4   :  { %v1846_v58 = vadd.f32 %v1842_v30, %v1834_v14  ;;  %v2040_v50 = vrot.slane %v4421_v56, %v4814_v7  ;;  %v2052_v43 = vrot.slane %v4421_v56, %v4815_v12  ;;  %v2009_v31 = vmul.f32 %v2008_v13, %v4890_v3  ;;  %v4897_v48 = vld [vmem:[#allocation85_spill] sm:$0xff]  ;;  %v4904_v3 = vld [vmem:[#allocation111_spill] sm:$0xff] }
 0x1d5   :  { %v1881_v28 = vadd.f32 %v1877_v1, %v1869_v27  ;;  %v4476_v39 = vadd.f32 %v1712_v19, %v1704_v40  ;;  %v2017_v51 = vmul.f32 %v2016_v53, %v4891_v16  ;;  %v2029_v34 = vmul.f32 %v2028_v5, %v4892_v46  ;;  %v4902_v19 = vld [vmem:[#allocation108_spill] sm:$0xff]  ;;  %v4903_v40 = vld [vmem:[#allocation109_spill] sm:$0xff] }
 0x1d6   :  { %v1858_v59 = vadd.f32 %v1854_v32, %v1846_v58  ;;  %v2041_v10 = vmul.f32 %v2040_v50, %v4893_v22  ;;  %v2053_v52 = vmul.f32 %v2052_v43, %v4894_v11  ;;  %v1886_v7 = vrot.slane %v4384_v33, %v4841_v44  ;;  %v4906_v46 = vld [vmem:[#allocation28_spill] sm:$0xff]  ;;  %v4907_v22 = vld [vmem:[#allocation29_spill] sm:$0xff] }
 0x1d7   :  { %v2021_v57 = vadd.f32 %v2017_v51, %v2009_v31  ;;  %v2064_v12 = vrot.slane %v4421_v56, %v4816_v63  ;;  %v1898_v1 = vrot.slane %v4384_v33, %v4842_v47  ;;  %v2010_v42 = vmul.f32 %v2008_v13, %v4895_v17  ;;  %v4901_v63 = vld [vmem:[#allocation86_spill] sm:$0xff]  ;;  %v4908_v17 = vld [vmem:[#allocation87_spill] sm:$0xff] }
 0x1d8   :  { %v1870_v23 = vadd.f32 %v1866_v4, %v1858_v59  ;;  %v2018_v24 = vmul.f32 %v2016_v53, %v4896_v25  ;;  %v2030_v37 = vmul.f32 %v2028_v5, %v4897_v48  ;;  %v1887_v32 = vmul.f32 %v1886_v7, %v4898_v9  ;;  %v4905_v51 = vld [vmem:[#allocation110_spill] sm:$0xff]  ;;  %v4910_v48 = vld [vmem:[#allocation113_spill] sm:$0xff] }
 0x1d9   :  { %v2033_v30 = vadd.f32 %v2029_v34, %v2021_v57  ;;  %v2065_v60 = vmul.f32 %v2064_v12, %v4899_v54  ;;  %v1899_v35 = vmul.f32 %v1898_v1, %v4900_v15  ;;  %v2042_v26 = vmul.f32 %v2040_v50, %v4901_v63  ;;  %v4912_v15 = vld [vmem:[#allocation114_spill] sm:$0xff] }
 0x1da   :  { %v1882_v14 = vadd.f32 %v1878_v20, %v1870_v23  ;;  %v2022_v21 = vadd.f32 %v2018_v24, %v2010_v42  ;;  %v2054_v33 = vmul.f32 %v2052_v43, %v4902_v19  ;;  %v1891_v27 = vadd.f32 %v1887_v32, %v1879_v0  ;;  %v4909_v0 = vld [vmem:[#allocation88_spill] sm:$0xff] }
 0x1db   :  { %v2045_v4 = vadd.f32 %v2041_v10, %v2033_v30  ;;  %v1888_v58 = vmul.f32 %v1886_v7, %v4903_v40  ;;  %v2066_v31 = vmul.f32 %v2064_v12, %v4904_v3  ;;  %v1900_v59 = vmul.f32 %v1898_v1, %v4905_v51  ;;  %v4911_v32 = vld [vmem:[#allocation112_spill] sm:$0xff]  ;;  %v4917_v3 = vld [vmem:[#allocation33_spill] sm:$0xff] }
 0x1dc   :  { %v2034_v16 = vadd.f32 %v2030_v37, %v2022_v21  ;;  %v2011_v34 = vmul.f32 %v2008_v13, %v4906_v46  ;;  %v2019_v11 = vmul.f32 %v2016_v53, %v4907_v22  ;;  %v4502_v20 = vadd.f32 %v1899_v35, %v1891_v27  ;;  %v4918_v51 = vld [vmem:[#allocation89_spill] sm:$0xff] }
 0x1dd   :  { %v2057_v57 = vadd.f32 %v2053_v52, %v2045_v4  ;;  %v1892_v23 = vadd.f32 %v1888_v58, %v1880_v41  ;;  %v2031_v42 = vmul.f32 %v2028_v5, %v4908_v17  ;;  %v2043_v24 = vmul.f32 %v2040_v50, %v4909_v0  ;;  %v4913_v52 = vld [vmem:[#allocation115_spill] sm:$0xff]  ;;  %v4921_v17 = vld [vmem:[#allocation116_spill] sm:$0xff] }
 0x1de   :  { %v2046_v25 = vadd.f32 %v2042_v26, %v2034_v16  ;;  %v2023_v10 = vadd.f32 %v2019_v11, %v2011_v34  ;;  %v2055_v30 = vmul.f32 %v2052_v43, %v4910_v48  ;;  %v1889_v54 = vmul.f32 %v1886_v7, %v4911_v32  ;;  %v4914_v4 = vld [vmem:[#allocation83_spill] sm:$0xff]  ;;  %v4916_v26 = vld [vmem:[#allocation32_spill] sm:$0xff]  ;;  %v4919_v34 = vld [vmem:[#allocation90_spill] sm:$0xff] }
 0x1df   :  { %v2069_v9 = vadd.f32 %v2065_v60, %v2057_v57  ;;  %v1904_v37 = vadd.f32 %v1900_v59, %v1892_v23  ;;  %v2067_v21 = vmul.f32 %v2064_v12, %v4912_v15  ;;  %v1901_v35 = vmul.f32 %v1898_v1, %v4913_v52  ;;  %v4915_v41 = vld [vmem:[#allocation67_spill] sm:$0xff]  ;;  %v4926_v32 = vld [vmem:[#allocation73_spill] sm:$0xff] }
 0x1e0   :  { %v2058_v63 = vadd.f32 %v2054_v33, %v2046_v25  ;;  %v2035_v19 = vadd.f32 %v2031_v42, %v2023_v10  ;;  %v1118_v27 = vadd.f32 %v4915_v41, %v4914_v4  ;;  %v1893_v40 = vadd.f32 %v1889_v54, %v1881_v28  ;;  %v4920_v23 = vld [vmem:[#allocation15_spill] sm:$0xff]  ;;  %v4922_v25 = vld [vmem:[#allocation70_spill] sm:$0xff]  ;;  %v4927_v41 = vld [vmem:[#allocation81_spill] sm:$0xff] }
 0x1e1   :  { %v2012_v58 = vmul.f32 %v2008_v13, %v4916_v26  ;;  %v2020_v16 = vmul.f32 %v2016_v53, %v4917_v3  ;;  %v2032_v46 = vmul.f32 %v2028_v5, %v4918_v51  ;;  %v2044_v22 = vmul.f32 %v2040_v50, %v4919_v34  ;;  %v4923_v13 = vld [vmem:[#allocation68_spill] sm:$0xff]  ;;  %v4924_v53 = vld [vmem:[#allocation18_spill] sm:$0xff]  ;;  %v4925_v48 = vld [vmem:[#allocation71_spill] sm:$0xff] }
 0x1e2   :  { %v2070_v60 = vadd.f32 %v2066_v31, %v2058_v63  ;;  %v2047_v59 = vadd.f32 %v2043_v24, %v2035_v19  ;;  %v2056_v11 = vmul.f32 %v2052_v43, %v1118_v27  ;;  %v1905_v57 = vadd.f32 %v1901_v35, %v1893_v40  ;;  %v4928_v27 = vld [vmem:[#allocation75_spill] sm:$0xff] }
 0x1e3   :  { %v2024_v33 = vadd.f32 %v2020_v16, %v2012_v58  ;;  %v1303_v42 = vadd.f32 %v4921_v17, %v4920_v23  ;;  %v1120_v10 = vadd.f32 %v4922_v25, %v4914_v4  ;;  %v1305_v0 = vadd.f32 %v4923_v13, %v4920_v23 }
 0x1e4   :  { %v2059_v28 = vadd.f32 %v2055_v30, %v2047_v59  ;;  %v1309_v5 = vadd.f32 %v4925_v48, %v4924_v53  ;;  %v2076_v31 = vrot.slane %v4421_v56, %v4841_v44  ;;  %v1311_v54 = vadd.f32 %v4926_v32, %v4924_v53 }
 0x1e5   :  { %v2036_v50 = vadd.f32 %v2032_v46, %v2024_v33  ;;  %v1890_v43 = vmul.f32 %v1886_v7, %v1303_v42  ;;  %v2068_v24 = vmul.f32 %v2064_v12, %v1120_v10  ;;  %v1902_v63 = vmul.f32 %v1898_v1, %v1305_v0  ;;  %v4929_v12 = vld [vmem:[#allocation82_spill] sm:$0xff] }
 0x1e6   :  { %v2071_v15 = vadd.f32 %v2067_v21, %v2059_v28  ;;  %v2077_v19 = vmul.f32 %v2076_v31, %v1309_v5  ;;  %v2088_v30 = vrot.slane %v4421_v56, %v4842_v47  ;;  %v1315_v40 = vadd.f32 %v4928_v27, %v4927_v41 }
 0x1e7   :  { %v2048_v52 = vadd.f32 %v2044_v22, %v2036_v50  ;;  %v1894_v35 = vadd.f32 %v1890_v43, %v1882_v14  ;;  %v1317_v44 = vadd.f32 %v4311_v49, %v4927_v41  ;;  %v1321_v58 = vadd.f32 %v4322_v62, %v4929_v12 }
 0x1e8   :  { %v2081_v26 = vadd.f32 %v2077_v19, %v2069_v9  ;;  %v2089_v7 = vmul.f32 %v2088_v30, %v1311_v54  ;;  %v1323_v1 = vadd.f32 %v4325_v18, %v4929_v12  ;;  %v2078_v16 = vmul.f32 %v2076_v31, %v1315_v40 }
 0x1e9   :  { %v2060_v21 = vadd.f32 %v2056_v11, %v2048_v52  ;;  %v1906_v3 = vadd.f32 %v1902_v63, %v1894_v35  ;;  %v2090_v47 = vmul.f32 %v2088_v30, %v1317_v44  ;;  %v2079_v14 = vmul.f32 %v2076_v31, %v1321_v58 }
 0x1ea   :  { %v2093_v56 = vadd.f32 %v2089_v7, %v2081_v26  ;;  %v2091_v51 = vmul.f32 %v2088_v30, %v1323_v1  ;;  %v1327_v46 = vadd.f32 %v4345_v6, %v4914_v4  ;;  %v2082_v49 = vadd.f32 %v2078_v16, %v2070_v60 }
 0x1eb   :  { %v2072_v59 = vadd.f32 %v2068_v24, %v2060_v21  ;;  %v1329_v9 = vadd.f32 %v4348_v29, %v4914_v4  ;;  %v2480_v62 = vpack.c.bf16 %v4386_v55, %v4371_v38  ;;  %v2083_v34 = vadd.f32 %v2079_v14, %v2071_v15 }
 0x1ec   :  { %v2080_v18 = vmul.f32 %v2076_v31, %v1327_v46  ;;  %v2484_v22 = vpack.c.bf16 %v4416_v36, %v4402_v61  ;;  %v2488_v11 = vpack.c.bf16 %v4451_v2, %v4446_v45  ;;  %v2094_v33 = vadd.f32 %v2090_v47, %v2082_v49  ;;  %v2098_v36 = vld [vmem:[%s4596_s6 + $0x8] sm:$0xff]  ;;  %v2099_v45 = vld [vmem:[%s4596_s6 + $0x10] sm:$0xff]  ;;  %v2100_v2 = vld [vmem:[%s4596_s6 + $0x18] sm:$0xff] }
 0x1ed   :  { %v2092_v23 = vmul.f32 %v2088_v30, %v1329_v9  ;;  %2481 = vmatprep.subr.bf16.mxu1 %v2480_v62  ;;  %v2492_v6 = vpack.c.bf16 %v4476_v39, %v4462_v8  ;;  %v2496_v60 = vpack.c.bf16 %v1904_v37, %v4502_v20  ;;  %v2095_v29 = vadd.f32 %v2091_v51, %v2083_v34 }
 0x1ee   :  { %v2084_v4 = vadd.f32 %v2080_v18, %v2072_v59  ;;  %2483 = vmatpush3.bf16.msra.mxu1 %v2480_v62  ;;  %v2500_v38 = vpack.c.bf16 %v1906_v3, %v1905_v57  ;;  %v2504_v55 = vpack.c.bf16 %v2094_v33, %v2093_v56 }
 0x1ef   :  { %2485 = vmatprep.subr.bf16.mxu1 %v2484_v22 }
 0x1f0   :  { %v2096_v17 = vadd.f32 %v2092_v23, %v2084_v4 }
 0x1f2   :  { %2487 = vmatpush3.bf16.msra.mxu1 %v2484_v22  ;;  %v2508_v61 = vpack.c.bf16 %v2096_v17, %v2095_v29 }
 0x1f3   :  { %2489 = vmatprep.subr.bf16.mxu1 %v2488_v11 }
 0x1f6   :  { %2491 = vmatpush3.bf16.msra.mxu1 %v2488_v11 }
 0x1f7   :  { %2493 = vmatprep.subr.bf16.mxu1 %v2492_v6 }
 0x1fa   :  { %2495 = vmatpush3.bf16.msra.mxu1 %v2492_v6 }
 0x1fb   :  { %2497 = vmatprep.subr.bf16.mxu1 %v2496_v60 }
 0x1fe   :  { %2499 = vmatpush3.bf16.msra.mxu1 %v2496_v60 }
 0x1ff   :  { %2501 = vmatprep.subr.bf16.mxu1 %v2500_v38 }
 0x202   :  { %2503 = vmatpush3.bf16.msra.mxu1 %v2500_v38 }
 0x203   :  { %2505 = vmatprep.subr.bf16.mxu1 %v2504_v55 }
 0x206   :  { %2507 = vmatpush3.bf16.msra.mxu1 %v2504_v55 }
 0x207   :  { %2509 = vmatprep.subr.bf16.mxu1 %v2508_v61 }
 0x20a   :  { %2511 = vmatpush3.bf16.msra.mxu1 %v2508_v61 }
 0x20d   :  { %2435 = vmatmul.mubr.f32.vlgmr.msra.gmra.mrb[96].mxu1 %v2098_v36 }
 0x20e   :  { %2437 = vmatprep.mubr.f32.mxu1 %v2099_v45 }
 0x211   :  { %2438 = vmatmul.mubr.f32.gmra.mrb[98].mxu1 %v2100_v2 }
 0x212   :  { %2547 = shalt.err (!%p2544_p4)
}
 0x213   :  { %s2548_s14 = scalar_lea.hbm %s4599_s9, 512 }
 0x214   :  { %p2549_p5 = scmp.ne.s32.totalorder %s4599_s9, %s2548_s14  ;;  %p2552_p6 = scmp.lt.u32.totalorder %s2548_s14, %s4599_s9 }
 0x216   :  { %p2554_p7 = pnand %p2552_p6, %p2549_p5 }
 0x218   :  { %2557 = shalt.err (!%p2554_p7)
}
 0x219   :  { %s2587_s17 = smov 128   ;;  %s2588_s18 = smov 8   ;;  %v2113_v8 = vpop.permute.xlu1 %2112  ;;  %v2108_v39 = vpop.permute.xlu0 %2107 }
 0x21a   :  { %2237 = dma.vmem_to_hbm [thread:$0]  %s2232_s0, 512, %s4599_s9, [#allocation5], %s2587_s17, %s2587_s17, %s2588_s18  }
 0x21b   :  { %s2589_s20 = smov [#allocation2]  }
 0x21c   :  { %s2219_s21 = sshll.u32 %s2589_s20, 4  ;;  %s2220_s21 = int_to_ptr.vmem [resolvable:$true] %s2219_s21 }
 0x21d   :  { %v2123_v25 = vpop.permute.xlu1 %2122  ;;  %v2118_v28 = vpop.permute.xlu0 %2117  ;;  %s2558_s9 = scalar_lea.vmem %s2220_s21, 512  ;;  %p2563_p9 = scmp.lt.s32.totalorder %s2220_s21, %s2220_s21 }
 0x21e   :  { %p2559_p8 = scmp.ne.s32.totalorder %s2220_s21, %s2558_s9  ;;  %p2564_p10 = scmp.lt.s32.totalorder %s2558_s9, %s2558_s9 }
 0x220   :  { %p2565_p11 = por %p2564_p10, %p2563_p9 }
 0x222   :  { %p2566_p12 = pnand %p2565_p11, %p2559_p8 }
 0x2e0   :  { %v2436_v20 = vpop.f32.mrb[96].mxu1 }
 0x2e1   :  { %v2197_v37 = vadd.f32 %v2436_v20, %v2113_v8  ;;  %v2191_v57 = vpop.f32.mrb[97].mxu1 }
 0x2e2   :  { %v2192_v42 = vadd.f32 %v2191_v57, %v2108_v39 }
 0x2e3   :  { %2211 = vst [vmem:[#allocation2 + $0x8] sm:$0xff] %v2197_v37 }
 0x2e4   :  { %2210 = vst [vmem:[#allocation2] sm:$0xff] %v2192_v42  ;;  %v2439_v10 = vpop.f32.mrb[98].mxu1 }
 0x2e5   :  { %v2207_v13 = vadd.f32 %v2439_v10, %v2123_v25  ;;  %v2201_v0 = vpop.f32.mrb[99].mxu1 }
 0x2e6   :  { %v2202_v53 = vadd.f32 %v2201_v0, %v2118_v28 }
 0x2e7   :  { %2213 = vst [vmem:[#allocation2 + $0x18] sm:$0xff] %v2207_v13 }
 0x2e8   :  { %2212 = vst [vmem:[#allocation2 + $0x10] sm:$0xff] %v2202_v53 }
 0x2e9   :  { %2569 = shalt.err (!%p2566_p12)
}
 0x2ea   :  { %s2570_s24 = scalar_lea.hbm %s4598_s8, 512 }
 0x2eb   :  { %p2571_p13 = scmp.ne.s32.totalorder %s4598_s8, %s2570_s24  ;;  %p2574_p0 = scmp.lt.u32.totalorder %s2570_s24, %s4598_s8 }
 0x2ed   :  { %p2576_p1 = pnand %p2574_p0, %p2571_p13 }
 0x2ef   :  { %2579 = shalt.err (!%p2576_p1)
}
 0x2f0   :  { %2225 = dma.vmem_to_hbm [thread:$0]  %s2220_s21, 512, %s4598_s8, [#allocation3], %s2587_s17, %s2587_s17, %s2588_s18  }
 0x2f1   :  { %2580 = dma.done.wait [#allocation3], 512  }
 0x2f2   :  { %2581 = vsyncadd [#allocation3], 4294966784 }
 0x2f3   :  { %2582 = dma.done.wait [#allocation5], 512  }
 0x2f4   :  { %2583 = vsyncadd [#allocation5], 4294966784 }
 0x2f5   :  { %2244 = vsyncpa [#allocation3], 1 }
 0x2f6   :  { %2245 = vsyncpa [#allocation5], 1 }

</bundles_post_ra>
